<compile_context>
chip_gen: v6e
topology: v6e:2x2x1
jax: 0.10.0
libtpu: 0.0.40
codegen_flags: <defaults>
</compile_context>

<pallas_src>
import jax
import jax.numpy as jnp
from jax.experimental import pallas as pl
from jax.experimental.pallas import tpu as pltpu

K = 3        # kernel size
STRIDE = 2
PAD = 2
OUT_PAD = 3
TH = 16      # output-row tile per phase (row parity)


def convt_hardswish_kernel(xs_ref, w_ref, b_ref, o_ref, acc_ref):
    """One (row-parity, row-tile) step.

    xs_ref : (H_tot+1, W, 2*C_in)      bf16  -- channels = (dc shift, ci)
    w_ref  : (4, 2*C_in, 2*C_out)      bf16  -- [2*ph + dr], K=(dc,ci), N=(pw,co)
    b_ref  : (1, 2*C_out)              f32   -- bias duplicated per W-parity
    o_ref  : (TH, 1, W, 2*C_out)       f32   -- block (row tile i, row parity ph)
    acc_ref: (TH*W, 2*C_out)           f32   -- VMEM scratch accumulator
    """
    th = o_ref.shape[0]
    w = o_ref.shape[2]
    c_out = o_ref.shape[3] // 2
    k2 = xs_ref.shape[2]                      # 2 * C_in

    ph = pl.program_id(0)
    r0 = pl.program_id(1) * th

    # Two K-concatenated (dc-fused), W-parity-fused matmuls; pure chained MXU
    # accumulation into scratch (no VPU math interleaved).  Patch reshapes are
    # layout-preserving (W=16 rows == one bf16 sublane tile).
    p0 = xs_ref[pl.ds(r0, th), :, :].reshape(th * w, k2)       # dr = 0
    p1 = xs_ref[pl.ds(r0 + 1, th), :, :].reshape(th * w, k2)   # dr = 1
    acc_ref[...] = jnp.dot(p0, w_ref[2 * ph], preferred_element_type=jnp.float32)
    acc_ref[...] += jnp.dot(p1, w_ref[2 * ph + 1], preferred_element_type=jnp.float32)

    # Epilogue in two lane-aligned halves (one per output W-parity) to bound live
    # vregs.  The store is already in the phase-interleaved HBM layout.
    for pw in range(2):
        sl = slice(pw * c_out, (pw + 1) * c_out)
        v1 = acc_ref[:, sl] + b_ref[:, sl]                      # + bias
        v4 = jnp.clip(v1 + 3.0, 0.0, 6.0)                       # clamp(v1+3, 0, 6)
        out = jnp.clip(v1 * v4 * (1.0 / 6.0), 0.0, 6.0)         # relu6(v1*v4/6)
        o_ref[:, :, :, sl] = out.reshape(th, 1, w, c_out)       # layout-preserving


def _tap_kh(parity, d):
    """Kernel index used by output parity `parity` at input offset d in {0,1}."""
    if parity == 0:
        return 2 * d                      # even outputs use taps {0, 2}
    return 1 if d == 1 else None          # odd outputs only use tap 1


@jax.jit
def model_forward(x_nchw, w_pt, bias):
    """x_nchw: (1, C_in, H, W); w_pt: (C_in, C_out, K, K) PyTorch ConvT layout; bias: (C_out,)."""
    n, c_in, h, w = x_nchw.shape
    assert n == 1
    c_out = w_pt.shape[1]
    h_out = (h - 1) * STRIDE - 2 * PAD + K + OUT_PAD
    w_out = (w - 1) * STRIDE - 2 * PAD + K + OUT_PAD
    assert h_out == 2 * h and w_out == 2 * w          # holds for the fixed hyperparams

    # ---- phase/parity-combined weights (bf16) --------------------------------
    # ConvTranspose weight -> equivalent cross-correlation weight:
    #   w_conv[kh, kw, ci, co] = w_pt[ci, co, K-1-kh, K-1-kw]
    w_conv = jnp.transpose(w_pt[:, :, ::-1, ::-1], (2, 3, 0, 1)).astype(jnp.bfloat16)
    zero_tap = jnp.zeros((c_in, c_out), jnp.bfloat16)

    def tap(ph, pw, dr, dc):
        kh, kw = _tap_kh(ph, dr), _tap_kh(pw, dc)
        return zero_tap if (kh is None or kw is None) else w_conv[kh, kw]

    blocks = []
    for ph in range(2):
        for dr in range(2):
            # rows ordered (dc, ci); columns ordered (pw, co)
            kblk = jnp.concatenate(
                [jnp.concatenate([tap(ph, 0, dr, dc), tap(ph, 1, dr, dc)], axis=1)
                 for dc in range(2)],
                axis=0)
            blocks.append(kblk)
    w_comb = jnp.stack(blocks, axis=0)                 # (4, 2*C_in, 2*C_out) bf16

    # ---- channels-last bf16 input, 1 zero row/col, dc shift fused into channels
    x_hwc = jnp.transpose(x_nchw[0], (1, 2, 0)).astype(jnp.bfloat16)     # (H, W, C_in)
    h_pad = -(-h // TH) * TH
    xp = jnp.pad(x_hwc, ((0, h_pad + 1 - h), (0, 1), (0, 0)))
    xs2 = jnp.concatenate([xp[:, 0:w, :], xp[:, 1:w + 1, :]], axis=-1)   # (h_pad+1, W, 2*C_in)

    b2 = jnp.concatenate([bias, bias]).reshape(1, 2 * c_out).astype(jnp.float32)

    n_row_tiles = h_pad // TH
    out_arr = pl.pallas_call(
        convt_hardswish_kernel,
        out_shape=jax.ShapeDtypeStruct((h_pad, 2, w, 2 * c_out), jnp.float32),
        grid_spec=pltpu.PrefetchScalarGridSpec(
            num_scalar_prefetch=0,
            grid=(2, n_row_tiles),
            in_specs=[
                pl.BlockSpec((h_pad + 1, w, 2 * c_in), lambda p, i: (0, 0, 0)),   # resident
                pl.BlockSpec((4, 2 * c_in, 2 * c_out), lambda p, i: (0, 0, 0)),   # resident
                pl.BlockSpec((1, 2 * c_out), lambda p, i: (0, 0)),
            ],
            out_specs=pl.BlockSpec((TH, 1, w, 2 * c_out), lambda p, i: (i, p, 0, 0)),
            scratch_shapes=[pltpu.VMEM((TH * w, 2 * c_out), jnp.float32)],
        ),
        compiler_params=pltpu.CompilerParams(
            dimension_semantics=("parallel", "parallel"),
            vmem_limit_bytes=32 * 1024 * 1024,
        ),
    )(xs2, w_comb, b2)

    # ---- zero-copy interleave: (h, 2, w, 2*c_out) -> (2h, 2w, c_out) ----------
    if h_pad != h:
        out_arr = out_arr[:h]
    out_hwc = out_arr.reshape(h_out, w_out, c_out)
    # Channels-last result is available here; the transpose below exists only to
    # match the PyTorch module's NCHW output layout (drop it if the consumer is NHWC).
    return jnp.transpose(out_hwc, (2, 0, 1))[None]


def reference_forward(x_nchw, w_pt, bias):
    """Pure-XLA reference (lhs-dilated conv) with the same bf16 operand quantization."""
    xq = x_nchw.astype(jnp.bfloat16).astype(jnp.float32)
    wq = w_pt.astype(jnp.bfloat16).astype(jnp.float32)
    pad_lo = K - 1 - PAD
    pad_hi = K - 1 - PAD + OUT_PAD
    w_oihw = jnp.transpose(wq[:, :, ::-1, ::-1], (1, 0, 2, 3))
    v1 = jax.lax.conv_general_dilated(
        xq, w_oihw,
        window_strides=(1, 1),
        padding=((pad_lo, pad_hi), (pad_lo, pad_hi)),
        lhs_dilation=(STRIDE, STRIDE),
        dimension_numbers=("NCHW", "OIHW", "NCHW"),
    ) + bias[None, :, None, None]
    v4 = jnp.clip(v1 + 3.0, 0.0, 6.0)
    return jnp.clip(v1 * v4 / 6.0, 0.0, 6.0)


if __name__ == "__main__":
    # 256 in/out channels are fixed by the module; spatial extent reduced 36x36 -> 16x16.
    C_IN, C_OUT = 256, 256
    H = W = 16

    key = jax.random.PRNGKey(0)
    kx, kw_, kb = jax.random.split(key, 3)
    x1 = jax.random.normal(kx, (1, C_IN, H, W), jnp.float32)
    # PyTorch ConvTranspose2d weight layout: (in_channels, out_channels, kH, kW)
    w_pt = jax.random.normal(kw_, (C_IN, C_OUT, K, K), jnp.float32) * 0.05
    bias = jax.random.normal(kb, (C_OUT,), jnp.float32) * 0.05

    out = jax.block_until_ready(model_forward(x1, w_pt, bias))

    ref = reference_forward(x1, w_pt, bias)
    assert out.shape == ref.shape == (1, C_OUT, 2 * H, 2 * W), (out.shape, ref.shape)
    max_err = float(jnp.max(jnp.abs(out - ref)))
    assert max_err < 5e-3, max_err

    print("KERNEL_OK")
</pallas_src>

<mosaic_0001>
module attributes {stable_mosaic.version = 11 : i64} {
  func.func @convt_hardswish_kernel(%arg0: i32, %arg1: i32, %arg2: memref<17x16x512xbf16, #tpu.memory_space<vmem>>, %arg3: memref<4x512x512xbf16, #tpu.memory_space<vmem>>, %arg4: memref<1x512xf32, #tpu.memory_space<vmem>>, %arg5: memref<16x1x16x512xf32, #tpu.memory_space<vmem>>, %arg6: memref<256x512xf32, #tpu.memory_space<vmem>>) attributes {dimension_semantics = [#tpu.dimension_semantics<parallel>, #tpu.dimension_semantics<parallel>], iteration_bounds = array<i64: 2, 1>, scalar_prefetch = 0 : i64, scratch_operands = 1 : i64, tpu.core_type = #tpu.core_type<tc>, window_params = [{pipeline_mode = #tpu.pipeline_mode<synchronous>, transform_indices = @transform_0, window_bounds = array<i64: 17, 16, 512>}, {pipeline_mode = #tpu.pipeline_mode<synchronous>, transform_indices = @transform_1, window_bounds = array<i64: 4, 512, 512>}, {pipeline_mode = #tpu.pipeline_mode<synchronous>, transform_indices = @transform_2, window_bounds = array<i64: 1, 512>}, {transform_indices = @transform_3, window_bounds = array<i64: 16, 1, 16, 512>}]} {
    %c16_i32 = arith.constant 16 : i32
    %0 = arith.muli %arg1, %c16_i32 : i32
    %1 = arith.index_cast %0 : i32 to index
    %c0 = arith.constant 0 : index
    %c0_0 = arith.constant 0 : index
    %2 = vector.load %arg2[%1, %c0, %c0_0] : memref<17x16x512xbf16, #tpu.memory_space<vmem>>, vector<16x16x512xbf16>
    %3 = vector.shape_cast %2 : vector<16x16x512xbf16> to vector<256x512xbf16>
    %c1_i32 = arith.constant 1 : i32
    %4 = arith.addi %0, %c1_i32 : i32
    %5 = arith.index_cast %4 : i32 to index
    %c0_1 = arith.constant 0 : index
    %c0_2 = arith.constant 0 : index
    %6 = vector.load %arg2[%5, %c0_1, %c0_2] : memref<17x16x512xbf16, #tpu.memory_space<vmem>>, vector<16x16x512xbf16>
    %7 = vector.shape_cast %6 : vector<16x16x512xbf16> to vector<256x512xbf16>
    %c2_i32 = arith.constant 2 : i32
    %8 = arith.muli %c2_i32, %arg0 : i32
    %9 = arith.index_cast %8 : i32 to index
    %c0_3 = arith.constant 0 : index
    %c0_4 = arith.constant 0 : index
    %10 = vector.load %arg3[%9, %c0_3, %c0_4] : memref<4x512x512xbf16, #tpu.memory_space<vmem>>, vector<1x512x512xbf16>
    %11 = vector.shape_cast %10 : vector<1x512x512xbf16> to vector<512x512xbf16>
    %cst = arith.constant dense<0.000000e+00> : vector<256x512xf32>
    %12 = tpu.matmul %3, %11, %cst {dimension_numbers = #tpu.dot_dimension_numbers<[1], [0], [0], [1], [0, 0, 1, 1], [], []>} : vector<256x512xbf16>, vector<512x512xbf16>, vector<256x512xf32> -> vector<256x512xf32>
    %c0_5 = arith.constant 0 : index
    %c0_6 = arith.constant 0 : index
    %13 = vector.load %arg6[%c0_5, %c0_6] : memref<256x512xf32, #tpu.memory_space<vmem>>, vector<256x512xf32>
    tpu.vector_store %arg6[%c0_5, %c0_6], %12 {strides = array<i32>} : memref<256x512xf32, #tpu.memory_space<vmem>>, vector<256x512xf32>,
    %c0_7 = arith.constant 0 : index
    %c0_8 = arith.constant 0 : index
    %14 = vector.load %arg6[%c0_7, %c0_8] : memref<256x512xf32, #tpu.memory_space<vmem>>, vector<256x512xf32>
    %c2_i32_9 = arith.constant 2 : i32
    %15 = arith.muli %c2_i32_9, %arg0 : i32
    %c1_i32_10 = arith.constant 1 : i32
    %16 = arith.addi %15, %c1_i32_10 : i32
    %17 = arith.index_cast %16 : i32 to index
    %c0_11 = arith.constant 0 : index
    %c0_12 = arith.constant 0 : index
    %18 = vector.load %arg3[%17, %c0_11, %c0_12] : memref<4x512x512xbf16, #tpu.memory_space<vmem>>, vector<1x512x512xbf16>
    %19 = vector.shape_cast %18 : vector<1x512x512xbf16> to vector<512x512xbf16>
    %cst_13 = arith.constant dense<0.000000e+00> : vector<256x512xf32>
    %20 = tpu.matmul %7, %19, %cst_13 {dimension_numbers = #tpu.dot_dimension_numbers<[1], [0], [0], [1], [0, 0, 1, 1], [], []>} : vector<256x512xbf16>, vector<512x512xbf16>, vector<256x512xf32> -> vector<256x512xf32>
    %21 = arith.addf %14, %20 : vector<256x512xf32>
    %c0_14 = arith.constant 0 : index
    %c0_15 = arith.constant 0 : index
    %22 = vector.load %arg6[%c0_14, %c0_15] : memref<256x512xf32, #tpu.memory_space<vmem>>, vector<256x512xf32>
    tpu.vector_store %arg6[%c0_14, %c0_15], %21 {strides = array<i32>} : memref<256x512xf32, #tpu.memory_space<vmem>>, vector<256x512xf32>,
    %c0_16 = arith.constant 0 : index
    %c0_17 = arith.constant 0 : index
    %23 = vector.load %arg6[%c0_16, %c0_17] : memref<256x512xf32, #tpu.memory_space<vmem>>, vector<256x256xf32>
    %c0_18 = arith.constant 0 : index
    %c0_19 = arith.constant 0 : index
    %24 = vector.load %arg4[%c0_18, %c0_19] : memref<1x512xf32, #tpu.memory_space<vmem>>, vector<1x256xf32>
    %25 = vector.broadcast %24 : vector<1x256xf32> to vector<256x256xf32>
    %26 = arith.addf %23, %25 : vector<256x256xf32>
    %cst_20 = arith.constant 3.000000e+00 : f32
    %27 = vector.broadcast %cst_20 : f32 to vector<256x256xf32>
    %28 = arith.addf %26, %27 : vector<256x256xf32>
    %cst_21 = arith.constant 0.000000e+00 : f32
    %cst_22 = arith.constant 6.000000e+00 : f32
    %29 = vector.broadcast %cst_21 : f32 to vector<256x256xf32>
    %30 = arith.maximumf %29, %28 : vector<256x256xf32>
    %31 = vector.broadcast %cst_22 : f32 to vector<256x256xf32>
    %32 = arith.minimumf %31, %30 : vector<256x256xf32>
    %33 = arith.mulf %26, %32 : vector<256x256xf32>
    %cst_23 = arith.constant 0.166666672 : f32
    %34 = vector.broadcast %cst_23 : f32 to vector<256x256xf32>
    %35 = arith.mulf %33, %34 : vector<256x256xf32>
    %cst_24 = arith.constant 0.000000e+00 : f32
    %cst_25 = arith.constant 6.000000e+00 : f32
    %36 = vector.broadcast %cst_24 : f32 to vector<256x256xf32>
    %37 = arith.maximumf %36, %35 : vector<256x256xf32>
    %38 = vector.broadcast %cst_25 : f32 to vector<256x256xf32>
    %39 = arith.minimumf %38, %37 : vector<256x256xf32>
    %40 = vector.shape_cast %39 : vector<256x256xf32> to vector<16x1x16x256xf32>
    %c0_26 = arith.constant 0 : index
    %c0_27 = arith.constant 0 : index
    %c0_28 = arith.constant 0 : index
    %c0_29 = arith.constant 0 : index
    %41 = vector.load %arg5[%c0_26, %c0_27, %c0_28, %c0_29] : memref<16x1x16x512xf32, #tpu.memory_space<vmem>>, vector<16x1x16x256xf32>
    tpu.vector_store %arg5[%c0_26, %c0_27, %c0_28, %c0_29], %40 {strides = array<i32>} : memref<16x1x16x512xf32, #tpu.memory_space<vmem>>, vector<16x1x16x256xf32>,
    %c0_30 = arith.constant 0 : index
    %c256 = arith.constant 256 : index
    %42 = vector.load %arg6[%c0_30, %c256] : memref<256x512xf32, #tpu.memory_space<vmem>>, vector<256x256xf32>
    %c0_31 = arith.constant 0 : index
    %c256_32 = arith.constant 256 : index
    %43 = vector.load %arg4[%c0_31, %c256_32] : memref<1x512xf32, #tpu.memory_space<vmem>>, vector<1x256xf32>
    %44 = vector.broadcast %43 : vector<1x256xf32> to vector<256x256xf32>
    %45 = arith.addf %42, %44 : vector<256x256xf32>
    %cst_33 = arith.constant 3.000000e+00 : f32
    %46 = vector.broadcast %cst_33 : f32 to vector<256x256xf32>
    %47 = arith.addf %45, %46 : vector<256x256xf32>
    %cst_34 = arith.constant 0.000000e+00 : f32
    %cst_35 = arith.constant 6.000000e+00 : f32
    %48 = vector.broadcast %cst_34 : f32 to vector<256x256xf32>
    %49 = arith.maximumf %48, %47 : vector<256x256xf32>
    %50 = vector.broadcast %cst_35 : f32 to vector<256x256xf32>
    %51 = arith.minimumf %50, %49 : vector<256x256xf32>
    %52 = arith.mulf %45, %51 : vector<256x256xf32>
    %cst_36 = arith.constant 0.166666672 : f32
    %53 = vector.broadcast %cst_36 : f32 to vector<256x256xf32>
    %54 = arith.mulf %52, %53 : vector<256x256xf32>
    %cst_37 = arith.constant 0.000000e+00 : f32
    %cst_38 = arith.constant 6.000000e+00 : f32
    %55 = vector.broadcast %cst_37 : f32 to vector<256x256xf32>
    %56 = arith.maximumf %55, %54 : vector<256x256xf32>
    %57 = vector.broadcast %cst_38 : f32 to vector<256x256xf32>
    %58 = arith.minimumf %57, %56 : vector<256x256xf32>
    %59 = vector.shape_cast %58 : vector<256x256xf32> to vector<16x1x16x256xf32>
    %c0_39 = arith.constant 0 : index
    %c0_40 = arith.constant 0 : index
    %c0_41 = arith.constant 0 : index
    %c256_42 = arith.constant 256 : index
    %60 = vector.load %arg5[%c0_39, %c0_40, %c0_41, %c256_42] : memref<16x1x16x512xf32, #tpu.memory_space<vmem>>, vector<16x1x16x256xf32>
    tpu.vector_store %arg5[%c0_39, %c0_40, %c0_41, %c256_42], %59 {strides = array<i32>} : memref<16x1x16x512xf32, #tpu.memory_space<vmem>>, vector<16x1x16x256xf32>,
    return
  }
  func.func @transform_0(%arg0: i32, %arg1: i32) -> (i32, i32, i32) {
    %c0_i32 = arith.constant 0 : i32
    %c0_i32_0 = arith.constant 0 : i32
    %c0_i32_1 = arith.constant 0 : i32
    %c0_i32_2 = arith.constant 0 : i32
    return %c0_i32, %c0_i32_0, %c0_i32_1 : i32, i32, i32
  }
  func.func @transform_1(%arg0: i32, %arg1: i32) -> (i32, i32, i32) {
    %c0_i32 = arith.constant 0 : i32
    %c0_i32_0 = arith.constant 0 : i32
    %c0_i32_1 = arith.constant 0 : i32
    %c0_i32_2 = arith.constant 0 : i32
    return %c0_i32, %c0_i32_0, %c0_i32_1 : i32, i32, i32
  }
  func.func @transform_2(%arg0: i32, %arg1: i32) -> (i32, i32) {
    %c0_i32 = arith.constant 0 : i32
    %c0_i32_0 = arith.constant 0 : i32
    %c0_i32_1 = arith.constant 0 : i32
    return %c0_i32, %c0_i32_0 : i32, i32
  }
  func.func @transform_3(%arg0: i32, %arg1: i32) -> (i32, i32, i32, i32) {
    %c0_i32 = arith.constant 0 : i32
    %c0_i32_0 = arith.constant 0 : i32
    %c0_i32_1 = arith.constant 0 : i32
    return %arg1, %arg0, %c0_i32, %c0_i32_0 : i32, i32, i32, i32
  }
}

</mosaic_0001>

<bundles_post_ra>
// kernel: model_forward.1
= control target key start
LH: loop header
LB: loop body
LE: loop exit
PB: predicated region body
PF: predicated region fallthrough
CT: control target
= control target key end

     0   :  { %s7459_s12 = smov 0   ;;  %s7461_s13 = smov 0   ;;  %s10203_s0 = inlined_call_operand.vmem [shape: bf16[17,16,512], index: 0, kind: input, shape index: {}]   ;;  %s10204_s1 = inlined_call_operand.vmem [shape: bf16[4,512,512], index: 1, kind: input, shape index: {}]   ;;  %s10205_s2 = inlined_call_operand.vmem [shape: f32[1,512], index: 2, kind: input, shape index: {}]   ;;  %s10206_s3 = inlined_call_operand.vmem [shape: f32[16,2,16,512], index: 3, kind: output, shape index: {}]  }
   0x1   :  { %s7463_s14 = smov 0   ;;  %s7465_s15 = smov 0  }
   0x2   :  { %s7467_s16 = smov 0  }
   0x3 LB: > { %s6186_s17 = sadd.s32 4294967295, %s7437_s16   ;;  %s25_s18 = sadd.s32 1, %s7433_s15  ;;  %s7437_s16 = sphi %s7467_s16, %s13_s16   ;;  %s7433_s15 = sphi %s7465_s15, %s10544_s15   ;;  %s7429_s14 = sphi %s7463_s14, %s10543_s14   ;;  %s7425_s13 = sphi %s7461_s13, %s10542_s13   ;;  %s7421_s12 = sphi %s7459_s12, %s10541_s12  }
   0x4   : > { %p27_p0 = scmp.ge.s32.totalorder %s25_s18, 2  ;;  %s97_s19 = sadd.s32 1, %s7425_s13 }
   0x5   : > { %p107_p1 = scmp.ne.s32.totalorder %s7425_s13, %s7421_s12  ;;  %p108_p2 = scmp.eq.s32.totalorder %s6186_s17, 1 }
   0x6   : > { %s10546_s18 = smov (%p27_p0, %s25_s18), 0  ;;  %p6189_p4 = scmp.ge.s32.totalorder %s7437_s16, 1 }
   0x7   : > { %p7491_p3 = por %p108_p2, %p107_p1  ;;  %s93_s21 = ssub.s32 %s7433_s15, %s10546_s18 }
   0x8   : > { %p141_p5 = scmp.lt.s32.totalorder %s7437_s16, 3  ;;  %p95_p6 = scmp.eq.s32.totalorder %s93_s21, 0 }
   0xa   : > { %p142_p7 = pnand %p6189_p4, %p141_p5 }
   0xb   : > { %s7500_s22 = scalar_select %p95_p6, %s7425_s13, %s97_s19  }
   0xc   : > { %145 = sbr.rel (%p142_p7) target bundleno = 920 (0x398), region = 32 }
  0x11   : > { %s6778_s23 = sshll.u32 %s7429_s14, 11  ;;  %v6919_v0 = vld [vmem:[%s10203_s0 + $0x4] ss:$16 sps:$4 sm:$0xff]   ;;  %v6922_v47 = vld [vmem:[%s10203_s0 + $0xc] ss:$16 sps:$4 sm:$0xff]   ;;  %s6780_s10 = sshll.u32 (%p7491_p3), %s7429_s14, 6 }
  0x12   : > { %s7506_s26 = scalar_lea.vmem %s10204_s1, %s6778_s23  ;;  %1420 = vmatprep.mubr.bf16.mxu0 %v6919_v0  ;;  %1613 = vmatprep.mubr.bf16.mxu1 %v6922_v47  ;;  %s9933_s19 = scalar_lea.vmem (%p7491_p3), %s10206_s3, %s6780_s10 }
  0x13   : > { %v6821_v1 = vld [vmem:[%s7506_s26 + $0xe4] ss:$16 sps:$4 sm:$0xff]   ;;  %v6825_v3 = vld [vmem:[%s7506_s26 + $0xe0] ss:$16 sps:$4 sm:$0xff]   ;;  %v7012_v47 = vld [vmem:[%s7506_s26 + $0x20c] ss:$16 sps:$4 sm:$0xff]  }
  0x14   : > { %v6823_v2 = vld [vmem:[%s7506_s26 + $0x2e4] ss:$16 sps:$4 sm:$0xff]   ;;  %1388 = vmatprep.subr.bf16.mxu0 %v6821_v1  ;;  %v6826_v4 = vld [vmem:[%s7506_s26 + $0x2e0] ss:$16 sps:$4 sm:$0xff]  }
  0x15   : > { %1581 = vmatprep.subr.bf16.mxu1 %v6823_v2  ;;  %v6827_v5 = vld [vmem:[%s7506_s26 + $0xc4] ss:$16 sps:$4 sm:$0xff]   ;;  %1389 = vmatpush1.bf16.msra.mxu0 %v6825_v3  ;;  %v6831_v7 = vld [vmem:[%s7506_s26 + $0xc0] ss:$16 sps:$4 sm:$0xff]   ;;  %v6925_v3 = vld [vmem:[%s7506_s26 + $0xec] ss:$16 sps:$4 sm:$0xff]  }
  0x16   : > { %1582 = vmatpush1.bf16.msra.mxu1 %v6826_v4  ;;  %v6829_v6 = vld [vmem:[%s7506_s26 + $0x2c4] ss:$16 sps:$4 sm:$0xff]   ;;  %1390 = vmatprep.subr.bf16.mxu0 %v6827_v5  ;;  %v6832_v8 = vld [vmem:[%s7506_s26 + $0x2c0] ss:$16 sps:$4 sm:$0xff]   ;;  %v6928_v4 = vld [vmem:[%s7506_s26 + $0x2ec] ss:$16 sps:$4 sm:$0xff]  }
  0x17   : > { %1583 = vmatprep.subr.bf16.mxu1 %v6829_v6  ;;  %v6833_v9 = vld [vmem:[%s7506_s26 + $0xa4] ss:$16 sps:$4 sm:$0xff]   ;;  %v6837_v11 = vld [vmem:[%s7506_s26 + $0xa0] ss:$16 sps:$4 sm:$0xff]   ;;  %v7588_v5 = vld [vmem:[%s10203_s0 + $0x8] ss:$16 sps:$4 sm:$0xff]  }
  0x18   : > { %v6835_v10 = vld [vmem:[%s7506_s26 + $0x2a4] ss:$16 sps:$4 sm:$0xff]   ;;  %v6838_v12 = vld [vmem:[%s7506_s26 + $0x2a0] ss:$16 sps:$4 sm:$0xff]   ;;  %v6923_v6 = vld [vmem:[%s7506_s26 + $0xe8] ss:$16 sps:$4 sm:$0xff]  }
  0x19   : > { %1391 = vmatpush1.bf16.msra.mxu0 %v6831_v7  ;;  %v6839_v13 = vld [vmem:[%s7506_s26 + $0x84] ss:$16 sps:$4 sm:$0xff]   ;;  %v6843_v15 = vld [vmem:[%s7506_s26 + $0x80] ss:$16 sps:$4 sm:$0xff]   ;;  %v6926_v7 = vld [vmem:[%s7506_s26 + $0x2e8] ss:$16 sps:$4 sm:$0xff]  }
  0x1a   : > { %1584 = vmatpush1.bf16.msra.mxu1 %v6832_v8  ;;  %1392 = vmatprep.subr.bf16.mxu0 %v6833_v9  ;;  %v6841_v14 = vld [vmem:[%s7506_s26 + $0x284] ss:$16 sps:$4 sm:$0xff]   ;;  %v6844_v16 = vld [vmem:[%s7506_s26 + $0x280] ss:$16 sps:$4 sm:$0xff]   ;;  %v7600_v9 = vld [vmem:[%s10203_s0 + $0x2c] ss:$16 sps:$4 sm:$0xff]  }
  0x1b   : > { %1585 = vmatprep.subr.bf16.mxu1 %v6835_v10  ;;  %v6845_v17 = vld [vmem:[%s7506_s26 + $0x64] ss:$16 sps:$4 sm:$0xff]   ;;  %v6849_v19 = vld [vmem:[%s7506_s26 + $0x60] ss:$16 sps:$4 sm:$0xff]   ;;  %v6937_v10 = vld [vmem:[%s7506_s26 + $0xcc] ss:$16 sps:$4 sm:$0xff]  }
  0x1c   : > { %v6847_v18 = vld [vmem:[%s7506_s26 + $0x264] ss:$16 sps:$4 sm:$0xff]   ;;  %v6850_v20 = vld [vmem:[%s7506_s26 + $0x260] ss:$16 sps:$4 sm:$0xff]  }
  0x1d   : > { %1393 = vmatpush1.bf16.msra.mxu0 %v6837_v11  ;;  %v6851_v21 = vld [vmem:[%s7506_s26 + $0x44] ss:$16 sps:$4 sm:$0xff]   ;;  %v6855_v23 = vld [vmem:[%s7506_s26 + $0x40] ss:$16 sps:$4 sm:$0xff]   ;;  %v6940_v11 = vld [vmem:[%s7506_s26 + $0x2cc] ss:$16 sps:$4 sm:$0xff]  }
  0x1e   : > { %1586 = vmatpush1.bf16.msra.mxu1 %v6838_v12  ;;  %1394 = vmatprep.subr.bf16.mxu0 %v6839_v13  ;;  %v6853_v22 = vld [vmem:[%s7506_s26 + $0x244] ss:$16 sps:$4 sm:$0xff]   ;;  %v6856_v24 = vld [vmem:[%s7506_s26 + $0x240] ss:$16 sps:$4 sm:$0xff]   ;;  %v6935_v12 = vld [vmem:[%s7506_s26 + $0xc8] ss:$16 sps:$4 sm:$0xff]  }
  0x1f   : > { %1587 = vmatprep.subr.bf16.mxu1 %v6841_v14  ;;  %v6857_v25 = vld [vmem:[%s7506_s26 + $0x24] ss:$16 sps:$4 sm:$0xff]   ;;  %v6861_v27 = vld [vmem:[%s7506_s26 + $0x20] ss:$16 sps:$4 sm:$0xff]   ;;  %v6938_v13 = vld [vmem:[%s7506_s26 + $0x2c8] ss:$16 sps:$4 sm:$0xff]  }
  0x20   : > { %v6859_v26 = vld [vmem:[%s7506_s26 + $0x224] ss:$16 sps:$4 sm:$0xff]   ;;  %v6862_v28 = vld [vmem:[%s7506_s26 + $0x220] ss:$16 sps:$4 sm:$0xff]  }
  0x21   : > { %1395 = vmatpush1.bf16.msra.mxu0 %v6843_v15  ;;  %v6863_v29 = vld [vmem:[%s7506_s26 + $0x4] ss:$16 sps:$4 sm:$0xff]   ;;  %v6867_v31 = vld [vmem:[%s7506_s26] ss:$16 sps:$4 sm:$0xff]   ;;  %v6949_v15 = vld [vmem:[%s7506_s26 + $0xac] ss:$16 sps:$4 sm:$0xff]  }
  0x22   : > { %1588 = vmatpush1.bf16.msra.mxu1 %v6844_v16  ;;  %1396 = vmatprep.subr.bf16.mxu0 %v6845_v17  ;;  %v6865_v30 = vld [vmem:[%s7506_s26 + $0x204] ss:$16 sps:$4 sm:$0xff]   ;;  %v6868_v32 = vld [vmem:[%s7506_s26 + $0x200] ss:$16 sps:$4 sm:$0xff]   ;;  %v6952_v16 = vld [vmem:[%s7506_s26 + $0x2ac] ss:$16 sps:$4 sm:$0xff]  }
  0x23   : > { %1589 = vmatprep.subr.bf16.mxu1 %v6847_v18  ;;  %v6869_v33 = vld [vmem:[%s7506_s26 + $0x1e4] ss:$16 sps:$4 sm:$0xff]   ;;  %v6873_v35 = vld [vmem:[%s7506_s26 + $0x1e0] ss:$16 sps:$4 sm:$0xff]   ;;  %v7620_v17 = vld [vmem:[%s10203_s0 + $0x28] ss:$16 sps:$4 sm:$0xff]  }
  0x24   : > { %v6871_v34 = vld [vmem:[%s7506_s26 + $0x3e4] ss:$16 sps:$4 sm:$0xff]   ;;  %v6874_v36 = vld [vmem:[%s7506_s26 + $0x3e0] ss:$16 sps:$4 sm:$0xff]  }
  0x25   : > { %1397 = vmatpush1.bf16.msra.mxu0 %v6849_v19  ;;  %v6875_v37 = vld [vmem:[%s7506_s26 + $0x1c4] ss:$16 sps:$4 sm:$0xff]   ;;  %v6879_v39 = vld [vmem:[%s7506_s26 + $0x1c0] ss:$16 sps:$4 sm:$0xff]   ;;  %v7630_v19 = vld [vmem:[%s10203_s0 + $0x4c] ss:$16 sps:$4 sm:$0xff]  }
  0x26   : > { %1590 = vmatpush1.bf16.msra.mxu1 %v6850_v20  ;;  %1398 = vmatprep.subr.bf16.mxu0 %v6851_v21  ;;  %v6877_v38 = vld [vmem:[%s7506_s26 + $0x3c4] ss:$16 sps:$4 sm:$0xff]   ;;  %v6880_v40 = vld [vmem:[%s7506_s26 + $0x3c0] ss:$16 sps:$4 sm:$0xff]   ;;  %v6947_v20 = vld [vmem:[%s7506_s26 + $0xa8] ss:$16 sps:$4 sm:$0xff]  }
  0x27   : > { %1591 = vmatprep.subr.bf16.mxu1 %v6853_v22  ;;  %v6881_v41 = vld [vmem:[%s7506_s26 + $0x1a4] ss:$16 sps:$4 sm:$0xff]   ;;  %v6885_v43 = vld [vmem:[%s7506_s26 + $0x1a0] ss:$16 sps:$4 sm:$0xff]   ;;  %v6950_v21 = vld [vmem:[%s7506_s26 + $0x2a8] ss:$16 sps:$4 sm:$0xff]  }
  0x28   : > { %v6883_v42 = vld [vmem:[%s7506_s26 + $0x3a4] ss:$16 sps:$4 sm:$0xff]   ;;  %v6886_v44 = vld [vmem:[%s7506_s26 + $0x3a0] ss:$16 sps:$4 sm:$0xff]   ;;  %v6961_v22 = vld [vmem:[%s7506_s26 + $0x8c] ss:$16 sps:$4 sm:$0xff]  }
  0x29   : > { %1399 = vmatpush1.bf16.msra.mxu0 %v6855_v23  ;;  %v6887_v45 = vld [vmem:[%s7506_s26 + $0x184] ss:$16 sps:$4 sm:$0xff]   ;;  %v6891_v48 = vld [vmem:[%s7506_s26 + $0x180] ss:$16 sps:$4 sm:$0xff]   ;;  %v6964_v23 = vld [vmem:[%s7506_s26 + $0x28c] ss:$16 sps:$4 sm:$0xff]  }
  0x2a   : > { %1592 = vmatpush1.bf16.msra.mxu1 %v6856_v24  ;;  %1400 = vmatprep.subr.bf16.mxu0 %v6857_v25  ;;  %v6889_v46 = vld [vmem:[%s7506_s26 + $0x384] ss:$16 sps:$4 sm:$0xff]   ;;  %v6892_v49 = vld [vmem:[%s7506_s26 + $0x380] ss:$16 sps:$4 sm:$0xff]   ;;  %v6959_v24 = vld [vmem:[%s7506_s26 + $0x88] ss:$16 sps:$4 sm:$0xff]  }
  0x2b   : > { %1593 = vmatprep.subr.bf16.mxu1 %v6859_v26  ;;  %v6893_v50 = vld [vmem:[%s7506_s26 + $0x164] ss:$16 sps:$4 sm:$0xff]   ;;  %v6897_v52 = vld [vmem:[%s7506_s26 + $0x160] ss:$16 sps:$4 sm:$0xff]   ;;  %v7649_v26 = vld [vmem:[%s10203_s0 + $0x48] ss:$16 sps:$4 sm:$0xff]  }
  0x2c   : > { %v6895_v51 = vld [vmem:[%s7506_s26 + $0x364] ss:$16 sps:$4 sm:$0xff]   ;;  %v6898_v53 = vld [vmem:[%s7506_s26 + $0x360] ss:$16 sps:$4 sm:$0xff]  }
  0x2d   : > { %1401 = vmatpush1.bf16.msra.mxu0 %v6861_v27  ;;  %v6899_v54 = vld [vmem:[%s7506_s26 + $0x144] ss:$16 sps:$4 sm:$0xff]   ;;  %v6903_v56 = vld [vmem:[%s7506_s26 + $0x140] ss:$16 sps:$4 sm:$0xff]   ;;  %v6962_v27 = vld [vmem:[%s7506_s26 + $0x288] ss:$16 sps:$4 sm:$0xff]  }
  0x2e   : > { %1594 = vmatpush1.bf16.msra.mxu1 %v6862_v28  ;;  %1402 = vmatprep.subr.bf16.mxu0 %v6863_v29  ;;  %v6901_v55 = vld [vmem:[%s7506_s26 + $0x344] ss:$16 sps:$4 sm:$0xff]   ;;  %v6904_v57 = vld [vmem:[%s7506_s26 + $0x340] ss:$16 sps:$4 sm:$0xff]   ;;  %v6973_v28 = vld [vmem:[%s7506_s26 + $0x6c] ss:$16 sps:$4 sm:$0xff]  }
  0x2f   : > { %1595 = vmatprep.subr.bf16.mxu1 %v6865_v30  ;;  %v6905_v58 = vld [vmem:[%s7506_s26 + $0x124] ss:$16 sps:$4 sm:$0xff]   ;;  %v6909_v60 = vld [vmem:[%s7506_s26 + $0x120] ss:$16 sps:$4 sm:$0xff]   ;;  %v6976_v29 = vld [vmem:[%s7506_s26 + $0x26c] ss:$16 sps:$4 sm:$0xff]  }
  0x30   : > { %v6907_v59 = vld [vmem:[%s7506_s26 + $0x324] ss:$16 sps:$4 sm:$0xff]   ;;  %v6910_v61 = vld [vmem:[%s7506_s26 + $0x320] ss:$16 sps:$4 sm:$0xff]  }
  0x31   : > { %1403 = vmatpush1.bf16.msra.mxu0 %v6867_v31  ;;  %v6911_v62 = vld [vmem:[%s7506_s26 + $0x104] ss:$16 sps:$4 sm:$0xff]   ;;  %v6915_v0 = vld [vmem:[%s7506_s26 + $0x100] ss:$16 sps:$4 sm:$0xff]   ;;  %v7662_v31 = vld [vmem:[%s10203_s0 + $0x6c] ss:$16 sps:$4 sm:$0xff]  }
  0x32   : > { %1596 = vmatpush1.bf16.msra.mxu1 %v6868_v32  ;;  %1404 = vmatprep.subr.bf16.mxu0 %v6869_v33  ;;  %v6913_v63 = vld [vmem:[%s7506_s26 + $0x304] ss:$16 sps:$4 sm:$0xff]   ;;  %v6916_v1 = vld [vmem:[%s7506_s26 + $0x300] ss:$16 sps:$4 sm:$0xff]   ;;  %v6971_v32 = vld [vmem:[%s7506_s26 + $0x68] ss:$16 sps:$4 sm:$0xff]  }
  0x33   : > { %1597 = vmatprep.subr.bf16.mxu1 %v6871_v34  ;;  %v7581_v2 = vld [vmem:[%s10203_s0] ss:$16 sps:$4 sm:$0xff]   ;;  %v7595_v8 = vld [vmem:[%s10203_s0 + $0x24] ss:$16 sps:$4 sm:$0xff]   ;;  %v6974_v33 = vld [vmem:[%s7506_s26 + $0x268] ss:$16 sps:$4 sm:$0xff]  }
  0x34   : > { %v7613_v14 = vld [vmem:[%s10203_s0 + $0x20] ss:$16 sps:$4 sm:$0xff]   ;;  %v7625_v18 = vld [vmem:[%s10203_s0 + $0x44] ss:$16 sps:$4 sm:$0xff]   ;;  %v6985_v34 = vld [vmem:[%s7506_s26 + $0x4c] ss:$16 sps:$4 sm:$0xff]  }
  0x35   : > { %1405 = vmatpush2.bf16.msra.mxu0 %v6873_v35  ;;  %v7644_v25 = vld [vmem:[%s10203_s0 + $0x40] ss:$16 sps:$4 sm:$0xff]   ;;  %v7657_v30 = vld [vmem:[%s10203_s0 + $0x64] ss:$16 sps:$4 sm:$0xff]   ;;  %v6988_v35 = vld [vmem:[%s7506_s26 + $0x24c] ss:$16 sps:$4 sm:$0xff]  }
  0x36   : > { %1598 = vmatpush2.bf16.msra.mxu1 %v6874_v36  ;;  %1406 = vmatprep.subr.bf16.mxu0 %v6875_v37  ;;  %v7675_v36 = vld [vmem:[%s10203_s0 + $0x60] ss:$16 sps:$4 sm:$0xff]   ;;  %v7680_v37 = vld [vmem:[%s10203_s0 + $0x68] ss:$16 sps:$4 sm:$0xff]  }
  0x37   : > { %1599 = vmatprep.subr.bf16.mxu1 %v6877_v38  ;;  %v6983_v38 = vld [vmem:[%s7506_s26 + $0x48] ss:$16 sps:$4 sm:$0xff]  }
  0x39   : > { %1407 = vmatpush2.bf16.msra.mxu0 %v6879_v39  ;;  %v6986_v39 = vld [vmem:[%s7506_s26 + $0x248] ss:$16 sps:$4 sm:$0xff]  }
  0x3a   : > { %1600 = vmatpush2.bf16.msra.mxu1 %v6880_v40  ;;  %1408 = vmatprep.subr.bf16.mxu0 %v6881_v41  ;;  %v6997_v40 = vld [vmem:[%s7506_s26 + $0x2c] ss:$16 sps:$4 sm:$0xff]  }
  0x3b   : > { %1601 = vmatprep.subr.bf16.mxu1 %v6883_v42  ;;  %v7000_v41 = vld [vmem:[%s7506_s26 + $0x22c] ss:$16 sps:$4 sm:$0xff]   ;;  %v7689_v42 = vld [vmem:[%s10203_s0 + $0x84] ss:$16 sps:$4 sm:$0xff]  }
  0x3d   : > { %1409 = vmatpush2.bf16.msra.mxu0 %v6885_v43  ;;  %v7694_v43 = vld [vmem:[%s10203_s0 + $0x8c] ss:$16 sps:$4 sm:$0xff]  }
  0x3e   : > { %1602 = vmatpush2.bf16.msra.mxu1 %v6886_v44  ;;  %1410 = vmatprep.subr.bf16.mxu0 %v6887_v45  ;;  %v6995_v44 = vld [vmem:[%s7506_s26 + $0x28] ss:$16 sps:$4 sm:$0xff]  }
  0x3f   : > { %1603 = vmatprep.subr.bf16.mxu1 %v6889_v46  ;;  %v6998_v45 = vld [vmem:[%s7506_s26 + $0x228] ss:$16 sps:$4 sm:$0xff]   ;;  %v7009_v46 = vld [vmem:[%s7506_s26 + $0xc] ss:$16 sps:$4 sm:$0xff]  }
  0x41   : > { %1411 = vmatpush2.bf16.msra.mxu0 %v6891_v48  ;;  %v7007_v48 = vld [vmem:[%s7506_s26 + $0x8] ss:$16 sps:$4 sm:$0xff]  }
  0x42   : > { %1604 = vmatpush2.bf16.msra.mxu1 %v6892_v49  ;;  %1412 = vmatprep.subr.bf16.mxu0 %v6893_v50  ;;  %v7708_v49 = vld [vmem:[%s10203_s0 + $0x80] ss:$16 sps:$4 sm:$0xff]   ;;  %v7713_v50 = vld [vmem:[%s10203_s0 + $0x88] ss:$16 sps:$4 sm:$0xff]  }
  0x43   : > { %1605 = vmatprep.subr.bf16.mxu1 %v6895_v51  ;;  %v7010_v51 = vld [vmem:[%s7506_s26 + $0x208] ss:$16 sps:$4 sm:$0xff]  }
  0x45   : > { %1413 = vmatpush2.bf16.msra.mxu0 %v6897_v52  ;;  %v7021_v52 = vld [vmem:[%s7506_s26 + $0x1ec] ss:$16 sps:$4 sm:$0xff]  }
  0x46   : > { %1606 = vmatpush2.bf16.msra.mxu1 %v6898_v53  ;;  %1414 = vmatprep.subr.bf16.mxu0 %v6899_v54  ;;  %v7024_v53 = vld [vmem:[%s7506_s26 + $0x3ec] ss:$16 sps:$4 sm:$0xff]   ;;  %v7721_v54 = vld [vmem:[%s10203_s0 + $0xa4] ss:$16 sps:$4 sm:$0xff]  }
  0x47   : > { %1607 = vmatprep.subr.bf16.mxu1 %v6901_v55  ;;  %v7726_v55 = vld [vmem:[%s10203_s0 + $0xac] ss:$16 sps:$4 sm:$0xff]  }
  0x49   : > { %1415 = vmatpush2.bf16.msra.mxu0 %v6903_v56  ;;  %v7019_v56 = vld [vmem:[%s7506_s26 + $0x1e8] ss:$16 sps:$4 sm:$0xff]  }
  0x4a   : > { %1608 = vmatpush2.bf16.msra.mxu1 %v6904_v57  ;;  %1416 = vmatprep.subr.bf16.mxu0 %v6905_v58  ;;  %v7022_v57 = vld [vmem:[%s7506_s26 + $0x3e8] ss:$16 sps:$4 sm:$0xff]   ;;  %v7033_v58 = vld [vmem:[%s7506_s26 + $0x1cc] ss:$16 sps:$4 sm:$0xff]  }
  0x4b   : > { %1609 = vmatprep.subr.bf16.mxu1 %v6907_v59  ;;  %v7036_v59 = vld [vmem:[%s7506_s26 + $0x3cc] ss:$16 sps:$4 sm:$0xff]  }
  0x4d   : > { %1417 = vmatpush2.bf16.msra.mxu0 %v6909_v60  ;;  %v7739_v60 = vld [vmem:[%s10203_s0 + $0xa0] ss:$16 sps:$4 sm:$0xff]  }
  0x4e   : > { %1610 = vmatpush2.bf16.msra.mxu1 %v6910_v61  ;;  %1418 = vmatprep.subr.bf16.mxu0 %v6911_v62  ;;  %v7744_v61 = vld [vmem:[%s10203_s0 + $0xa8] ss:$16 sps:$4 sm:$0xff]  }
  0x4f   : > { %1611 = vmatprep.subr.bf16.mxu1 %v6913_v63  ;;  %v7031_v62 = vld [vmem:[%s7506_s26 + $0x1c8] ss:$16 sps:$4 sm:$0xff]  }
  0x50   : > { %v7034_v63 = vld [vmem:[%s7506_s26 + $0x3c8] ss:$16 sps:$4 sm:$0xff]  }
  0x51   : > { %1419 = vmatpush2.bf16.msra.mxu0 %v6915_v0  ;;  %v7045_v0 = vld [vmem:[%s7506_s26 + $0x1ac] ss:$16 sps:$4 sm:$0xff]  }
  0x52   : > { %1612 = vmatpush2.bf16.msra.mxu1 %v6916_v1  ;;  %1774 = vmatprep.subr.bf16.mxu0 %v6925_v3  ;;  %v7048_v1 = vld [vmem:[%s7506_s26 + $0x3ac] ss:$16 sps:$4 sm:$0xff]   ;;  %v7753_v3 = vld [vmem:[%s10203_s0 + $0xc4] ss:$16 sps:$4 sm:$0xff]  }
  0x53   : > { %1967 = vmatprep.subr.bf16.mxu1 %v6928_v4  ;;  %v7758_v4 = vld [vmem:[%s10203_s0 + $0xcc] ss:$16 sps:$4 sm:$0xff]  }
  0x54   : > { %1421 = vmatmul.mubr.bf16.vlgmr.msra.gmra.mxu0 %v7581_v2 }
  0x55   : > { %1614 = vmatmul.mubr.bf16.vlgmr.msra.gmra.mxu1 %v7588_v5  ;;  %1775 = vmatpush1.bf16.msra.mxu0 %v6923_v6  ;;  %v7043_v6 = vld [vmem:[%s7506_s26 + $0x1a8] ss:$16 sps:$4 sm:$0xff]  }
  0x56   : > { %1968 = vmatpush1.bf16.msra.mxu1 %v6926_v7  ;;  %1430 = vmatprep.mubr.bf16.mxu0 %v7595_v8  ;;  %v7046_v7 = vld [vmem:[%s7506_s26 + $0x3a8] ss:$16 sps:$4 sm:$0xff]  }
  0x57   : > { %1623 = vmatprep.mubr.bf16.mxu1 %v7600_v9  ;;  %1776 = vmatprep.subr.bf16.mxu0 %v6937_v10  ;;  %v7057_v10 = vld [vmem:[%s7506_s26 + $0x18c] ss:$16 sps:$4 sm:$0xff]  }
  0x58   : > { %1969 = vmatprep.subr.bf16.mxu1 %v6940_v11  ;;  %v7060_v11 = vld [vmem:[%s7506_s26 + $0x38c] ss:$16 sps:$4 sm:$0xff]  }
  0x59   : > { %1777 = vmatpush1.bf16.msra.mxu0 %v6935_v12  ;;  %v7055_v12 = vld [vmem:[%s7506_s26 + $0x188] ss:$16 sps:$4 sm:$0xff]  }
  0x5a   : > { %1970 = vmatpush1.bf16.msra.mxu1 %v6938_v13  ;;  %1778 = vmatprep.subr.bf16.mxu0 %v6949_v15  ;;  %v7772_v13 = vld [vmem:[%s10203_s0 + $0xc0] ss:$16 sps:$4 sm:$0xff]   ;;  %v7058_v15 = vld [vmem:[%s7506_s26 + $0x388] ss:$16 sps:$4 sm:$0xff]  }
  0x5b   : > { %1971 = vmatprep.subr.bf16.mxu1 %v6952_v16  ;;  %v7069_v16 = vld [vmem:[%s7506_s26 + $0x16c] ss:$16 sps:$4 sm:$0xff]  }
  0x5c   : > { %1431 = vmatmul.mubr.bf16.gmra.mxu0 %v7613_v14 }
  0x5d   : > { %1624 = vmatmul.mubr.bf16.gmra.mxu1 %v7620_v17  ;;  %1440 = vmatprep.mubr.bf16.mxu0 %v7625_v18 }
  0x5e   : > { %1633 = vmatprep.mubr.bf16.mxu1 %v7630_v19  ;;  %1779 = vmatpush1.bf16.msra.mxu0 %v6947_v20  ;;  %v7072_v20 = vld [vmem:[%s7506_s26 + $0x36c] ss:$16 sps:$4 sm:$0xff]  }
  0x5f   : > { %1972 = vmatpush1.bf16.msra.mxu1 %v6950_v21  ;;  %1780 = vmatprep.subr.bf16.mxu0 %v6961_v22  ;;  %v7780_v21 = vld [vmem:[%s10203_s0 + $0xc8] ss:$16 sps:$4 sm:$0xff]   ;;  %v7785_v22 = vld [vmem:[%s10203_s0 + $0xe4] ss:$16 sps:$4 sm:$0xff]  }
  0x60   : > { %1973 = vmatprep.subr.bf16.mxu1 %v6964_v23  ;;  %v7790_v23 = vld [vmem:[%s10203_s0 + $0xec] ss:$16 sps:$4 sm:$0xff]  }
  0x62   : > { %1781 = vmatpush1.bf16.msra.mxu0 %v6959_v24  ;;  %v7067_v24 = vld [vmem:[%s7506_s26 + $0x168] ss:$16 sps:$4 sm:$0xff]  }
  0x63   : > { %1974 = vmatpush1.bf16.msra.mxu1 %v6962_v27  ;;  %1782 = vmatprep.subr.bf16.mxu0 %v6973_v28  ;;  %v7070_v27 = vld [vmem:[%s7506_s26 + $0x368] ss:$16 sps:$4 sm:$0xff]   ;;  %v7081_v28 = vld [vmem:[%s7506_s26 + $0x14c] ss:$16 sps:$4 sm:$0xff]  }
  0x64   : > { %1975 = vmatprep.subr.bf16.mxu1 %v6976_v29  ;;  %1441 = vmatmul.mubr.bf16.gmra.mxu0 %v7644_v25  ;;  %v7084_v29 = vld [vmem:[%s7506_s26 + $0x34c] ss:$16 sps:$4 sm:$0xff]  }
  0x65   : > { %1634 = vmatmul.mubr.bf16.gmra.mxu1 %v7649_v26  ;;  %1450 = vmatprep.mubr.bf16.mxu0 %v7657_v30 }
  0x66   : > { %1643 = vmatprep.mubr.bf16.mxu1 %v7662_v31  ;;  %1783 = vmatpush1.bf16.msra.mxu0 %v6971_v32  ;;  %v7803_v32 = vld [vmem:[%s10203_s0 + $0xe0] ss:$16 sps:$4 sm:$0xff]  }
  0x67   : > { %1976 = vmatpush1.bf16.msra.mxu1 %v6974_v33  ;;  %1784 = vmatprep.subr.bf16.mxu0 %v6985_v34  ;;  %v7808_v33 = vld [vmem:[%s10203_s0 + $0xe8] ss:$16 sps:$4 sm:$0xff]  }
  0x68   : > { %1977 = vmatprep.subr.bf16.mxu1 %v6988_v35  ;;  %v7079_v34 = vld [vmem:[%s7506_s26 + $0x148] ss:$16 sps:$4 sm:$0xff]  }
  0x69   : > { %v7082_v35 = vld [vmem:[%s7506_s26 + $0x348] ss:$16 sps:$4 sm:$0xff]  }
  0x6a   : > { %1785 = vmatpush1.bf16.msra.mxu0 %v6983_v38  ;;  %v7815_v38 = vld [vmem:[%s10203_s0 + $0x104] ss:$16 sps:$4 sm:$0xff]  }
  0x6b   : > { %1978 = vmatpush1.bf16.msra.mxu1 %v6986_v39  ;;  %1786 = vmatprep.subr.bf16.mxu0 %v6997_v40  ;;  %v7820_v39 = vld [vmem:[%s10203_s0 + $0x10c] ss:$16 sps:$4 sm:$0xff]  }
  0x6c   : > { %1979 = vmatprep.subr.bf16.mxu1 %v7000_v41  ;;  %1451 = vmatmul.mubr.bf16.gmra.mxu0 %v7675_v36  ;;  %v7093_v40 = vld [vmem:[%s7506_s26 + $0x12c] ss:$16 sps:$4 sm:$0xff]   ;;  %v7091_v41 = vld [vmem:[%s7506_s26 + $0x128] ss:$16 sps:$4 sm:$0xff]  }
  0x6d   : > { %1644 = vmatmul.mubr.bf16.gmra.mxu1 %v7680_v37  ;;  %1460 = vmatprep.mubr.bf16.mxu0 %v7689_v42 }
  0x6e   : > { %1653 = vmatprep.mubr.bf16.mxu1 %v7694_v43  ;;  %1787 = vmatpush1.bf16.msra.mxu0 %v6995_v44  ;;  %v7096_v44 = vld [vmem:[%s7506_s26 + $0x32c] ss:$16 sps:$4 sm:$0xff]  }
  0x6f   : > { %1980 = vmatpush1.bf16.msra.mxu1 %v6998_v45  ;;  %1788 = vmatprep.subr.bf16.mxu0 %v7009_v46  ;;  %v7094_v45 = vld [vmem:[%s7506_s26 + $0x328] ss:$16 sps:$4 sm:$0xff]  }
  0x70   : > { %1981 = vmatprep.subr.bf16.mxu1 %v7012_v47  ;;  %v7103_v46 = vld [vmem:[%s7506_s26 + $0x108] ss:$16 sps:$4 sm:$0xff]   ;;  %v7105_v47 = vld [vmem:[%s7506_s26 + $0x10c] ss:$16 sps:$4 sm:$0xff]  }
  0x72   : > { %1789 = vmatpush1.bf16.msra.mxu0 %v7007_v48  ;;  %v7835_v48 = vld [vmem:[%s10203_s0 + $0x100] ss:$16 sps:$4 sm:$0xff]  }
  0x73   : > { %1982 = vmatpush1.bf16.msra.mxu1 %v7010_v51  ;;  %1790 = vmatprep.subr.bf16.mxu0 %v7021_v52  ;;  %v7840_v51 = vld [vmem:[%s10203_s0 + $0x108] ss:$16 sps:$4 sm:$0xff]  }
  0x74   : > { %1983 = vmatprep.subr.bf16.mxu1 %v7024_v53  ;;  %1461 = vmatmul.mubr.bf16.gmra.mxu0 %v7708_v49  ;;  %v7106_v52 = vld [vmem:[%s7506_s26 + $0x308] ss:$16 sps:$4 sm:$0xff]   ;;  %v7108_v53 = vld [vmem:[%s7506_s26 + $0x30c] ss:$16 sps:$4 sm:$0xff]  }
  0x75   : > { %1654 = vmatmul.mubr.bf16.gmra.mxu1 %v7713_v50  ;;  %1470 = vmatprep.mubr.bf16.mxu0 %v7721_v54 }
  0x76   : > { %1663 = vmatprep.mubr.bf16.mxu1 %v7726_v55  ;;  %1791 = vmatpush2.bf16.msra.mxu0 %v7019_v56  ;;  %v7847_v56 = vld [vmem:[%s10203_s0 + $0x124] ss:$16 sps:$4 sm:$0xff]  }
  0x77   : > { %1984 = vmatpush2.bf16.msra.mxu1 %v7022_v57  ;;  %1792 = vmatprep.subr.bf16.mxu0 %v7033_v58  ;;  %v7111_v57 = vld [vmem:[%s7506_s26 + $0x4e4] ss:$16 sps:$4 sm:$0xff]   ;;  %v7853_v58 = vld [vmem:[%s10203_s0 + $0x12c] ss:$16 sps:$4 sm:$0xff]  }
  0x78   : > { %1985 = vmatprep.subr.bf16.mxu1 %v7036_v59  ;;  %v7114_v59 = vld [vmem:[%s7506_s26 + $0x6e4] ss:$16 sps:$4 sm:$0xff]  }
  0x7a   : > { %1793 = vmatpush2.bf16.msra.mxu0 %v7031_v62  ;;  %v7863_v62 = vld [vmem:[%s10203_s0 + $0x120] ss:$16 sps:$4 sm:$0xff]  }
  0x7b   : > { %1986 = vmatpush2.bf16.msra.mxu1 %v7034_v63  ;;  %1794 = vmatprep.subr.bf16.mxu0 %v7045_v0  ;;  %v7868_v63 = vld [vmem:[%s10203_s0 + $0x128] ss:$16 sps:$4 sm:$0xff]   ;;  %v7873_v0 = vld [vmem:[%s10203_s0 + $0x144] ss:$16 sps:$4 sm:$0xff]  }
  0x7c   : > { %1987 = vmatprep.subr.bf16.mxu1 %v7048_v1  ;;  %1471 = vmatmul.mubr.bf16.gmra.mxu0 %v7739_v60  ;;  %v7878_v1 = vld [vmem:[%s10203_s0 + $0x14c] ss:$16 sps:$4 sm:$0xff]  }
  0x7d   : > { %1664 = vmatmul.mubr.bf16.gmra.mxu1 %v7744_v61  ;;  %1480 = vmatprep.mubr.bf16.mxu0 %v7753_v3 }
  0x7e   : > { %1673 = vmatprep.mubr.bf16.mxu1 %v7758_v4  ;;  %1795 = vmatpush2.bf16.msra.mxu0 %v7043_v6  ;;  %v7887_v6 = vld [vmem:[%s10203_s0 + $0x140] ss:$16 sps:$4 sm:$0xff]  }
  0x7f   : > { %1988 = vmatpush2.bf16.msra.mxu1 %v7046_v7  ;;  %1796 = vmatprep.subr.bf16.mxu0 %v7057_v10  ;;  %v7892_v7 = vld [vmem:[%s10203_s0 + $0x148] ss:$16 sps:$4 sm:$0xff]   ;;  %v7897_v10 = vld [vmem:[%s10203_s0 + $0x164] ss:$16 sps:$4 sm:$0xff]  }
  0x80   : > { %1989 = vmatprep.subr.bf16.mxu1 %v7060_v11  ;;  %v7902_v11 = vld [vmem:[%s10203_s0 + $0x16c] ss:$16 sps:$4 sm:$0xff]  }
  0x82   : > { %1797 = vmatpush2.bf16.msra.mxu0 %v7055_v12  ;;  %v7911_v12 = vld [vmem:[%s10203_s0 + $0x160] ss:$16 sps:$4 sm:$0xff]  }
  0x83   : > { %1990 = vmatpush2.bf16.msra.mxu1 %v7058_v15  ;;  %1798 = vmatprep.subr.bf16.mxu0 %v7069_v16  ;;  %v7916_v15 = vld [vmem:[%s10203_s0 + $0x168] ss:$16 sps:$4 sm:$0xff]   ;;  %v7921_v16 = vld [vmem:[%s10203_s0 + $0x184] ss:$16 sps:$4 sm:$0xff]  }
  0x84   : > { %1991 = vmatprep.subr.bf16.mxu1 %v7072_v20  ;;  %1481 = vmatmul.mubr.bf16.gmra.mxu0 %v7772_v13  ;;  %v7926_v20 = vld [vmem:[%s10203_s0 + $0x18c] ss:$16 sps:$4 sm:$0xff]  }
  0x85   : > { %1674 = vmatmul.mubr.bf16.gmra.mxu1 %v7780_v21  ;;  %1490 = vmatprep.mubr.bf16.mxu0 %v7785_v22 }
  0x86   : > { %1683 = vmatprep.mubr.bf16.mxu1 %v7790_v23  ;;  %1799 = vmatpush2.bf16.msra.mxu0 %v7067_v24  ;;  %v7935_v24 = vld [vmem:[%s10203_s0 + $0x180] ss:$16 sps:$4 sm:$0xff]  }
  0x87   : > { %1992 = vmatpush2.bf16.msra.mxu1 %v7070_v27  ;;  %1800 = vmatprep.subr.bf16.mxu0 %v7081_v28  ;;  %v7940_v27 = vld [vmem:[%s10203_s0 + $0x188] ss:$16 sps:$4 sm:$0xff]   ;;  %v7945_v28 = vld [vmem:[%s10203_s0 + $0x1a4] ss:$16 sps:$4 sm:$0xff]  }
  0x88   : > { %1993 = vmatprep.subr.bf16.mxu1 %v7084_v29  ;;  %v7950_v29 = vld [vmem:[%s10203_s0 + $0x1ac] ss:$16 sps:$4 sm:$0xff]  }
  0x8a   : > { %1801 = vmatpush2.bf16.msra.mxu0 %v7079_v34  ;;  %v7959_v34 = vld [vmem:[%s10203_s0 + $0x1a0] ss:$16 sps:$4 sm:$0xff]  }
  0x8b   : > { %1994 = vmatpush2.bf16.msra.mxu1 %v7082_v35  ;;  %1802 = vmatprep.subr.bf16.mxu0 %v7093_v40  ;;  %v7964_v35 = vld [vmem:[%s10203_s0 + $0x1a8] ss:$16 sps:$4 sm:$0xff]   ;;  %v7969_v40 = vld [vmem:[%s10203_s0 + $0x1c4] ss:$16 sps:$4 sm:$0xff]  }
  0x8c   : > { %1995 = vmatprep.subr.bf16.mxu1 %v7096_v44  ;;  %1491 = vmatmul.mubr.bf16.gmra.mxu0 %v7803_v32  ;;  %v7983_v44 = vld [vmem:[%s10203_s0 + $0x1c0] ss:$16 sps:$4 sm:$0xff]  }
  0x8d   : > { %1684 = vmatmul.mubr.bf16.gmra.mxu1 %v7808_v33  ;;  %1500 = vmatprep.mubr.bf16.mxu0 %v7815_v38  ;;  %10237 = vst [vmem:[#allocation4_spill] sm:$0xff] %v7983_v44 }
  0x8e   : > { %1693 = vmatprep.mubr.bf16.mxu1 %v7820_v39  ;;  %1803 = vmatpush2.bf16.msra.mxu0 %v7091_v41  ;;  %v7974_v41 = vld [vmem:[%s10203_s0 + $0x1cc] ss:$16 sps:$4 sm:$0xff]  }
  0x8f   : > { %1996 = vmatpush2.bf16.msra.mxu1 %v7094_v45  ;;  %1804 = vmatprep.subr.bf16.mxu0 %v7105_v47  ;;  %v7988_v45 = vld [vmem:[%s10203_s0 + $0x1c8] ss:$16 sps:$4 sm:$0xff]   ;;  %v7998_v47 = vld [vmem:[%s10203_s0 + $0x1ec] ss:$16 sps:$4 sm:$0xff]  }
  0x90   : > { %1997 = vmatprep.subr.bf16.mxu1 %v7108_v53  ;;  %10238 = vst [vmem:[#allocation5_spill] sm:$0xff] %v7988_v45  ;;  %10240 = vst [vmem:[#allocation7_spill] sm:$0xff] %v7998_v47  ;;  %v8012_v53 = vld [vmem:[%s10203_s0 + $0x1e8] ss:$16 sps:$4 sm:$0xff]  }
  0x91   : > { %10242 = vst [vmem:[#allocation9_spill] sm:$0xff] %v8012_v53 }
  0x92   : > { %1805 = vmatpush2.bf16.msra.mxu0 %v7103_v46  ;;  %v7993_v46 = vld [vmem:[%s10203_s0 + $0x1e4] ss:$16 sps:$4 sm:$0xff]  }
  0x93   : > { %1998 = vmatpush2.bf16.msra.mxu1 %v7106_v52  ;;  %3508 = vmatprep.subr.bf16.mxu0 %v7111_v57  ;;  %10239 = vst [vmem:[#allocation6_spill] sm:$0xff] %v7993_v46  ;;  %v8007_v52 = vld [vmem:[%s10203_s0 + $0x1e0] ss:$16 sps:$4 sm:$0xff]   ;;  %v7397_v57 = vld [vmem:[%s10203_s0 + $0x4] ss:$16 sps:$4 sm:$0xff]  }
  0x94   : > { %3701 = vmatprep.subr.bf16.mxu1 %v7114_v59  ;;  %1501 = vmatmul.mubr.bf16.gmra.mxu0 %v7835_v48  ;;  %10241 = vst [vmem:[#allocation8_spill] sm:$0xff] %v8007_v52  ;;  %v7398_v59 = vld [vmem:[%s10203_s0 + $0xc] ss:$16 sps:$4 sm:$0xff]  }
  0x95   : > { %1694 = vmatmul.mubr.bf16.gmra.mxu1 %v7840_v51  ;;  %1510 = vmatprep.mubr.bf16.mxu0 %v7847_v56 }
  0x96   : > { %1703 = vmatprep.mubr.bf16.mxu1 %v7853_v58 }
  0x9c   : > { %1511 = vmatmul.mubr.bf16.gmra.mxu0 %v7863_v62 }
  0x9d   : > { %1704 = vmatmul.mubr.bf16.gmra.mxu1 %v7868_v63  ;;  %1520 = vmatprep.mubr.bf16.mxu0 %v7873_v0 }
  0x9e   : > { %1713 = vmatprep.mubr.bf16.mxu1 %v7878_v1 }
  0xa4   : > { %1521 = vmatmul.mubr.bf16.gmra.mxu0 %v7887_v6 }
  0xa5   : > { %1714 = vmatmul.mubr.bf16.gmra.mxu1 %v7892_v7  ;;  %1530 = vmatprep.mubr.bf16.mxu0 %v7897_v10 }
  0xa6   : > { %1723 = vmatprep.mubr.bf16.mxu1 %v7902_v11 }
  0xac   : > { %1531 = vmatmul.mubr.bf16.gmra.mxu0 %v7911_v12 }
  0xad   : > { %1724 = vmatmul.mubr.bf16.gmra.mxu1 %v7916_v15  ;;  %1540 = vmatprep.mubr.bf16.mxu0 %v7921_v16 }
  0xae   : > { %1733 = vmatprep.mubr.bf16.mxu1 %v7926_v20 }
  0xb4   : > { %1541 = vmatmul.mubr.bf16.gmra.mxu0 %v7935_v24 }
  0xb5   : > { %1734 = vmatmul.mubr.bf16.gmra.mxu1 %v7940_v27  ;;  %1550 = vmatprep.mubr.bf16.mxu0 %v7945_v28 }
  0xb6   : > { %1743 = vmatprep.mubr.bf16.mxu1 %v7950_v29 }
  0xbc   : > { %1551 = vmatmul.mubr.bf16.gmra.mxu0 %v7959_v34 }
  0xbd   : > { %1744 = vmatmul.mubr.bf16.gmra.mxu1 %v7964_v35  ;;  %1560 = vmatprep.mubr.bf16.mxu0 %v7969_v40 }
  0xbe   : > { %1753 = vmatprep.mubr.bf16.mxu1 %v7974_v41 }
  0xc4   : > { %1561 = vmatmul.mubr.bf16.gmra.mxu0 %v7983_v44  ;;  %v7120_v44 = vld [vmem:[%s7506_s26 + $0x6c4] ss:$16 sps:$4 sm:$0xff]  }
  0xc5   : > { %1754 = vmatmul.mubr.bf16.gmra.mxu1 %v7988_v45  ;;  %1570 = vmatprep.mubr.bf16.mxu0 %v7993_v46  ;;  %v7112_v46 = vld [vmem:[%s7506_s26 + $0x6e0] ss:$16 sps:$4 sm:$0xff]   ;;  %v7117_v45 = vld [vmem:[%s7506_s26 + $0x4c4] ss:$16 sps:$4 sm:$0xff]  }
  0xc6   : > { %1763 = vmatprep.mubr.bf16.mxu1 %v7998_v47  ;;  %v7109_v47 = vld [vmem:[%s7506_s26 + $0x4e0] ss:$16 sps:$4 sm:$0xff]  }
  0xcc   : > { %1571 = vmatmul.mubr.bf16.gmra.mxu0 %v8007_v52  ;;  %v7123_v52 = vld [vmem:[%s7506_s26 + $0x4a4] ss:$16 sps:$4 sm:$0xff]  }
  0xcd   : > { %1764 = vmatmul.mubr.bf16.gmra.mxu1 %v8012_v53  ;;  %1806 = vmatprep.mubr.bf16.mxu0 %v7397_v57  ;;  %v7115_v57 = vld [vmem:[%s7506_s26 + $0x4c0] ss:$16 sps:$4 sm:$0xff]  }
  0xce   : > { %1999 = vmatprep.mubr.bf16.mxu1 %v7398_v59  ;;  %v7118_v53 = vld [vmem:[%s7506_s26 + $0x6c0] ss:$16 sps:$4 sm:$0xff]   ;;  %v7126_v59 = vld [vmem:[%s7506_s26 + $0x6a4] ss:$16 sps:$4 sm:$0xff]  }
  0xd4   : > { %1807 = vmatmul.mubr.bf16.vlgmr.msra.gmra.mxu0 %v7581_v2  ;;  %v7121_v2 = vld [vmem:[%s7506_s26 + $0x4a0] ss:$16 sps:$4 sm:$0xff]  }
  0xd5   : > { %2000 = vmatmul.mubr.bf16.vlgmr.msra.gmra.mxu1 %v7588_v5  ;;  %3509 = vmatpush1.bf16.msra.mxu0 %v7109_v47  ;;  %v7124_v5 = vld [vmem:[%s7506_s26 + $0x6a0] ss:$16 sps:$4 sm:$0xff]   ;;  %v7132_v47 = vld [vmem:[%s7506_s26 + $0x684] ss:$16 sps:$4 sm:$0xff]  }
  0xd6   : > { %3702 = vmatpush1.bf16.msra.mxu1 %v7112_v46  ;;  %1816 = vmatprep.mubr.bf16.mxu0 %v7595_v8  ;;  %v7129_v46 = vld [vmem:[%s7506_s26 + $0x484] ss:$16 sps:$4 sm:$0xff]   ;;  %v7127_v8 = vld [vmem:[%s7506_s26 + $0x480] ss:$16 sps:$4 sm:$0xff]  }
  0xd7   : > { %2009 = vmatprep.mubr.bf16.mxu1 %v7600_v9  ;;  %3510 = vmatprep.subr.bf16.mxu0 %v7117_v45  ;;  %v7130_v9 = vld [vmem:[%s7506_s26 + $0x680] ss:$16 sps:$4 sm:$0xff]   ;;  %v7138_v45 = vld [vmem:[%s7506_s26 + $0x664] ss:$16 sps:$4 sm:$0xff]  }
  0xd8   : > { %3703 = vmatprep.subr.bf16.mxu1 %v7120_v44  ;;  %v7135_v44 = vld [vmem:[%s7506_s26 + $0x464] ss:$16 sps:$4 sm:$0xff]  }
  0xd9   : > { %3511 = vmatpush1.bf16.msra.mxu0 %v7115_v57  ;;  %v7147_v57 = vld [vmem:[%s7506_s26 + $0x424] ss:$16 sps:$4 sm:$0xff]  }
  0xda   : > { %3704 = vmatpush1.bf16.msra.mxu1 %v7118_v53  ;;  %3512 = vmatprep.subr.bf16.mxu0 %v7123_v52  ;;  %v7136_v52 = vld [vmem:[%s7506_s26 + $0x660] ss:$16 sps:$4 sm:$0xff]  }
  0xdb   : > { %3705 = vmatprep.subr.bf16.mxu1 %v7126_v59  ;;  %v7142_v53 = vld [vmem:[%s7506_s26 + $0x640] ss:$16 sps:$4 sm:$0xff]   ;;  %v7150_v59 = vld [vmem:[%s7506_s26 + $0x624] ss:$16 sps:$4 sm:$0xff]  }
  0xdc   : > { %1817 = vmatmul.mubr.bf16.gmra.mxu0 %v7613_v14  ;;  %v7133_v14 = vld [vmem:[%s7506_s26 + $0x460] ss:$16 sps:$4 sm:$0xff]  }
  0xdd   : > { %2010 = vmatmul.mubr.bf16.gmra.mxu1 %v7620_v17  ;;  %1826 = vmatprep.mubr.bf16.mxu0 %v7625_v18  ;;  %v7141_v17 = vld [vmem:[%s7506_s26 + $0x444] ss:$16 sps:$4 sm:$0xff]  }
  0xde   : > { %2019 = vmatprep.mubr.bf16.mxu1 %v7630_v19  ;;  %3513 = vmatpush1.bf16.msra.mxu0 %v7121_v2  ;;  %v7144_v18 = vld [vmem:[%s7506_s26 + $0x644] ss:$16 sps:$4 sm:$0xff]   ;;  %v7139_v19 = vld [vmem:[%s7506_s26 + $0x440] ss:$16 sps:$4 sm:$0xff]  }
  0xdf   : > { %3706 = vmatpush1.bf16.msra.mxu1 %v7124_v5  ;;  %3514 = vmatprep.subr.bf16.mxu0 %v7129_v46  ;;  %v7145_v2 = vld [vmem:[%s7506_s26 + $0x420] ss:$16 sps:$4 sm:$0xff]   ;;  %v7159_v46 = vld [vmem:[%s7506_s26 + $0x5e4] ss:$16 sps:$4 sm:$0xff]  }
  0xe0   : > { %3707 = vmatprep.subr.bf16.mxu1 %v7132_v47  ;;  %v7154_v5 = vld [vmem:[%s7506_s26 + $0x600] ss:$16 sps:$4 sm:$0xff]   ;;  %v7162_v47 = vld [vmem:[%s7506_s26 + $0x7e4] ss:$16 sps:$4 sm:$0xff]  }
  0xe2   : > { %3515 = vmatpush1.bf16.msra.mxu0 %v7127_v8  ;;  %v7163_v8 = vld [vmem:[%s7506_s26 + $0x5c0] ss:$16 sps:$4 sm:$0xff]  }
  0xe3   : > { %3708 = vmatpush1.bf16.msra.mxu1 %v7130_v9  ;;  %3516 = vmatprep.subr.bf16.mxu0 %v7135_v44  ;;  %v7166_v9 = vld [vmem:[%s7506_s26 + $0x7c0] ss:$16 sps:$4 sm:$0xff]   ;;  %v7171_v44 = vld [vmem:[%s7506_s26 + $0x5a4] ss:$16 sps:$4 sm:$0xff]  }
  0xe4   : > { %3709 = vmatprep.subr.bf16.mxu1 %v7138_v45  ;;  %1827 = vmatmul.mubr.bf16.gmra.mxu0 %v7644_v25  ;;  %v7148_v25 = vld [vmem:[%s7506_s26 + $0x620] ss:$16 sps:$4 sm:$0xff]   ;;  %v7174_v45 = vld [vmem:[%s7506_s26 + $0x7a4] ss:$16 sps:$4 sm:$0xff]  }
  0xe5   : > { %2020 = vmatmul.mubr.bf16.gmra.mxu1 %v7649_v26  ;;  %1836 = vmatprep.mubr.bf16.mxu0 %v7657_v30  ;;  %v7153_v26 = vld [vmem:[%s7506_s26 + $0x404] ss:$16 sps:$4 sm:$0xff]  }
  0xe6   : > { %2029 = vmatprep.mubr.bf16.mxu1 %v7662_v31  ;;  %3517 = vmatpush1.bf16.msra.mxu0 %v7133_v14  ;;  %v7156_v30 = vld [vmem:[%s7506_s26 + $0x604] ss:$16 sps:$4 sm:$0xff]   ;;  %v7151_v31 = vld [vmem:[%s7506_s26 + $0x400] ss:$16 sps:$4 sm:$0xff]  }
  0xe7   : > { %3710 = vmatpush1.bf16.msra.mxu1 %v7136_v52  ;;  %3518 = vmatprep.subr.bf16.mxu0 %v7141_v17  ;;  %v7175_v14 = vld [vmem:[%s7506_s26 + $0x580] ss:$16 sps:$4 sm:$0xff]   ;;  %v7183_v17 = vld [vmem:[%s7506_s26 + $0x564] ss:$16 sps:$4 sm:$0xff]  }
  0xe8   : > { %3711 = vmatprep.subr.bf16.mxu1 %v7144_v18  ;;  %v7178_v52 = vld [vmem:[%s7506_s26 + $0x780] ss:$16 sps:$4 sm:$0xff]   ;;  %v7186_v18 = vld [vmem:[%s7506_s26 + $0x764] ss:$16 sps:$4 sm:$0xff]  }
  0xea   : > { %3519 = vmatpush1.bf16.msra.mxu0 %v7139_v19  ;;  %v7187_v19 = vld [vmem:[%s7506_s26 + $0x540] ss:$16 sps:$4 sm:$0xff]  }
  0xeb   : > { %3712 = vmatpush1.bf16.msra.mxu1 %v7142_v53  ;;  %3520 = vmatprep.subr.bf16.mxu0 %v7147_v57  ;;  %v7190_v53 = vld [vmem:[%s7506_s26 + $0x740] ss:$16 sps:$4 sm:$0xff]   ;;  %v7195_v57 = vld [vmem:[%s7506_s26 + $0x524] ss:$16 sps:$4 sm:$0xff]  }
  0xec   : > { %3713 = vmatprep.subr.bf16.mxu1 %v7150_v59  ;;  %1837 = vmatmul.mubr.bf16.gmra.mxu0 %v7675_v36  ;;  %v7157_v36 = vld [vmem:[%s7506_s26 + $0x5e0] ss:$16 sps:$4 sm:$0xff]   ;;  %v7198_v59 = vld [vmem:[%s7506_s26 + $0x724] ss:$16 sps:$4 sm:$0xff]  }
  0xed   : > { %2030 = vmatmul.mubr.bf16.gmra.mxu1 %v7680_v37  ;;  %1846 = vmatprep.mubr.bf16.mxu0 %v7689_v42  ;;  %v7160_v37 = vld [vmem:[%s7506_s26 + $0x7e0] ss:$16 sps:$4 sm:$0xff]   ;;  %v7165_v42 = vld [vmem:[%s7506_s26 + $0x5c4] ss:$16 sps:$4 sm:$0xff]  }
  0xee   : > { %2039 = vmatprep.mubr.bf16.mxu1 %v7694_v43  ;;  %3521 = vmatpush1.bf16.msra.mxu0 %v7145_v2  ;;  %v7168_v43 = vld [vmem:[%s7506_s26 + $0x7c4] ss:$16 sps:$4 sm:$0xff]   ;;  %v7199_v2 = vld [vmem:[%s7506_s26 + $0x500] ss:$16 sps:$4 sm:$0xff]  }
  0xef   : > { %3714 = vmatpush1.bf16.msra.mxu1 %v7148_v25  ;;  %3522 = vmatprep.subr.bf16.mxu0 %v7153_v26  ;;  %v7202_v25 = vld [vmem:[%s7506_s26 + $0x700] ss:$16 sps:$4 sm:$0xff]   ;;  %v7213_v26 = vld [vmem:[%s7506_s26 + $0x4ec] ss:$16 sps:$4 sm:$0xff]  }
  0xf0   : > { %3715 = vmatprep.subr.bf16.mxu1 %v7156_v30  ;;  %v7216_v30 = vld [vmem:[%s7506_s26 + $0x6ec] ss:$16 sps:$4 sm:$0xff]  }
  0xf2   : > { %3523 = vmatpush1.bf16.msra.mxu0 %v7151_v31 }
  0xf3   : > { %3716 = vmatpush1.bf16.msra.mxu1 %v7154_v5  ;;  %3524 = vmatprep.subr.bf16.mxu0 %v7159_v46 }
  0xf4   : > { %3717 = vmatprep.subr.bf16.mxu1 %v7162_v47  ;;  %1847 = vmatmul.mubr.bf16.gmra.mxu0 %v7708_v49  ;;  %v7169_v49 = vld [vmem:[%s7506_s26 + $0x5a0] ss:$16 sps:$4 sm:$0xff]  }
  0xf5   : > { %2040 = vmatmul.mubr.bf16.gmra.mxu1 %v7713_v50  ;;  %1856 = vmatprep.mubr.bf16.mxu0 %v7721_v54  ;;  %v7172_v50 = vld [vmem:[%s7506_s26 + $0x7a0] ss:$16 sps:$4 sm:$0xff]   ;;  %v7177_v54 = vld [vmem:[%s7506_s26 + $0x584] ss:$16 sps:$4 sm:$0xff]  }
  0xf6   : > { %2049 = vmatprep.mubr.bf16.mxu1 %v7726_v55  ;;  %3525 = vmatpush2.bf16.msra.mxu0 %v7157_v36  ;;  %v7180_v55 = vld [vmem:[%s7506_s26 + $0x784] ss:$16 sps:$4 sm:$0xff]  }
  0xf7   : > { %3718 = vmatpush2.bf16.msra.mxu1 %v7160_v37  ;;  %3526 = vmatprep.subr.bf16.mxu0 %v7165_v42 }
  0xf8   : > { %3719 = vmatprep.subr.bf16.mxu1 %v7168_v43 }
  0xfa   : > { %3527 = vmatpush2.bf16.msra.mxu0 %v7163_v8 }
  0xfb   : > { %3720 = vmatpush2.bf16.msra.mxu1 %v7166_v9  ;;  %3528 = vmatprep.subr.bf16.mxu0 %v7171_v44 }
  0xfc   : > { %3721 = vmatprep.subr.bf16.mxu1 %v7174_v45  ;;  %1857 = vmatmul.mubr.bf16.gmra.mxu0 %v7739_v60  ;;  %v7181_v60 = vld [vmem:[%s7506_s26 + $0x560] ss:$16 sps:$4 sm:$0xff]  }
  0xfd   : > { %2050 = vmatmul.mubr.bf16.gmra.mxu1 %v7744_v61  ;;  %1866 = vmatprep.mubr.bf16.mxu0 %v7753_v3  ;;  %v7184_v61 = vld [vmem:[%s7506_s26 + $0x760] ss:$16 sps:$4 sm:$0xff]   ;;  %v7189_v3 = vld [vmem:[%s7506_s26 + $0x544] ss:$16 sps:$4 sm:$0xff]  }
  0xfe   : > { %2059 = vmatprep.mubr.bf16.mxu1 %v7758_v4  ;;  %3529 = vmatpush2.bf16.msra.mxu0 %v7169_v49  ;;  %v7192_v4 = vld [vmem:[%s7506_s26 + $0x744] ss:$16 sps:$4 sm:$0xff]  }
  0xff   : > { %3722 = vmatpush2.bf16.msra.mxu1 %v7172_v50  ;;  %3530 = vmatprep.subr.bf16.mxu0 %v7177_v54 }
 0x100   : > { %3723 = vmatprep.subr.bf16.mxu1 %v7180_v55 }
 0x102   : > { %3531 = vmatpush2.bf16.msra.mxu0 %v7175_v14 }
 0x103   : > { %3724 = vmatpush2.bf16.msra.mxu1 %v7178_v52  ;;  %3532 = vmatprep.subr.bf16.mxu0 %v7183_v17 }
 0x104   : > { %3725 = vmatprep.subr.bf16.mxu1 %v7186_v18  ;;  %1867 = vmatmul.mubr.bf16.gmra.mxu0 %v7772_v13  ;;  %v7193_v13 = vld [vmem:[%s7506_s26 + $0x520] ss:$16 sps:$4 sm:$0xff]  }
 0x105   : > { %2060 = vmatmul.mubr.bf16.gmra.mxu1 %v7780_v21  ;;  %1876 = vmatprep.mubr.bf16.mxu0 %v7785_v22  ;;  %v7196_v21 = vld [vmem:[%s7506_s26 + $0x720] ss:$16 sps:$4 sm:$0xff]   ;;  %v7201_v22 = vld [vmem:[%s7506_s26 + $0x504] ss:$16 sps:$4 sm:$0xff]  }
 0x106   : > { %2069 = vmatprep.mubr.bf16.mxu1 %v7790_v23  ;;  %3533 = vmatpush2.bf16.msra.mxu0 %v7181_v60  ;;  %v7204_v23 = vld [vmem:[%s7506_s26 + $0x704] ss:$16 sps:$4 sm:$0xff]  }
 0x107   : > { %3726 = vmatpush2.bf16.msra.mxu1 %v7184_v61  ;;  %3534 = vmatprep.subr.bf16.mxu0 %v7189_v3 }
 0x108   : > { %3727 = vmatprep.subr.bf16.mxu1 %v7192_v4 }
 0x10a   : > { %3535 = vmatpush2.bf16.msra.mxu0 %v7187_v19 }
 0x10b   : > { %3728 = vmatpush2.bf16.msra.mxu1 %v7190_v53  ;;  %3536 = vmatprep.subr.bf16.mxu0 %v7195_v57 }
 0x10c   : > { %3729 = vmatprep.subr.bf16.mxu1 %v7198_v59  ;;  %1877 = vmatmul.mubr.bf16.gmra.mxu0 %v7803_v32 }
 0x10d   : > { %2070 = vmatmul.mubr.bf16.gmra.mxu1 %v7808_v33  ;;  %1886 = vmatprep.mubr.bf16.mxu0 %v7815_v38 }
 0x10e   : > { %2079 = vmatprep.mubr.bf16.mxu1 %v7820_v39  ;;  %3537 = vmatpush2.bf16.msra.mxu0 %v7193_v13 }
 0x10f   : > { %3730 = vmatpush2.bf16.msra.mxu1 %v7196_v21  ;;  %3538 = vmatprep.subr.bf16.mxu0 %v7201_v22 }
 0x110   : > { %3731 = vmatprep.subr.bf16.mxu1 %v7204_v23 }
 0x112   : > { %3539 = vmatpush2.bf16.msra.mxu0 %v7199_v2 }
 0x113   : > { %3732 = vmatpush2.bf16.msra.mxu1 %v7202_v25  ;;  %3894 = vmatprep.subr.bf16.mxu0 %v7213_v26 }
 0x114   : > { %4087 = vmatprep.subr.bf16.mxu1 %v7216_v30  ;;  %v1422_v31 = vpop.f32.mrf.mxu0  ;;  %1887 = vmatmul.mubr.bf16.gmra.mxu0 %v7835_v48 }
 0x115   : > { %v1615_v32 = vpop.f32.mrf.mxu1  ;;  %2080 = vmatmul.mubr.bf16.gmra.mxu1 %v7840_v51  ;;  %1896 = vmatprep.mubr.bf16.mxu0 %v7847_v56 }
 0x116   : > { %v8120_v33 = vadd.f32 %v1615_v32, %v1422_v31  ;;  %2089 = vmatprep.mubr.bf16.mxu1 %v7853_v58  ;;  %v1424_v38 = vpop.f32.mrf.mxu0 }
 0x117   : > { %v1617_v39 = vpop.f32.mrf.mxu1 }
 0x118   : > { %v8124_v5 = vadd.f32 %v1617_v39, %v1424_v38  ;;  %v1426_v46 = vpop.f32.mrf.mxu0 }
 0x119   : > { %v1619_v47 = vpop.f32.mrf.mxu1 }
 0x11a   : > { %v8126_v36 = vadd.f32 %v1619_v47, %v1426_v46  ;;  %v1428_v37 = vpop.f32.mrf.mxu0 }
 0x11b   : > { %v1621_v42 = vpop.f32.mrf.mxu1 }
 0x11c   : > { %v8128_v43 = vadd.f32 %v1621_v42, %v1428_v37  ;;  %v1432_v48 = vpop.f32.mrf.mxu0  ;;  %1897 = vmatmul.mubr.bf16.gmra.mxu0 %v7863_v62 }
 0x11d   : > { %v1625_v51 = vpop.f32.mrf.mxu1  ;;  %2090 = vmatmul.mubr.bf16.gmra.mxu1 %v7868_v63  ;;  %1906 = vmatprep.mubr.bf16.mxu0 %v7873_v0 }
 0x11e   : > { %v8132_v56 = vadd.f32 %v1625_v51, %v1432_v48  ;;  %2099 = vmatprep.mubr.bf16.mxu1 %v7878_v1  ;;  %v1434_v58 = vpop.f32.mrf.mxu0 }
 0x11f   : > { %v1627_v8 = vpop.f32.mrf.mxu1 }
 0x120   : > { %v8136_v9 = vadd.f32 %v1627_v8, %v1434_v58  ;;  %v1436_v44 = vpop.f32.mrf.mxu0 }
 0x121   : > { %v1629_v45 = vpop.f32.mrf.mxu1 }
 0x122   : > { %v8138_v49 = vadd.f32 %v1629_v45, %v1436_v44  ;;  %v1438_v50 = vpop.f32.mrf.mxu0  ;;  %v10260_v44 = vld [vmem:[#allocation4_spill] sm:$0xff]  ;;  %v10261_v45 = vld [vmem:[#allocation5_spill] sm:$0xff] }
 0x123   : > { %v1631_v54 = vpop.f32.mrf.mxu1 }
 0x124   : > { %v8140_v55 = vadd.f32 %v1631_v54, %v1438_v50  ;;  %v1442_v62 = vpop.f32.mrf.mxu0  ;;  %1907 = vmatmul.mubr.bf16.gmra.mxu0 %v7887_v6  ;;  %v10264_v50 = vld [vmem:[#allocation7_spill] sm:$0xff] }
 0x125   : > { %v1635_v63 = vpop.f32.mrf.mxu1  ;;  %2100 = vmatmul.mubr.bf16.gmra.mxu1 %v7892_v7  ;;  %1916 = vmatprep.mubr.bf16.mxu0 %v7897_v10 }
 0x126   : > { %10243 = vst [vmem:[#allocation10_spill] sm:$0xff] %v8140_v55  ;;  %v8144_v0 = vadd.f32 %v1635_v63, %v1442_v62  ;;  %2109 = vmatprep.mubr.bf16.mxu1 %v7902_v11  ;;  %v1444_v1 = vpop.f32.mrf.mxu0 }
 0x127   : > { %v1637_v14 = vpop.f32.mrf.mxu1 }
 0x128   : > { %10244 = vst [vmem:[#allocation11_spill] sm:$0xff] %v8144_v0  ;;  %v8148_v52 = vadd.f32 %v1637_v14, %v1444_v1  ;;  %v1446_v17 = vpop.f32.mrf.mxu0 }
 0x129   : > { %v1639_v18 = vpop.f32.mrf.mxu1 }
 0x12a   : > { %10245 = vst [vmem:[#allocation12_spill] sm:$0xff] %v8148_v52  ;;  %v8150_v60 = vadd.f32 %v1639_v18, %v1446_v17  ;;  %v1448_v61 = vpop.f32.mrf.mxu0  ;;  %v8203_v18 = vld [vmem:[%s10203_s0 + $0x24] ss:$16 sps:$4 sm:$0xff]  }
 0x12b   : > { %v1641_v3 = vpop.f32.mrf.mxu1 }
 0x12c   : > { %10246 = vst [vmem:[#allocation13_spill] sm:$0xff] %v8150_v60  ;;  %v8152_v4 = vadd.f32 %v1641_v3, %v1448_v61  ;;  %v1452_v6 = vpop.f32.mrf.mxu0  ;;  %1917 = vmatmul.mubr.bf16.gmra.mxu0 %v7911_v12  ;;  %v8208_v61 = vld [vmem:[%s10203_s0 + $0x2c] ss:$16 sps:$4 sm:$0xff]  }
 0x12d   : > { %v1645_v7 = vpop.f32.mrf.mxu1  ;;  %2110 = vmatmul.mubr.bf16.gmra.mxu1 %v7916_v15  ;;  %1926 = vmatprep.mubr.bf16.mxu0 %v7921_v16 }
 0x12e   : > { %10247 = vst [vmem:[#allocation14_spill] sm:$0xff] %v8152_v4  ;;  %v8156_v10 = vadd.f32 %v1645_v7, %v1452_v6  ;;  %2119 = vmatprep.mubr.bf16.mxu1 %v7926_v20  ;;  %v1454_v11 = vpop.f32.mrf.mxu0 }
 0x12f   : > { %v1647_v19 = vpop.f32.mrf.mxu1 }
 0x130   : > { %10248 = vst [vmem:[#allocation15_spill] sm:$0xff] %v8156_v10  ;;  %v8160_v53 = vadd.f32 %v1647_v19, %v1454_v11  ;;  %v1456_v57 = vpop.f32.mrf.mxu0 }
 0x131   : > { %v1649_v59 = vpop.f32.mrf.mxu1 }
 0x132   : > { %10249 = vst [vmem:[#allocation16_spill] sm:$0xff] %v8160_v53  ;;  %v8162_v13 = vadd.f32 %v1649_v59, %v1456_v57  ;;  %v1458_v21 = vpop.f32.mrf.mxu0  ;;  %v10268_v57 = vld [vmem:[#allocation8_spill] sm:$0xff]  ;;  %v10269_v59 = vld [vmem:[#allocation9_spill] sm:$0xff] }
 0x133   : > { %v1651_v22 = vpop.f32.mrf.mxu1 }
 0x134   : > { %10250 = vst [vmem:[#allocation17_spill] sm:$0xff] %v8162_v13  ;;  %v8164_v23 = vadd.f32 %v1651_v22, %v1458_v21  ;;  %v1462_v12 = vpop.f32.mrf.mxu0  ;;  %1927 = vmatmul.mubr.bf16.gmra.mxu0 %v7935_v24 }
 0x135   : > { %v1655_v15 = vpop.f32.mrf.mxu1  ;;  %2120 = vmatmul.mubr.bf16.gmra.mxu1 %v7940_v27  ;;  %1936 = vmatprep.mubr.bf16.mxu0 %v7945_v28 }
 0x136   : > { %10251 = vst [vmem:[#allocation18_spill] sm:$0xff] %v8164_v23  ;;  %v8168_v16 = vadd.f32 %v1655_v15, %v1462_v12  ;;  %2129 = vmatprep.mubr.bf16.mxu1 %v7950_v29  ;;  %v1464_v20 = vpop.f32.mrf.mxu0 }
 0x137   : > { %v1657_v2 = vpop.f32.mrf.mxu1 }
 0x138   : > { %10252 = vst [vmem:[#allocation19_spill] sm:$0xff] %v8168_v16  ;;  %v8172_v25 = vadd.f32 %v1657_v2, %v1464_v20  ;;  %v1466_v26 = vpop.f32.mrf.mxu0 }
 0x139   : > { %v1659_v30 = vpop.f32.mrf.mxu1 }
 0x13a   : > { %10253 = vst [vmem:[#allocation20_spill] sm:$0xff] %v8172_v25  ;;  %v8174_v31 = vadd.f32 %v1659_v30, %v1466_v26  ;;  %v1468_v32 = vpop.f32.mrf.mxu0  ;;  %v8223_v26 = vld [vmem:[%s10203_s0 + $0x20] ss:$16 sps:$4 sm:$0xff]   ;;  %v8228_v30 = vld [vmem:[%s10203_s0 + $0x28] ss:$16 sps:$4 sm:$0xff]  }
 0x13b   : > { %v1661_v38 = vpop.f32.mrf.mxu1 }
 0x13c   : > { %10254 = vst [vmem:[#allocation21_spill] sm:$0xff] %v8174_v31  ;;  %v8176_v39 = vadd.f32 %v1661_v38, %v1468_v32  ;;  %v1472_v24 = vpop.f32.mrf.mxu0  ;;  %1937 = vmatmul.mubr.bf16.gmra.mxu0 %v7959_v34  ;;  %v7211_v38 = vld [vmem:[%s7506_s26 + $0x4e8] ss:$16 sps:$4 sm:$0xff]  }
 0x13d   : > { %v1665_v27 = vpop.f32.mrf.mxu1  ;;  %2130 = vmatmul.mubr.bf16.gmra.mxu1 %v7964_v35  ;;  %1946 = vmatprep.mubr.bf16.mxu0 %v7969_v40 }
 0x13e   : > { %10255 = vst [vmem:[#allocation22_spill] sm:$0xff] %v8176_v39  ;;  %v8180_v28 = vadd.f32 %v1665_v27, %v1472_v24  ;;  %2139 = vmatprep.mubr.bf16.mxu1 %v7974_v41  ;;  %v1474_v29 = vpop.f32.mrf.mxu0  ;;  %v10263_v41 = vld [vmem:[#allocation6_spill] sm:$0xff]  ;;  %v7214_v24 = vld [vmem:[%s7506_s26 + $0x6e8] ss:$16 sps:$4 sm:$0xff]  }
 0x13f   : > { %v1667_v46 = vpop.f32.mrf.mxu1  ;;  %v7382_v39 = vld [vmem:[%s7506_s26 + $0x728] ss:$16 sps:$4 sm:$0xff]  }
 0x140   : > { %10256 = vst [vmem:[#allocation23_spill] sm:$0xff] %v8180_v28  ;;  %v8184_v47 = vadd.f32 %v1667_v46, %v1474_v29  ;;  %v1476_v37 = vpop.f32.mrf.mxu0  ;;  %v8237_v46 = vld [vmem:[%s10203_s0 + $0x44] ss:$16 sps:$4 sm:$0xff]   ;;  %v7384_v28 = vld [vmem:[%s7506_s26 + $0x72c] ss:$16 sps:$4 sm:$0xff]  }
 0x141   : > { %v1669_v42 = vpop.f32.mrf.mxu1 }
 0x142   : > { %10257 = vst [vmem:[#allocation24_spill] sm:$0xff] %v8184_v47  ;;  %v8186_v48 = vadd.f32 %v1669_v42, %v1476_v37  ;;  %v1478_v51 = vpop.f32.mrf.mxu0  ;;  %v8242_v37 = vld [vmem:[%s10203_s0 + $0x4c] ss:$16 sps:$4 sm:$0xff]  }
 0x143   : > { %v1671_v58 = vpop.f32.mrf.mxu1 }
 0x144   : > { %10258 = vst [vmem:[#allocation25_spill] sm:$0xff] %v8186_v48  ;;  %v8188_v8 = vadd.f32 %v1671_v58, %v1478_v51  ;;  %v1482_v34 = vpop.f32.mrf.mxu0  ;;  %1947 = vmatmul.mubr.bf16.gmra.mxu0 %v10260_v44  ;;  %v7225_v51 = vld [vmem:[%s7506_s26 + $0x4cc] ss:$16 sps:$4 sm:$0xff]  }
 0x145   : > { %v1675_v35 = vpop.f32.mrf.mxu1  ;;  %2140 = vmatmul.mubr.bf16.gmra.mxu1 %v10261_v45  ;;  %1956 = vmatprep.mubr.bf16.mxu0 %v10263_v41  ;;  %v7228_v58 = vld [vmem:[%s7506_s26 + $0x6cc] ss:$16 sps:$4 sm:$0xff]   ;;  %v7223_v45 = vld [vmem:[%s7506_s26 + $0x4c8] ss:$16 sps:$4 sm:$0xff]  }
 0x146   : > { %10259 = vst [vmem:[#allocation26_spill] sm:$0xff] %v8188_v8  ;;  %v8192_v40 = vadd.f32 %v1675_v35, %v1482_v34  ;;  %2149 = vmatprep.mubr.bf16.mxu1 %v10264_v50  ;;  %v1484_v54 = vpop.f32.mrf.mxu0  ;;  %v7226_v41 = vld [vmem:[%s7506_s26 + $0x6c8] ss:$16 sps:$4 sm:$0xff]  }
 0x147   : > { %v1677_v62 = vpop.f32.mrf.mxu1  ;;  %v7358_v8 = vld [vmem:[%s7506_s26 + $0x768] ss:$16 sps:$4 sm:$0xff]  }
 0x148   : > { %10262 = vst [vmem:[#allocation4_spill] sm:$0xff] %v8192_v40  ;;  %v8196_v63 = vadd.f32 %v1677_v62, %v1484_v54  ;;  %v1486_v1 = vpop.f32.mrf.mxu0  ;;  %v7237_v62 = vld [vmem:[%s7506_s26 + $0x4ac] ss:$16 sps:$4 sm:$0xff]  }
 0x149   : > { %v1679_v14 = vpop.f32.mrf.mxu1  ;;  %v7360_v40 = vld [vmem:[%s7506_s26 + $0x76c] ss:$16 sps:$4 sm:$0xff]  }
 0x14a   : > { %10265 = vst [vmem:[#allocation5_spill] sm:$0xff] %v8196_v63  ;;  %v8198_v17 = vadd.f32 %v1679_v14, %v1486_v1  ;;  %v1488_v3 = vpop.f32.mrf.mxu0  ;;  %v7240_v1 = vld [vmem:[%s7506_s26 + $0x6ac] ss:$16 sps:$4 sm:$0xff]  }
 0x14b   : > { %v1681_v6 = vpop.f32.mrf.mxu1 }
 0x14c   : > { %10266 = vst [vmem:[#allocation6_spill] sm:$0xff] %v8198_v17  ;;  %v8210_v7 = vadd.f32 %v1681_v6, %v1488_v3  ;;  %v1492_v11 = vpop.f32.mrf.mxu0  ;;  %1957 = vmatmul.mubr.bf16.gmra.mxu0 %v10268_v57 }
 0x14d   : > { %v1685_v19 = vpop.f32.mrf.mxu1  ;;  %2150 = vmatmul.mubr.bf16.gmra.mxu1 %v10269_v59  ;;  %3540 = vmatprep.mubr.bf16.mxu0 %v8203_v18  ;;  %v8275_v59 = vld [vmem:[%s10203_s0 + $0x64] ss:$16 sps:$4 sm:$0xff]  }
 0x14e   : > { %10267 = vst [vmem:[#allocation7_spill] sm:$0xff] %v8210_v7  ;;  %v8214_v21 = vadd.f32 %v1685_v19, %v1492_v11  ;;  %3733 = vmatprep.mubr.bf16.mxu1 %v8208_v61  ;;  %v1494_v22 = vpop.f32.mrf.mxu0  ;;  %v8263_v11 = vld [vmem:[%s10203_s0 + $0x40] ss:$16 sps:$4 sm:$0xff]   ;;  %v8268_v19 = vld [vmem:[%s10203_s0 + $0x48] ss:$16 sps:$4 sm:$0xff]  }
 0x14f   : > { %v1687_v12 = vpop.f32.mrf.mxu1  ;;  %v7334_v7 = vld [vmem:[%s7506_s26 + $0x7a8] ss:$16 sps:$4 sm:$0xff]  }
 0x150   : > { %10270 = vst [vmem:[#allocation8_spill] sm:$0xff] %v8214_v21  ;;  %v8218_v15 = vadd.f32 %v1687_v12, %v1494_v22  ;;  %v1496_v20 = vpop.f32.mrf.mxu0  ;;  %v8280_v22 = vld [vmem:[%s10203_s0 + $0x6c] ss:$16 sps:$4 sm:$0xff]  }
 0x151   : > { %v1689_v2 = vpop.f32.mrf.mxu1  ;;  %v7336_v21 = vld [vmem:[%s7506_s26 + $0x7ac] ss:$16 sps:$4 sm:$0xff]  }
 0x152   : > { %10271 = vst [vmem:[#allocation9_spill] sm:$0xff] %v8218_v15  ;;  %v8230_v32 = vadd.f32 %v1689_v2, %v1496_v20  ;;  %v1498_v27 = vpop.f32.mrf.mxu0  ;;  %v7235_v2 = vld [vmem:[%s7506_s26 + $0x4a8] ss:$16 sps:$4 sm:$0xff]  }
 0x153   : > { %v1691_v29 = vpop.f32.mrf.mxu1 }
 0x154   : > { %10272 = vst [vmem:[#allocation27_spill] sm:$0xff] %v8230_v32  ;;  %v8244_v42 = vadd.f32 %v1691_v29, %v1498_v27  ;;  %v1502_v34 = vpop.f32.mrf.mxu0  ;;  %3541 = vmatmul.mubr.bf16.vlgmr.msra.gmra.mxu0 %v8223_v26  ;;  %v7249_v27 = vld [vmem:[%s7506_s26 + $0x48c] ss:$16 sps:$4 sm:$0xff]  }
 0x155   : > { %v1695_v35 = vpop.f32.mrf.mxu1  ;;  %3734 = vmatmul.mubr.bf16.vlgmr.msra.gmra.mxu1 %v8228_v30  ;;  %3895 = vmatpush1.bf16.msra.mxu0 %v7211_v38  ;;  %v7238_v38 = vld [vmem:[%s7506_s26 + $0x6a8] ss:$16 sps:$4 sm:$0xff]   ;;  %v7252_v29 = vld [vmem:[%s7506_s26 + $0x68c] ss:$16 sps:$4 sm:$0xff]  }
 0x156   : > { %10273 = vst [vmem:[#allocation28_spill] sm:$0xff] %v8244_v42  ;;  %v8250_v44 = vadd.f32 %v1695_v35, %v1502_v34  ;;  %4088 = vmatpush1.bf16.msra.mxu1 %v7214_v24  ;;  %v1504_v50 = vpop.f32.mrf.mxu0  ;;  %3550 = vmatprep.mubr.bf16.mxu0 %v8237_v46  ;;  %v7310_v42 = vld [vmem:[%s7506_s26 + $0x7e8] ss:$16 sps:$4 sm:$0xff]  }
 0x157   : > { %v1697_v54 = vpop.f32.mrf.mxu1  ;;  %3743 = vmatprep.mubr.bf16.mxu1 %v8242_v37  ;;  %3896 = vmatprep.subr.bf16.mxu0 %v7225_v51 }
 0x158   : > { %10274 = vst [vmem:[#allocation29_spill] sm:$0xff] %v8250_v44  ;;  %v8258_v14 = vadd.f32 %v1697_v54, %v1504_v50  ;;  %4089 = vmatprep.subr.bf16.mxu1 %v7228_v58  ;;  %v1506_v3 = vpop.f32.mrf.mxu0  ;;  %v7250_v50 = vld [vmem:[%s7506_s26 + $0x688] ss:$16 sps:$4 sm:$0xff]   ;;  %v7312_v44 = vld [vmem:[%s7506_s26 + $0x7ec] ss:$16 sps:$4 sm:$0xff]  }
 0x159   : > { %v1699_v6 = vpop.f32.mrf.mxu1  ;;  %3897 = vmatpush1.bf16.msra.mxu0 %v7223_v45 }
 0x15a   : > { %10275 = vst [vmem:[#allocation30_spill] sm:$0xff] %v8258_v14  ;;  %v8270_v57 = vadd.f32 %v1699_v6, %v1506_v3  ;;  %4090 = vmatpush1.bf16.msra.mxu1 %v7226_v41  ;;  %v1508_v12 = vpop.f32.mrf.mxu0  ;;  %3898 = vmatprep.subr.bf16.mxu0 %v7237_v62  ;;  %v7247_v41 = vld [vmem:[%s7506_s26 + $0x488] ss:$16 sps:$4 sm:$0xff]   ;;  %v7261_v62 = vld [vmem:[%s7506_s26 + $0x46c] ss:$16 sps:$4 sm:$0xff]  }
 0x15b   : > { %v1701_v20 = vpop.f32.mrf.mxu1  ;;  %4091 = vmatprep.subr.bf16.mxu1 %v7240_v1  ;;  %v7264_v1 = vld [vmem:[%s7506_s26 + $0x66c] ss:$16 sps:$4 sm:$0xff]  }
 0x15c   : > { %10276 = vst [vmem:[#allocation31_spill] sm:$0xff] %v8270_v57  ;;  %v8284_v24 = vadd.f32 %v1701_v20, %v1508_v12  ;;  %v1512_v51 = vpop.f32.mrf.mxu0  ;;  %3551 = vmatmul.mubr.bf16.gmra.mxu0 %v8263_v11  ;;  %v8303_v12 = vld [vmem:[%s10203_s0 + $0x60] ss:$16 sps:$4 sm:$0xff]   ;;  %v8308_v20 = vld [vmem:[%s10203_s0 + $0x68] ss:$16 sps:$4 sm:$0xff]  }
 0x15d   : > { %v1705_v58 = vpop.f32.mrf.mxu1  ;;  %3744 = vmatmul.mubr.bf16.gmra.mxu1 %v8268_v19  ;;  %3560 = vmatprep.mubr.bf16.mxu0 %v8275_v59 }
 0x15e   : > { %10277 = vst [vmem:[#allocation32_spill] sm:$0xff] %v8284_v24  ;;  %v8290_v34 = vadd.f32 %v1705_v58, %v1512_v51  ;;  %3753 = vmatprep.mubr.bf16.mxu1 %v8280_v22  ;;  %v1514_v35 = vpop.f32.mrf.mxu0  ;;  %3899 = vmatpush1.bf16.msra.mxu0 %v7235_v2  ;;  %v7259_v58 = vld [vmem:[%s7506_s26 + $0x468] ss:$16 sps:$4 sm:$0xff]  }
 0x15f   : > { %v1707_v45 = vpop.f32.mrf.mxu1  ;;  %4092 = vmatpush1.bf16.msra.mxu1 %v7238_v38  ;;  %3900 = vmatprep.subr.bf16.mxu0 %v7249_v27  ;;  %v8315_v38 = vld [vmem:[%s10203_s0 + $0x84] ss:$16 sps:$4 sm:$0xff]   ;;  %v8320_v27 = vld [vmem:[%s10203_s0 + $0x8c] ss:$16 sps:$4 sm:$0xff]   ;;  %v7286_v24 = vld [vmem:[%s7506_s26 + $0x628] ss:$16 sps:$4 sm:$0xff]  }
 0x160   : > { %10278 = vst [vmem:[#allocation33_spill] sm:$0xff] %v8290_v34  ;;  %v8296_v54 = vadd.f32 %v1707_v45, %v1514_v35  ;;  %4093 = vmatprep.subr.bf16.mxu1 %v7252_v29  ;;  %v1516_v3 = vpop.f32.mrf.mxu0  ;;  %v7262_v35 = vld [vmem:[%s7506_s26 + $0x668] ss:$16 sps:$4 sm:$0xff]   ;;  %v7288_v34 = vld [vmem:[%s7506_s26 + $0x62c] ss:$16 sps:$4 sm:$0xff]  }
 0x161   : > { %v1709_v6 = vpop.f32.mrf.mxu1 }
 0x162   : > { %10279 = vst [vmem:[#allocation34_spill] sm:$0xff] %v8296_v54  ;;  %v8310_v2 = vadd.f32 %v1709_v6, %v1516_v3  ;;  %v1518_v29 = vpop.f32.mrf.mxu0  ;;  %3901 = vmatpush1.bf16.msra.mxu0 %v7247_v41  ;;  %v7273_v3 = vld [vmem:[%s7506_s26 + $0x44c] ss:$16 sps:$4 sm:$0xff]  }
 0x163   : > { %v1711_v51 = vpop.f32.mrf.mxu1  ;;  %4094 = vmatpush1.bf16.msra.mxu1 %v7250_v50  ;;  %3902 = vmatprep.subr.bf16.mxu0 %v7261_v62  ;;  %v7276_v6 = vld [vmem:[%s7506_s26 + $0x64c] ss:$16 sps:$4 sm:$0xff]  }
 0x164   : > { %10280 = vst [vmem:[#allocation35_spill] sm:$0xff] %v8310_v2  ;;  %v8324_v45 = vadd.f32 %v1711_v51, %v1518_v29  ;;  %4095 = vmatprep.subr.bf16.mxu1 %v7264_v1  ;;  %v1522_v2 = vpop.f32.mrf.mxu0  ;;  %3561 = vmatmul.mubr.bf16.gmra.mxu0 %v8303_v12  ;;  %v7271_v1 = vld [vmem:[%s7506_s26 + $0x448] ss:$16 sps:$4 sm:$0xff]  }
 0x165   : > { %v1715_v54 = vpop.f32.mrf.mxu1  ;;  %3754 = vmatmul.mubr.bf16.gmra.mxu1 %v8308_v20  ;;  %3570 = vmatprep.mubr.bf16.mxu0 %v8315_v38  ;;  %v7274_v29 = vld [vmem:[%s7506_s26 + $0x648] ss:$16 sps:$4 sm:$0xff]  }
 0x166   : > { %10281 = vst [vmem:[#allocation36_spill] sm:$0xff] %v8324_v45  ;;  %v8330_v41 = vadd.f32 %v1715_v54, %v1522_v2  ;;  %3763 = vmatprep.mubr.bf16.mxu1 %v8320_v27  ;;  %v1524_v50 = vpop.f32.mrf.mxu0  ;;  %3903 = vmatpush1.bf16.msra.mxu0 %v7259_v58  ;;  %v7285_v45 = vld [vmem:[%s7506_s26 + $0x42c] ss:$16 sps:$4 sm:$0xff]   ;;  %v8348_v58 = vld [vmem:[%s10203_s0 + $0x88] ss:$16 sps:$4 sm:$0xff]  }
 0x167   : > { %v1717_v62 = vpop.f32.mrf.mxu1  ;;  %4096 = vmatpush1.bf16.msra.mxu1 %v7262_v35  ;;  %3904 = vmatprep.subr.bf16.mxu0 %v7273_v3  ;;  %v8355_v3 = vld [vmem:[%s10203_s0 + $0xa4] ss:$16 sps:$4 sm:$0xff]  }
 0x168   : > { %10282 = vst [vmem:[#allocation37_spill] sm:$0xff] %v8330_v41  ;;  %v8336_v51 = vadd.f32 %v1717_v62, %v1524_v50  ;;  %4097 = vmatprep.subr.bf16.mxu1 %v7276_v6  ;;  %v1526_v54 = vpop.f32.mrf.mxu0  ;;  %v8343_v41 = vld [vmem:[%s10203_s0 + $0x80] ss:$16 sps:$4 sm:$0xff]   ;;  %v8360_v6 = vld [vmem:[%s10203_s0 + $0xac] ss:$16 sps:$4 sm:$0xff]  }
 0x169   : > { %v1719_v2 = vpop.f32.mrf.mxu1 }
 0x16a   : > { %10283 = vst [vmem:[#allocation38_spill] sm:$0xff] %v8336_v51  ;;  %v8350_v35 = vadd.f32 %v1719_v2, %v1526_v54  ;;  %v1528_v50 = vpop.f32.mrf.mxu0  ;;  %3905 = vmatpush1.bf16.msra.mxu0 %v7271_v1  ;;  %v7283_v51 = vld [vmem:[%s7506_s26 + $0x428] ss:$16 sps:$4 sm:$0xff]   ;;  %v7297_v54 = vld [vmem:[%s7506_s26 + $0x40c] ss:$16 sps:$4 sm:$0xff]  }
 0x16b   : > { %v1721_v62 = vpop.f32.mrf.mxu1  ;;  %4098 = vmatpush1.bf16.msra.mxu1 %v7274_v29  ;;  %3906 = vmatprep.subr.bf16.mxu0 %v7285_v45  ;;  %v7300_v2 = vld [vmem:[%s7506_s26 + $0x60c] ss:$16 sps:$4 sm:$0xff]  }
 0x16c   : > { %10284 = vst [vmem:[#allocation39_spill] sm:$0xff] %v8350_v35  ;;  %v8364_v57 = vadd.f32 %v1721_v62, %v1528_v50  ;;  %4099 = vmatprep.subr.bf16.mxu1 %v7288_v34  ;;  %v1532_v35 = vpop.f32.mrf.mxu0  ;;  %3571 = vmatmul.mubr.bf16.gmra.mxu0 %v8343_v41  ;;  %v7295_v34 = vld [vmem:[%s7506_s26 + $0x408] ss:$16 sps:$4 sm:$0xff]  }
 0x16d   : > { %v1725_v14 = vpop.f32.mrf.mxu1  ;;  %3764 = vmatmul.mubr.bf16.gmra.mxu1 %v8348_v58  ;;  %3580 = vmatprep.mubr.bf16.mxu0 %v8355_v3  ;;  %v7298_v50 = vld [vmem:[%s7506_s26 + $0x608] ss:$16 sps:$4 sm:$0xff]  }
 0x16e   : > { %10285 = vst [vmem:[#allocation40_spill] sm:$0xff] %v8364_v57  ;;  %v8370_v1 = vadd.f32 %v1725_v14, %v1532_v35  ;;  %3773 = vmatprep.mubr.bf16.mxu1 %v8360_v6  ;;  %v1534_v29 = vpop.f32.mrf.mxu0  ;;  %3907 = vmatpush1.bf16.msra.mxu0 %v7283_v51  ;;  %v7309_v57 = vld [vmem:[%s7506_s26 + $0x5ec] ss:$16 sps:$4 sm:$0xff]  }
 0x16f   : > { %v1727_v45 = vpop.f32.mrf.mxu1  ;;  %4100 = vmatpush1.bf16.msra.mxu1 %v7286_v24  ;;  %3908 = vmatprep.subr.bf16.mxu0 %v7297_v54  ;;  %v8388_v24 = vld [vmem:[%s10203_s0 + $0xa8] ss:$16 sps:$4 sm:$0xff]   ;;  %v8395_v54 = vld [vmem:[%s10203_s0 + $0xc4] ss:$16 sps:$4 sm:$0xff]  }
 0x170   : > { %10286 = vst [vmem:[#allocation41_spill] sm:$0xff] %v8370_v1  ;;  %v8376_v62 = vadd.f32 %v1727_v45, %v1534_v29  ;;  %4101 = vmatprep.subr.bf16.mxu1 %v7300_v2  ;;  %v1536_v14 = vpop.f32.mrf.mxu0  ;;  %v8383_v1 = vld [vmem:[%s10203_s0 + $0xa0] ss:$16 sps:$4 sm:$0xff]   ;;  %v8400_v2 = vld [vmem:[%s10203_s0 + $0xcc] ss:$16 sps:$4 sm:$0xff]  }
 0x171   : > { %v1729_v35 = vpop.f32.mrf.mxu1 }
 0x172   : > { %10287 = vst [vmem:[#allocation42_spill] sm:$0xff] %v8376_v62  ;;  %v8390_v51 = vadd.f32 %v1729_v35, %v1536_v14  ;;  %v1538_v29 = vpop.f32.mrf.mxu0  ;;  %3909 = vmatpush1.bf16.msra.mxu0 %v7295_v34  ;;  %v7307_v62 = vld [vmem:[%s7506_s26 + $0x5e8] ss:$16 sps:$4 sm:$0xff]   ;;  %v7321_v14 = vld [vmem:[%s7506_s26 + $0x5cc] ss:$16 sps:$4 sm:$0xff]  }
 0x173   : > { %v1731_v45 = vpop.f32.mrf.mxu1  ;;  %4102 = vmatpush1.bf16.msra.mxu1 %v7298_v50  ;;  %3910 = vmatprep.subr.bf16.mxu0 %v7309_v57  ;;  %v7324_v35 = vld [vmem:[%s7506_s26 + $0x7cc] ss:$16 sps:$4 sm:$0xff]  }
 0x174   : > { %10288 = vst [vmem:[#allocation43_spill] sm:$0xff] %v8390_v51  ;;  %v8404_v32 = vadd.f32 %v1731_v45, %v1538_v29  ;;  %4103 = vmatprep.subr.bf16.mxu1 %v7312_v44  ;;  %v1542_v51 = vpop.f32.mrf.mxu0  ;;  %3581 = vmatmul.mubr.bf16.gmra.mxu0 %v8383_v1  ;;  %v7319_v44 = vld [vmem:[%s7506_s26 + $0x5c8] ss:$16 sps:$4 sm:$0xff]  }
 0x175   : > { %v1735_v15 = vpop.f32.mrf.mxu1  ;;  %3774 = vmatmul.mubr.bf16.gmra.mxu1 %v8388_v24  ;;  %3590 = vmatprep.mubr.bf16.mxu0 %v8395_v54  ;;  %v7322_v29 = vld [vmem:[%s7506_s26 + $0x7c8] ss:$16 sps:$4 sm:$0xff]  }
 0x176   : > { %10289 = vst [vmem:[#allocation44_spill] sm:$0xff] %v8404_v32  ;;  %v8410_v34 = vadd.f32 %v1735_v15, %v1542_v51  ;;  %3783 = vmatprep.mubr.bf16.mxu1 %v8400_v2  ;;  %v1544_v50 = vpop.f32.mrf.mxu0  ;;  %3911 = vmatpush2.bf16.msra.mxu0 %v7307_v62  ;;  %v7333_v32 = vld [vmem:[%s7506_s26 + $0x5ac] ss:$16 sps:$4 sm:$0xff]  }
 0x177   : > { %v1737_v57 = vpop.f32.mrf.mxu1  ;;  %4104 = vmatpush2.bf16.msra.mxu1 %v7310_v42  ;;  %3912 = vmatprep.subr.bf16.mxu0 %v7321_v14  ;;  %v8428_v42 = vld [vmem:[%s10203_s0 + $0xc8] ss:$16 sps:$4 sm:$0xff]   ;;  %v8435_v14 = vld [vmem:[%s10203_s0 + $0xe4] ss:$16 sps:$4 sm:$0xff]  }
 0x178   : > { %10290 = vst [vmem:[#allocation45_spill] sm:$0xff] %v8410_v34  ;;  %v8416_v45 = vadd.f32 %v1737_v57, %v1544_v50  ;;  %4105 = vmatprep.subr.bf16.mxu1 %v7324_v35  ;;  %v1546_v15 = vpop.f32.mrf.mxu0  ;;  %v8423_v34 = vld [vmem:[%s10203_s0 + $0xc0] ss:$16 sps:$4 sm:$0xff]   ;;  %v8440_v35 = vld [vmem:[%s10203_s0 + $0xec] ss:$16 sps:$4 sm:$0xff]  }
 0x179   : > { %v1739_v51 = vpop.f32.mrf.mxu1 }
 0x17a   : > { %10291 = vst [vmem:[#allocation46_spill] sm:$0xff] %v8416_v45  ;;  %v8430_v62 = vadd.f32 %v1739_v51, %v1546_v15  ;;  %v1548_v50 = vpop.f32.mrf.mxu0  ;;  %3913 = vmatpush2.bf16.msra.mxu0 %v7319_v44  ;;  %v7331_v45 = vld [vmem:[%s7506_s26 + $0x5a8] ss:$16 sps:$4 sm:$0xff]   ;;  %v7345_v15 = vld [vmem:[%s7506_s26 + $0x58c] ss:$16 sps:$4 sm:$0xff]  }
 0x17b   : > { %v1741_v57 = vpop.f32.mrf.mxu1  ;;  %4106 = vmatpush2.bf16.msra.mxu1 %v7322_v29  ;;  %3914 = vmatprep.subr.bf16.mxu0 %v7333_v32  ;;  %v7348_v51 = vld [vmem:[%s7506_s26 + $0x78c] ss:$16 sps:$4 sm:$0xff]  }
 0x17c   : > { %10292 = vst [vmem:[#allocation47_spill] sm:$0xff] %v8430_v62  ;;  %v8444_v17 = vadd.f32 %v1741_v57, %v1548_v50  ;;  %4107 = vmatprep.subr.bf16.mxu1 %v7336_v21  ;;  %v1552_v62 = vpop.f32.mrf.mxu0  ;;  %3591 = vmatmul.mubr.bf16.gmra.mxu0 %v8423_v34  ;;  %v7343_v21 = vld [vmem:[%s7506_s26 + $0x588] ss:$16 sps:$4 sm:$0xff]  }
 0x17d   : > { %v1745_v63 = vpop.f32.mrf.mxu1  ;;  %3784 = vmatmul.mubr.bf16.gmra.mxu1 %v8428_v42  ;;  %3600 = vmatprep.mubr.bf16.mxu0 %v8435_v14  ;;  %v7346_v50 = vld [vmem:[%s7506_s26 + $0x788] ss:$16 sps:$4 sm:$0xff]  }
 0x17e   : > { %10293 = vst [vmem:[#allocation48_spill] sm:$0xff] %v8444_v17  ;;  %v8450_v44 = vadd.f32 %v1745_v63, %v1552_v62  ;;  %3793 = vmatprep.mubr.bf16.mxu1 %v8440_v35  ;;  %v1554_v29 = vpop.f32.mrf.mxu0  ;;  %3915 = vmatpush2.bf16.msra.mxu0 %v7331_v45  ;;  %v7357_v17 = vld [vmem:[%s7506_s26 + $0x56c] ss:$16 sps:$4 sm:$0xff]  }
 0x17f   : > { %v1747_v32 = vpop.f32.mrf.mxu1  ;;  %4108 = vmatpush2.bf16.msra.mxu1 %v7334_v7  ;;  %3916 = vmatprep.subr.bf16.mxu0 %v7345_v15  ;;  %v8468_v7 = vld [vmem:[%s10203_s0 + $0xe8] ss:$16 sps:$4 sm:$0xff]   ;;  %v8475_v15 = vld [vmem:[%s10203_s0 + $0x104] ss:$16 sps:$4 sm:$0xff]  }
 0x180   : > { %10294 = vst [vmem:[#allocation49_spill] sm:$0xff] %v8450_v44  ;;  %v8456_v57 = vadd.f32 %v1747_v32, %v1554_v29  ;;  %4109 = vmatprep.subr.bf16.mxu1 %v7348_v51  ;;  %v1556_v63 = vpop.f32.mrf.mxu0  ;;  %v8463_v44 = vld [vmem:[%s10203_s0 + $0xe0] ss:$16 sps:$4 sm:$0xff]   ;;  %v8480_v51 = vld [vmem:[%s10203_s0 + $0x10c] ss:$16 sps:$4 sm:$0xff]  }
 0x181   : > { %v1749_v62 = vpop.f32.mrf.mxu1 }
 0x182   : > { %10295 = vst [vmem:[#allocation50_spill] sm:$0xff] %v8456_v57  ;;  %v8470_v45 = vadd.f32 %v1749_v62, %v1556_v63  ;;  %v1558_v29 = vpop.f32.mrf.mxu0  ;;  %3917 = vmatpush2.bf16.msra.mxu0 %v7343_v21  ;;  %v7355_v57 = vld [vmem:[%s7506_s26 + $0x568] ss:$16 sps:$4 sm:$0xff]   ;;  %v7369_v63 = vld [vmem:[%s7506_s26 + $0x54c] ss:$16 sps:$4 sm:$0xff]  }
 0x183   : > { %v1751_v32 = vpop.f32.mrf.mxu1  ;;  %4110 = vmatpush2.bf16.msra.mxu1 %v7346_v50  ;;  %3918 = vmatprep.subr.bf16.mxu0 %v7357_v17  ;;  %v7372_v62 = vld [vmem:[%s7506_s26 + $0x74c] ss:$16 sps:$4 sm:$0xff]  }
 0x184   : > { %10296 = vst [vmem:[#allocation51_spill] sm:$0xff] %v8470_v45  ;;  %v8484_v48 = vadd.f32 %v1751_v32, %v1558_v29  ;;  %4111 = vmatprep.subr.bf16.mxu1 %v7360_v40  ;;  %v1562_v45 = vpop.f32.mrf.mxu0  ;;  %3601 = vmatmul.mubr.bf16.gmra.mxu0 %v8463_v44  ;;  %v7367_v40 = vld [vmem:[%s7506_s26 + $0x548] ss:$16 sps:$4 sm:$0xff]  }
 0x185   : > { %v1755_v47 = vpop.f32.mrf.mxu1  ;;  %3794 = vmatmul.mubr.bf16.gmra.mxu1 %v8468_v7  ;;  %3610 = vmatprep.mubr.bf16.mxu0 %v8475_v15  ;;  %v7370_v29 = vld [vmem:[%s7506_s26 + $0x748] ss:$16 sps:$4 sm:$0xff]  }
 0x186   : > { %10297 = vst [vmem:[#allocation52_spill] sm:$0xff] %v8484_v48  ;;  %v8490_v21 = vadd.f32 %v1755_v47, %v1562_v45  ;;  %3803 = vmatprep.mubr.bf16.mxu1 %v8480_v51  ;;  %v1564_v50 = vpop.f32.mrf.mxu0  ;;  %3919 = vmatpush2.bf16.msra.mxu0 %v7355_v57  ;;  %v7381_v48 = vld [vmem:[%s7506_s26 + $0x52c] ss:$16 sps:$4 sm:$0xff]  }
 0x187   : > { %v1757_v17 = vpop.f32.mrf.mxu1  ;;  %4112 = vmatpush2.bf16.msra.mxu1 %v7358_v8  ;;  %3920 = vmatprep.subr.bf16.mxu0 %v7369_v63  ;;  %v8508_v8 = vld [vmem:[%s10203_s0 + $0x108] ss:$16 sps:$4 sm:$0xff]   ;;  %v8515_v63 = vld [vmem:[%s10203_s0 + $0x124] ss:$16 sps:$4 sm:$0xff]  }
 0x188   : > { %10298 = vst [vmem:[#allocation53_spill] sm:$0xff] %v8490_v21  ;;  %v8496_v32 = vadd.f32 %v1757_v17, %v1564_v50  ;;  %4113 = vmatprep.subr.bf16.mxu1 %v7372_v62  ;;  %v1566_v47 = vpop.f32.mrf.mxu0  ;;  %v8503_v21 = vld [vmem:[%s10203_s0 + $0x100] ss:$16 sps:$4 sm:$0xff]   ;;  %v8520_v62 = vld [vmem:[%s10203_s0 + $0x12c] ss:$16 sps:$4 sm:$0xff]  }
 0x189   : > { %v1759_v45 = vpop.f32.mrf.mxu1 }
 0x18a   : > { %10299 = vst [vmem:[#allocation54_spill] sm:$0xff] %v8496_v32  ;;  %v8510_v57 = vadd.f32 %v1759_v45, %v1566_v47  ;;  %v1568_v50 = vpop.f32.mrf.mxu0  ;;  %3921 = vmatpush2.bf16.msra.mxu0 %v7367_v40  ;;  %v7379_v32 = vld [vmem:[%s7506_s26 + $0x528] ss:$16 sps:$4 sm:$0xff]   ;;  %v7393_v47 = vld [vmem:[%s7506_s26 + $0x50c] ss:$16 sps:$4 sm:$0xff]  }
 0x18b   : > { %v1761_v17 = vpop.f32.mrf.mxu1  ;;  %4114 = vmatpush2.bf16.msra.mxu1 %v7370_v29  ;;  %3922 = vmatprep.subr.bf16.mxu0 %v7381_v48  ;;  %v7396_v45 = vld [vmem:[%s7506_s26 + $0x70c] ss:$16 sps:$4 sm:$0xff]   ;;  %v7391_v48 = vld [vmem:[%s7506_s26 + $0x508] ss:$16 sps:$4 sm:$0xff]  }
 0x18c   : > { %10300 = vst [vmem:[#allocation55_spill] sm:$0xff] %v8510_v57  ;;  %v8524_v31 = vadd.f32 %v1761_v17, %v1568_v50  ;;  %4115 = vmatprep.subr.bf16.mxu1 %v7384_v28  ;;  %v1572_v57 = vpop.f32.mrf.mxu0  ;;  %3611 = vmatmul.mubr.bf16.gmra.mxu0 %v8503_v21  ;;  %v7394_v28 = vld [vmem:[%s7506_s26 + $0x708] ss:$16 sps:$4 sm:$0xff]   ;;  %s156_s26 = sand.u32 1, %s7421_s12  }
 0x18d   : > { %v1765_v25 = vpop.f32.mrf.mxu1  ;;  %3804 = vmatmul.mubr.bf16.gmra.mxu1 %v8508_v8  ;;  %3620 = vmatprep.mubr.bf16.mxu0 %v8515_v63  ;;  %s8919_s7 = sshll.u32 %s156_s26, 10 }
 0x18e   : > { %10301 = vst [vmem:[#allocation56_spill] sm:$0xff] %v8524_v31  ;;  %v8530_v16 = vadd.f32 %v1765_v25, %v1572_v57  ;;  %3813 = vmatprep.mubr.bf16.mxu1 %v8520_v62  ;;  %v1574_v40 = vpop.f32.mrf.mxu0  ;;  %3923 = vmatpush2.bf16.msra.mxu0 %v7379_v32  ;;  %v8541_v25 = vld [vmem:[%s10203_s0 + $0x120] ss:$16 sps:$4 sm:$0xff]   ;;  %v8546_v57 = vld [vmem:[%s10203_s0 + $0x128] ss:$16 sps:$4 sm:$0xff]   ;;  %s8931_s12 = scalar_lea.vmem [#allocation3], %s8919_s7 }
 0x18f   : > { %v1767_v29 = vpop.f32.mrf.mxu1  ;;  %4116 = vmatpush2.bf16.msra.mxu1 %v7382_v39  ;;  %3924 = vmatprep.subr.bf16.mxu0 %v7393_v47  ;;  %v8553_v39 = vld [vmem:[%s10203_s0 + $0x144] ss:$16 sps:$4 sm:$0xff]   ;;  %v8558_v47 = vld [vmem:[%s10203_s0 + $0x14c] ss:$16 sps:$4 sm:$0xff]  }
 0x190   : > { %10302 = vst [vmem:[#allocation57_spill] sm:$0xff] %v8530_v16  ;;  %v8536_v50 = vadd.f32 %v1767_v29, %v1574_v40  ;;  %4117 = vmatprep.subr.bf16.mxu1 %v7396_v45  ;;  %v1576_v17 = vpop.f32.mrf.mxu0 }
 0x191   : > { %v1769_v31 = vpop.f32.mrf.mxu1 }
 0x192   : > { %10303 = vst [vmem:[#allocation58_spill] sm:$0xff] %v8536_v50  ;;  %v8548_v32 = vadd.f32 %v1769_v31, %v1576_v17  ;;  %v1578_v45 = vpop.f32.mrf.mxu0  ;;  %3925 = vmatpush2.bf16.msra.mxu0 %v7391_v48 }
 0x193   : > { %v1771_v40 = vpop.f32.mrf.mxu1  ;;  %4118 = vmatpush2.bf16.msra.mxu1 %v7394_v28 }
 0x194   : > { %10304 = vst [vmem:[#allocation59_spill] sm:$0xff] %v8548_v32  ;;  %v8560_v29 = vadd.f32 %v1771_v40, %v1578_v45  ;;  %v1808_v50 = vpop.f32.mrf.mxu0  ;;  %3621 = vmatmul.mubr.bf16.gmra.mxu0 %v8541_v25  ;;  %v8573_v45 = vld [vmem:[%s10203_s0 + $0x140] ss:$16 sps:$4 sm:$0xff]   ;;  %v8585_v40 = vld [vmem:[%s10203_s0 + $0x164] ss:$16 sps:$4 sm:$0xff]  }
 0x195   : > { %v2001_v16 = vpop.f32.mrf.mxu1  ;;  %3814 = vmatmul.mubr.bf16.gmra.mxu1 %v8546_v57  ;;  %3630 = vmatprep.mubr.bf16.mxu0 %v8553_v39 }
 0x196   : > { %10305 = vst [vmem:[#allocation60_spill] sm:$0xff] %v8560_v29  ;;  %v8564_v31 = vadd.f32 %v2001_v16, %v1808_v50  ;;  %3823 = vmatprep.mubr.bf16.mxu1 %v8558_v47  ;;  %v1810_v17 = vpop.f32.mrf.mxu0  ;;  %v8578_v16 = vld [vmem:[%s10203_s0 + $0x148] ss:$16 sps:$4 sm:$0xff]  }
 0x197   : > { %v2003_v32 = vpop.f32.mrf.mxu1 }
 0x198   : > { %10306 = vst [vmem:[#allocation61_spill] sm:$0xff] %v8564_v31  ;;  %v8568_v23 = vadd.f32 %v2003_v32, %v1810_v17  ;;  %v1812_v48 = vpop.f32.mrf.mxu0  ;;  %v8590_v32 = vld [vmem:[%s10203_s0 + $0x16c] ss:$16 sps:$4 sm:$0xff]  }
 0x199   : > { %v2005_v28 = vpop.f32.mrf.mxu1 }
 0x19a   : > { %10307 = vst [vmem:[#allocation62_spill] sm:$0xff] %v8568_v23  ;;  %v8580_v50 = vadd.f32 %v2005_v28, %v1812_v48  ;;  %v1814_v17 = vpop.f32.mrf.mxu0 }
 0x19b   : > { %v2007_v23 = vpop.f32.mrf.mxu1 }
 0x19c   : > { %10308 = vst [vmem:[#allocation63_spill] sm:$0xff] %v8580_v50  ;;  %v8592_v31 = vadd.f32 %v2007_v23, %v1814_v17  ;;  %v1818_v29 = vpop.f32.mrf.mxu0  ;;  %3631 = vmatmul.mubr.bf16.gmra.mxu0 %v8573_v45  ;;  %v8605_v23 = vld [vmem:[%s10203_s0 + $0x160] ss:$16 sps:$4 sm:$0xff]   ;;  %v8617_v17 = vld [vmem:[%s10203_s0 + $0x184] ss:$16 sps:$4 sm:$0xff]  }
 0x19d   : > { %v2011_v13 = vpop.f32.mrf.mxu1  ;;  %3824 = vmatmul.mubr.bf16.gmra.mxu1 %v8578_v16  ;;  %3640 = vmatprep.mubr.bf16.mxu0 %v8585_v40  ;;  %10312 = vst [vmem:[#allocation67_spill] sm:$0xff] %v8605_v23  ;;  %10315 = vst [vmem:[#allocation70_spill] sm:$0xff] %v8617_v17 }
 0x19e   : > { %10309 = vst [vmem:[#allocation64_spill] sm:$0xff] %v8592_v31  ;;  %v8596_v48 = vadd.f32 %v2011_v13, %v1818_v29  ;;  %3833 = vmatprep.mubr.bf16.mxu1 %v8590_v32  ;;  %v1820_v28 = vpop.f32.mrf.mxu0  ;;  %v8610_v13 = vld [vmem:[%s10203_s0 + $0x168] ss:$16 sps:$4 sm:$0xff]  }
 0x19f   : > { %v2013_v50 = vpop.f32.mrf.mxu1  ;;  %10313 = vst [vmem:[#allocation68_spill] sm:$0xff] %v8610_v13 }
 0x1a0   : > { %10310 = vst [vmem:[#allocation65_spill] sm:$0xff] %v8596_v48  ;;  %v8600_v53 = vadd.f32 %v2013_v50, %v1820_v28  ;;  %v1822_v10 = vpop.f32.mrf.mxu0  ;;  %v8622_v50 = vld [vmem:[%s10203_s0 + $0x18c] ss:$16 sps:$4 sm:$0xff]  }
 0x1a1   : > { %v2015_v4 = vpop.f32.mrf.mxu1  ;;  %10316 = vst [vmem:[#allocation71_spill] sm:$0xff] %v8622_v50 }
 0x1a2   : > { %10311 = vst [vmem:[#allocation66_spill] sm:$0xff] %v8600_v53  ;;  %v8612_v29 = vadd.f32 %v2015_v4, %v1822_v10  ;;  %v1824_v28 = vpop.f32.mrf.mxu0 }
 0x1a3   : > { %v2017_v53 = vpop.f32.mrf.mxu1 }
 0x1a4   : > { %10314 = vst [vmem:[#allocation69_spill] sm:$0xff] %v8612_v29  ;;  %v8624_v48 = vadd.f32 %v2017_v53, %v1824_v28  ;;  %v1828_v31 = vpop.f32.mrf.mxu0  ;;  %3641 = vmatmul.mubr.bf16.gmra.mxu0 %v8605_v23  ;;  %v8637_v53 = vld [vmem:[%s10203_s0 + $0x180] ss:$16 sps:$4 sm:$0xff]   ;;  %v8649_v28 = vld [vmem:[%s10203_s0 + $0x1a4] ss:$16 sps:$4 sm:$0xff]  }
 0x1a5   : > { %v2021_v60 = vpop.f32.mrf.mxu1  ;;  %3834 = vmatmul.mubr.bf16.gmra.mxu1 %v8610_v13  ;;  %3650 = vmatprep.mubr.bf16.mxu0 %v8617_v17  ;;  %10320 = vst [vmem:[#allocation75_spill] sm:$0xff] %v8637_v53  ;;  %10323 = vst [vmem:[#allocation78_spill] sm:$0xff] %v8649_v28 }
 0x1a6   : > { %10317 = vst [vmem:[#allocation72_spill] sm:$0xff] %v8624_v48  ;;  %v8628_v4 = vadd.f32 %v2021_v60, %v1828_v31  ;;  %3843 = vmatprep.mubr.bf16.mxu1 %v8622_v50  ;;  %v1830_v10 = vpop.f32.mrf.mxu0  ;;  %v8642_v60 = vld [vmem:[%s10203_s0 + $0x188] ss:$16 sps:$4 sm:$0xff]  }
 0x1a7   : > { %v2023_v29 = vpop.f32.mrf.mxu1  ;;  %10321 = vst [vmem:[#allocation76_spill] sm:$0xff] %v8642_v60 }
 0x1a8   : > { %10318 = vst [vmem:[#allocation73_spill] sm:$0xff] %v8628_v4  ;;  %v8632_v52 = vadd.f32 %v2023_v29, %v1830_v10  ;;  %v1832_v0 = vpop.f32.mrf.mxu0  ;;  %v8654_v29 = vld [vmem:[%s10203_s0 + $0x1ac] ss:$16 sps:$4 sm:$0xff]  }
 0x1a9   : > { %v2025_v55 = vpop.f32.mrf.mxu1  ;;  %10324 = vst [vmem:[#allocation79_spill] sm:$0xff] %v8654_v29 }
 0x1aa   : > { %10319 = vst [vmem:[#allocation74_spill] sm:$0xff] %v8632_v52  ;;  %v8644_v31 = vadd.f32 %v2025_v55, %v1832_v0  ;;  %v1834_v10 = vpop.f32.mrf.mxu0 }
 0x1ab   : > { %v2027_v52 = vpop.f32.mrf.mxu1 }
 0x1ac   : > { %10322 = vst [vmem:[#allocation77_spill] sm:$0xff] %v8644_v31  ;;  %v8656_v4 = vadd.f32 %v2027_v52, %v1834_v10  ;;  %v1838_v48 = vpop.f32.mrf.mxu0  ;;  %3651 = vmatmul.mubr.bf16.gmra.mxu0 %v8637_v53  ;;  %v8669_v52 = vld [vmem:[%s10203_s0 + $0x1a0] ss:$16 sps:$4 sm:$0xff]   ;;  %v8681_v10 = vld [vmem:[%s10203_s0 + $0x1c4] ss:$16 sps:$4 sm:$0xff]  }
 0x1ad   : > { %v2031_v50 = vpop.f32.mrf.mxu1  ;;  %3844 = vmatmul.mubr.bf16.gmra.mxu1 %v8642_v60  ;;  %3660 = vmatprep.mubr.bf16.mxu0 %v8649_v28  ;;  %10328 = vst [vmem:[#allocation83_spill] sm:$0xff] %v8669_v52  ;;  %10331 = vst [vmem:[#allocation86_spill] sm:$0xff] %v8681_v10 }
 0x1ae   : > { %10325 = vst [vmem:[#allocation80_spill] sm:$0xff] %v8656_v4  ;;  %v8660_v55 = vadd.f32 %v2031_v50, %v1838_v48  ;;  %3853 = vmatprep.mubr.bf16.mxu1 %v8654_v29  ;;  %v1840_v0 = vpop.f32.mrf.mxu0  ;;  %v8674_v48 = vld [vmem:[%s10203_s0 + $0x1a8] ss:$16 sps:$4 sm:$0xff]  }
 0x1af   : > { %v2033_v31 = vpop.f32.mrf.mxu1  ;;  %10329 = vst [vmem:[#allocation84_spill] sm:$0xff] %v8674_v48 }
 0x1b0   : > { %10326 = vst [vmem:[#allocation81_spill] sm:$0xff] %v8660_v55  ;;  %v8664_v17 = vadd.f32 %v2033_v31, %v1840_v0  ;;  %v1842_v13 = vpop.f32.mrf.mxu0  ;;  %v8686_v31 = vld [vmem:[%s10203_s0 + $0x1cc] ss:$16 sps:$4 sm:$0xff]  }
 0x1b1   : > { %v2035_v23 = vpop.f32.mrf.mxu1  ;;  %10332 = vst [vmem:[#allocation87_spill] sm:$0xff] %v8686_v31 }
 0x1b2   : > { %10327 = vst [vmem:[#allocation82_spill] sm:$0xff] %v8664_v17  ;;  %v8676_v50 = vadd.f32 %v2035_v23, %v1842_v13  ;;  %v1844_v0 = vpop.f32.mrf.mxu0 }
 0x1b3   : > { %v2037_v17 = vpop.f32.mrf.mxu1 }
 0x1b4   : > { %10330 = vst [vmem:[#allocation85_spill] sm:$0xff] %v8676_v50  ;;  %v8688_v55 = vadd.f32 %v2037_v17, %v1844_v0  ;;  %v1848_v4 = vpop.f32.mrf.mxu0  ;;  %3661 = vmatmul.mubr.bf16.gmra.mxu0 %v8669_v52  ;;  %v8701_v17 = vld [vmem:[%s10203_s0 + $0x1c0] ss:$16 sps:$4 sm:$0xff]   ;;  %v8713_v0 = vld [vmem:[%s10203_s0 + $0x1e4] ss:$16 sps:$4 sm:$0xff]  }
 0x1b5   : > { %v2041_v29 = vpop.f32.mrf.mxu1  ;;  %3854 = vmatmul.mubr.bf16.gmra.mxu1 %v8674_v48  ;;  %3670 = vmatprep.mubr.bf16.mxu0 %v8681_v10  ;;  %10336 = vst [vmem:[#allocation91_spill] sm:$0xff] %v8701_v17  ;;  %10339 = vst [vmem:[#allocation94_spill] sm:$0xff] %v8713_v0 }
 0x1b6   : > { %10333 = vst [vmem:[#allocation88_spill] sm:$0xff] %v8688_v55  ;;  %v8692_v23 = vadd.f32 %v2041_v29, %v1848_v4  ;;  %3863 = vmatprep.mubr.bf16.mxu1 %v8686_v31  ;;  %v1850_v13 = vpop.f32.mrf.mxu0  ;;  %v8706_v4 = vld [vmem:[%s10203_s0 + $0x1c8] ss:$16 sps:$4 sm:$0xff]  }
 0x1b7   : > { %v2043_v50 = vpop.f32.mrf.mxu1  ;;  %10337 = vst [vmem:[#allocation92_spill] sm:$0xff] %v8706_v4 }
 0x1b8   : > { %10334 = vst [vmem:[#allocation89_spill] sm:$0xff] %v8692_v23  ;;  %v8696_v28 = vadd.f32 %v2043_v50, %v1850_v13  ;;  %v1852_v60 = vpop.f32.mrf.mxu0  ;;  %v8718_v50 = vld [vmem:[%s10203_s0 + $0x1ec] ss:$16 sps:$4 sm:$0xff]  }
 0x1b9   : > { %v2045_v53 = vpop.f32.mrf.mxu1  ;;  %10340 = vst [vmem:[#allocation95_spill] sm:$0xff] %v8718_v50 }
 0x1ba   : > { %10335 = vst [vmem:[#allocation90_spill] sm:$0xff] %v8696_v28  ;;  %v8708_v29 = vadd.f32 %v2045_v53, %v1852_v60  ;;  %v1854_v13 = vpop.f32.mrf.mxu0 }
 0x1bb   : > { %v2047_v28 = vpop.f32.mrf.mxu1 }
 0x1bc   : > { %10338 = vst [vmem:[#allocation93_spill] sm:$0xff] %v8708_v29  ;;  %v8720_v23 = vadd.f32 %v2047_v28, %v1854_v13  ;;  %v1858_v55 = vpop.f32.mrf.mxu0  ;;  %3671 = vmatmul.mubr.bf16.gmra.mxu0 %v8701_v17  ;;  %v8733_v28 = vld [vmem:[%s10203_s0 + $0x1e0] ss:$16 sps:$4 sm:$0xff]   ;;  %v8745_v13 = vld [vmem:[%s10203_s0 + $0x204] ss:$16 sps:$4 sm:$0xff]  }
 0x1bd   : > { %v2051_v31 = vpop.f32.mrf.mxu1  ;;  %3864 = vmatmul.mubr.bf16.gmra.mxu1 %v8706_v4  ;;  %3680 = vmatprep.mubr.bf16.mxu0 %v8713_v0  ;;  %10346 = vst [vmem:[#allocation101_spill] sm:$0xff] %v8745_v13 }
 0x1be   : > { %10341 = vst [vmem:[#allocation96_spill] sm:$0xff] %v8720_v23  ;;  %v8724_v53 = vadd.f32 %v2051_v31, %v1858_v55  ;;  %3873 = vmatprep.mubr.bf16.mxu1 %v8718_v50  ;;  %v1860_v60 = vpop.f32.mrf.mxu0  ;;  %v8738_v55 = vld [vmem:[%s10203_s0 + $0x1e8] ss:$16 sps:$4 sm:$0xff]  }
 0x1bf   : > { %v2053_v29 = vpop.f32.mrf.mxu1  ;;  %10344 = vst [vmem:[#allocation99_spill] sm:$0xff] %v8738_v55 }
 0x1c0   : > { %10342 = vst [vmem:[#allocation97_spill] sm:$0xff] %v8724_v53  ;;  %v8728_v10 = vadd.f32 %v2053_v29, %v1860_v60  ;;  %v1862_v48 = vpop.f32.mrf.mxu0  ;;  %v8750_v29 = vld [vmem:[%s10203_s0 + $0x20c] ss:$16 sps:$4 sm:$0xff]  }
 0x1c1   : > { %v2055_v52 = vpop.f32.mrf.mxu1  ;;  %10347 = vst [vmem:[#allocation102_spill] sm:$0xff] %v8750_v29 }
 0x1c2   : > { %10343 = vst [vmem:[#allocation98_spill] sm:$0xff] %v8728_v10  ;;  %v8740_v31 = vadd.f32 %v2055_v52, %v1862_v48  ;;  %v1864_v60 = vpop.f32.mrf.mxu0 }
 0x1c3   : > { %v2057_v10 = vpop.f32.mrf.mxu1 }
 0x1c4   : > { %10345 = vst [vmem:[#allocation100_spill] sm:$0xff] %v8740_v31  ;;  %v8752_v53 = vadd.f32 %v2057_v10, %v1864_v60  ;;  %v1868_v23 = vpop.f32.mrf.mxu0  ;;  %3681 = vmatmul.mubr.bf16.gmra.mxu0 %v8733_v28  ;;  %v8765_v10 = vld [vmem:[%s10203_s0 + $0x200] ss:$16 sps:$4 sm:$0xff]  }
 0x1c5   : > { %v2061_v50 = vpop.f32.mrf.mxu1  ;;  %3874 = vmatmul.mubr.bf16.gmra.mxu1 %v8738_v55  ;;  %3690 = vmatprep.mubr.bf16.mxu0 %v8745_v13  ;;  %10351 = vst [vmem:[#allocation106_spill] sm:$0xff] %v8765_v10 }
 0x1c6   : > { %10348 = vst [vmem:[#allocation103_spill] sm:$0xff] %v8752_v53  ;;  %v8756_v52 = vadd.f32 %v2061_v50, %v1868_v23  ;;  %3883 = vmatprep.mubr.bf16.mxu1 %v8750_v29  ;;  %v1870_v48 = vpop.f32.mrf.mxu0  ;;  %v8770_v23 = vld [vmem:[%s10203_s0 + $0x208] ss:$16 sps:$4 sm:$0xff]  }
 0x1c7   : > { %v2063_v31 = vpop.f32.mrf.mxu1  ;;  %10352 = vst [vmem:[#allocation107_spill] sm:$0xff] %v8770_v23 }
 0x1c8   : > { %10349 = vst [vmem:[#allocation104_spill] sm:$0xff] %v8756_v52  ;;  %v8760_v0 = vadd.f32 %v2063_v31, %v1870_v48  ;;  %v1872_v4 = vpop.f32.mrf.mxu0 }
 0x1c9   : > { %v2065_v17 = vpop.f32.mrf.mxu1 }
 0x1ca   : > { %10350 = vst [vmem:[#allocation105_spill] sm:$0xff] %v8760_v0  ;;  %v8772_v50 = vadd.f32 %v2065_v17, %v1872_v4  ;;  %v1874_v60 = vpop.f32.mrf.mxu0 }
 0x1cb   : > { %v2067_v52 = vpop.f32.mrf.mxu1 }
 0x1cc   : > { %10353 = vst [vmem:[#allocation108_spill] sm:$0xff] %v8772_v50  ;;  %v8774_v53 = vadd.f32 %v2067_v52, %v1874_v60  ;;  %v1878_v31 = vpop.f32.mrf.mxu0  ;;  %3691 = vmatmul.mubr.bf16.gmra.mxu0 %v8765_v10 }
 0x1cd   : > { %v2071_v48 = vpop.f32.mrf.mxu1  ;;  %3884 = vmatmul.mubr.bf16.gmra.mxu1 %v8770_v23  ;;  %3926 = vmatprep.mubr.bf16.mxu0 %v8203_v18 }
 0x1ce   : > { %10354 = vst [vmem:[#allocation109_spill] sm:$0xff] %v8774_v53  ;;  %v8778_v0 = vadd.f32 %v2071_v48, %v1878_v31  ;;  %4119 = vmatprep.mubr.bf16.mxu1 %v8208_v61  ;;  %v1880_v29 = vpop.f32.mrf.mxu0 }
 0x1cf   : > { %v2073_v13 = vpop.f32.mrf.mxu1 }
 0x1d0   : > { %10355 = vst [vmem:[#allocation110_spill] sm:$0xff] %v8778_v0  ;;  %v8782_v17 = vadd.f32 %v2073_v13, %v1880_v29  ;;  %v1882_v4 = vpop.f32.mrf.mxu0 }
 0x1d1   : > { %v2075_v50 = vpop.f32.mrf.mxu1 }
 0x1d2   : > { %10356 = vst [vmem:[#allocation111_spill] sm:$0xff] %v8782_v17  ;;  %v8784_v52 = vadd.f32 %v2075_v50, %v1882_v4  ;;  %v1884_v60 = vpop.f32.mrf.mxu0 }
 0x1d3   : > { %v2077_v53 = vpop.f32.mrf.mxu1 }
 0x1d4   : > { %10357 = vst [vmem:[#allocation112_spill] sm:$0xff] %v8784_v52  ;;  %v8786_v55 = vadd.f32 %v2077_v53, %v1884_v60  ;;  %v1888_v10 = vpop.f32.mrf.mxu0  ;;  %3927 = vmatmul.mubr.bf16.vlgmr.msra.gmra.mxu0 %v8223_v26 }
 0x1d5   : > { %v2081_v23 = vpop.f32.mrf.mxu1  ;;  %4120 = vmatmul.mubr.bf16.vlgmr.msra.gmra.mxu1 %v8228_v30  ;;  %3936 = vmatprep.mubr.bf16.mxu0 %v8237_v46 }
 0x1d6   : > { %10358 = vst [vmem:[#allocation113_spill] sm:$0xff] %v8786_v55  ;;  %v8790_v18 = vadd.f32 %v2081_v23, %v1888_v10  ;;  %4129 = vmatprep.mubr.bf16.mxu1 %v8242_v37  ;;  %v1890_v61 = vpop.f32.mrf.mxu0 }
 0x1d7   : > { %v2083_v13 = vpop.f32.mrf.mxu1 }
 0x1d8   : > { %10359 = vst [vmem:[#allocation114_spill] sm:$0xff] %v8790_v18  ;;  %v8794_v29 = vadd.f32 %v2083_v13, %v1890_v61  ;;  %v1892_v50 = vpop.f32.mrf.mxu0 }
 0x1d9   : > { %v2085_v31 = vpop.f32.mrf.mxu1 }
 0x1da   : > { %10360 = vst [vmem:[#allocation115_spill] sm:$0xff] %v8794_v29  ;;  %v8796_v53 = vadd.f32 %v2085_v31, %v1892_v50  ;;  %v1894_v48 = vpop.f32.mrf.mxu0 }
 0x1db   : > { %v2087_v4 = vpop.f32.mrf.mxu1 }
 0x1dc   : > { %10361 = vst [vmem:[#allocation116_spill] sm:$0xff] %v8796_v53  ;;  %v8798_v60 = vadd.f32 %v2087_v4, %v1894_v48  ;;  %v1898_v26 = vpop.f32.mrf.mxu0  ;;  %3937 = vmatmul.mubr.bf16.gmra.mxu0 %v8263_v11 }
 0x1dd   : > { %v2091_v30 = vpop.f32.mrf.mxu1  ;;  %4130 = vmatmul.mubr.bf16.gmra.mxu1 %v8268_v19  ;;  %3946 = vmatprep.mubr.bf16.mxu0 %v8275_v59 }
 0x1de   : > { %10362 = vst [vmem:[#allocation117_spill] sm:$0xff] %v8798_v60  ;;  %v8802_v46 = vadd.f32 %v2091_v30, %v1898_v26  ;;  %4139 = vmatprep.mubr.bf16.mxu1 %v8280_v22  ;;  %v1900_v37 = vpop.f32.mrf.mxu0  ;;  %v10461_v60 = vld [vmem:[#allocation53_spill] sm:$0xff] }
 0x1df   : > { %v2093_v10 = vpop.f32.mrf.mxu1 }
 0x1e0   : > { %10363 = vst [vmem:[#allocation118_spill] sm:$0xff] %v8802_v46  ;;  %v8806_v23 = vadd.f32 %v2093_v10, %v1900_v37  ;;  %v1902_v61 = vpop.f32.mrf.mxu0 }
 0x1e1   : > { %v2095_v13 = vpop.f32.mrf.mxu1 }
 0x1e2   : > { %10364 = vst [vmem:[#allocation119_spill] sm:$0xff] %v8806_v23  ;;  %v8808_v50 = vadd.f32 %v2095_v13, %v1902_v61  ;;  %v1904_v31 = vpop.f32.mrf.mxu0 }
 0x1e3   : > { %v2097_v48 = vpop.f32.mrf.mxu1 }
 0x1e4   : > { %10365 = vst [vmem:[#allocation120_spill] sm:$0xff] %v8808_v50  ;;  %v8810_v4 = vadd.f32 %v2097_v48, %v1904_v31  ;;  %v1908_v11 = vpop.f32.mrf.mxu0  ;;  %3947 = vmatmul.mubr.bf16.gmra.mxu0 %v8303_v12 }
 0x1e5   : > { %v2101_v19 = vpop.f32.mrf.mxu1  ;;  %4140 = vmatmul.mubr.bf16.gmra.mxu1 %v8308_v20  ;;  %3956 = vmatprep.mubr.bf16.mxu0 %v8315_v38 }
 0x1e6   : > { %10366 = vst [vmem:[#allocation121_spill] sm:$0xff] %v8810_v4  ;;  %v8814_v59 = vadd.f32 %v2101_v19, %v1908_v11  ;;  %4149 = vmatprep.mubr.bf16.mxu1 %v8320_v27  ;;  %v1910_v22 = vpop.f32.mrf.mxu0  ;;  %v10453_v4 = vld [vmem:[#allocation45_spill] sm:$0xff] }
 0x1e7   : > { %v2103_v26 = vpop.f32.mrf.mxu1 }
 0x1e8   : > { %10367 = vst [vmem:[#allocation122_spill] sm:$0xff] %v8814_v59  ;;  %v8818_v30 = vadd.f32 %v2103_v26, %v1910_v22  ;;  %v1912_v37 = vpop.f32.mrf.mxu0 }
 0x1e9   : > { %v2105_v10 = vpop.f32.mrf.mxu1 }
 0x1ea   : > { %10368 = vst [vmem:[#allocation123_spill] sm:$0xff] %v8818_v30  ;;  %v8820_v61 = vadd.f32 %v2105_v10, %v1912_v37  ;;  %v1914_v13 = vpop.f32.mrf.mxu0 }
 0x1eb   : > { %v2107_v31 = vpop.f32.mrf.mxu1 }
 0x1ec   : > { %10369 = vst [vmem:[#allocation124_spill] sm:$0xff] %v8820_v61  ;;  %v8822_v48 = vadd.f32 %v2107_v31, %v1914_v13  ;;  %v1918_v12 = vpop.f32.mrf.mxu0  ;;  %3957 = vmatmul.mubr.bf16.gmra.mxu0 %v8343_v41 }
 0x1ed   : > { %v2111_v20 = vpop.f32.mrf.mxu1  ;;  %4150 = vmatmul.mubr.bf16.gmra.mxu1 %v8348_v58  ;;  %3966 = vmatprep.mubr.bf16.mxu0 %v8355_v3 }
 0x1ee   : > { %10370 = vst [vmem:[#allocation125_spill] sm:$0xff] %v8822_v48  ;;  %v8826_v38 = vadd.f32 %v2111_v20, %v1918_v12  ;;  %4159 = vmatprep.mubr.bf16.mxu1 %v8360_v6  ;;  %v1920_v27 = vpop.f32.mrf.mxu0  ;;  %v10445_v48 = vld [vmem:[#allocation37_spill] sm:$0xff] }
 0x1ef   : > { %v2113_v11 = vpop.f32.mrf.mxu1 }
 0x1f0   : > { %10371 = vst [vmem:[#allocation126_spill] sm:$0xff] %v8826_v38  ;;  %v8830_v19 = vadd.f32 %v2113_v11, %v1920_v27  ;;  %v1922_v22 = vpop.f32.mrf.mxu0 }
 0x1f1   : > { %v2115_v26 = vpop.f32.mrf.mxu1 }
 0x1f2   : > { %10372 = vst [vmem:[#allocation127_spill] sm:$0xff] %v8830_v19  ;;  %v8832_v37 = vadd.f32 %v2115_v26, %v1922_v22  ;;  %v1924_v10 = vpop.f32.mrf.mxu0 }
 0x1f3   : > { %v2117_v13 = vpop.f32.mrf.mxu1 }
 0x1f4   : > { %10373 = vst [vmem:[#allocation128_spill] sm:$0xff] %v8832_v37  ;;  %v8834_v31 = vadd.f32 %v2117_v13, %v1924_v10  ;;  %v1928_v41 = vpop.f32.mrf.mxu0  ;;  %3967 = vmatmul.mubr.bf16.gmra.mxu0 %v8383_v1 }
 0x1f5   : > { %v2121_v58 = vpop.f32.mrf.mxu1  ;;  %4160 = vmatmul.mubr.bf16.gmra.mxu1 %v8388_v24  ;;  %3976 = vmatprep.mubr.bf16.mxu0 %v8395_v54 }
 0x1f6   : > { %10374 = vst [vmem:[#allocation129_spill] sm:$0xff] %v8834_v31  ;;  %v8838_v3 = vadd.f32 %v2121_v58, %v1928_v41  ;;  %4169 = vmatprep.mubr.bf16.mxu1 %v8400_v2  ;;  %v1930_v6 = vpop.f32.mrf.mxu0  ;;  %v10437_v31 = vld [vmem:[#allocation29_spill] sm:$0xff] }
 0x1f7   : > { %v2123_v12 = vpop.f32.mrf.mxu1 }
 0x1f8   : > { %10375 = vst [vmem:[#allocation130_spill] sm:$0xff] %v8838_v3  ;;  %v8842_v20 = vadd.f32 %v2123_v12, %v1930_v6  ;;  %v1932_v27 = vpop.f32.mrf.mxu0 }
 0x1f9   : > { %v2125_v11 = vpop.f32.mrf.mxu1 }
 0x1fa   : > { %10376 = vst [vmem:[#allocation131_spill] sm:$0xff] %v8842_v20  ;;  %v8844_v22 = vadd.f32 %v2125_v11, %v1932_v27  ;;  %v1934_v26 = vpop.f32.mrf.mxu0 }
 0x1fb   : > { %v2127_v10 = vpop.f32.mrf.mxu1 }
 0x1fc   : > { %10377 = vst [vmem:[#allocation132_spill] sm:$0xff] %v8844_v22  ;;  %v8846_v13 = vadd.f32 %v2127_v10, %v1934_v26  ;;  %v1938_v1 = vpop.f32.mrf.mxu0  ;;  %3977 = vmatmul.mubr.bf16.gmra.mxu0 %v8423_v34 }
 0x1fd   : > { %v2131_v24 = vpop.f32.mrf.mxu1  ;;  %4170 = vmatmul.mubr.bf16.gmra.mxu1 %v8428_v42  ;;  %3986 = vmatprep.mubr.bf16.mxu0 %v8435_v14 }
 0x1fe   : > { %10378 = vst [vmem:[#allocation133_spill] sm:$0xff] %v8846_v13  ;;  %v8850_v54 = vadd.f32 %v2131_v24, %v1938_v1  ;;  %4179 = vmatprep.mubr.bf16.mxu1 %v8440_v35  ;;  %v1940_v2 = vpop.f32.mrf.mxu0 }
 0x1ff   : > { %v2133_v41 = vpop.f32.mrf.mxu1 }
 0x200   : > { %10379 = vst [vmem:[#allocation134_spill] sm:$0xff] %v8850_v54  ;;  %v8854_v58 = vadd.f32 %v2133_v41, %v1940_v2  ;;  %v1942_v6 = vpop.f32.mrf.mxu0 }
 0x201   : > { %v2135_v12 = vpop.f32.mrf.mxu1 }
 0x202   : > { %10380 = vst [vmem:[#allocation135_spill] sm:$0xff] %v8854_v58  ;;  %v8856_v27 = vadd.f32 %v2135_v12, %v1942_v6  ;;  %v1944_v11 = vpop.f32.mrf.mxu0  ;;  %v4602_v12 = vlaneseq }
 0x203   : > { %v2137_v26 = vpop.f32.mrf.mxu1 }
 0x204   : > { %10381 = vst [vmem:[#allocation136_spill] sm:$0xff] %v8856_v27  ;;  %v8858_v10 = vadd.f32 %v2137_v26, %v1944_v11  ;;  %v1948_v34 = vpop.f32.mrf.mxu0  ;;  %3987 = vmatmul.mubr.bf16.gmra.mxu0 %v8463_v44 }
 0x205   : > { %v2141_v42 = vpop.f32.mrf.mxu1  ;;  %4180 = vmatmul.mubr.bf16.gmra.mxu1 %v8468_v7  ;;  %3996 = vmatprep.mubr.bf16.mxu0 %v8475_v15 }
 0x206   : > { %10382 = vst [vmem:[#allocation137_spill] sm:$0xff] %v8858_v10  ;;  %v8862_v14 = vadd.f32 %v2141_v42, %v1948_v34  ;;  %4189 = vmatprep.mubr.bf16.mxu1 %v8480_v51  ;;  %v1950_v35 = vpop.f32.mrf.mxu0  ;;  %v8878_v51 = vshrl.u32 %v4602_v12, 7 }
 0x207   : > { %v2143_v1 = vpop.f32.mrf.mxu1 }
 0x208   : > { %10383 = vst [vmem:[#allocation138_spill] sm:$0xff] %v8862_v14  ;;  %v8866_v24 = vadd.f32 %v2143_v1, %v1950_v35  ;;  %v1952_v2 = vpop.f32.mrf.mxu0 }
 0x209   : > { %v2145_v41 = vpop.f32.mrf.mxu1 }
 0x20a   : > { %10384 = vst [vmem:[#allocation139_spill] sm:$0xff] %v8866_v24  ;;  %v8868_v6 = vadd.f32 %v2145_v41, %v1952_v2  ;;  %v1954_v11 = vpop.f32.mrf.mxu0 }
 0x20b   : > { %v2147_v26 = vpop.f32.mrf.mxu1 }
 0x20c   : > { %10385 = vst [vmem:[#allocation140_spill] sm:$0xff] %v8868_v6  ;;  %v8870_v44 = vadd.f32 %v2147_v26, %v1954_v11  ;;  %v1958_v7 = vpop.f32.mrf.mxu0  ;;  %3997 = vmatmul.mubr.bf16.gmra.mxu0 %v8503_v21  ;;  %v10234_v21 = vsub.s32 0, %v8878_v51  ;;  %v10396_v6 = vld [vmem:[#allocation11_spill] sm:$0xff] }
 0x20d   : > { %v2151_v34 = vpop.f32.mrf.mxu1  ;;  %4190 = vmatmul.mubr.bf16.gmra.mxu1 %v8508_v8  ;;  %4006 = vmatprep.mubr.bf16.mxu0 %v8515_v63  ;;  %v4600_v63 = vld [vmem:[%s10205_s2] sm:$0x3] }
 0x20e   : > { %10386 = vst [vmem:[#allocation141_spill] sm:$0xff] %v8870_v44  ;;  %v8874_v15 = vadd.f32 %v2151_v34, %v1958_v7  ;;  %4199 = vmatprep.mubr.bf16.mxu1 %v8520_v62  ;;  %v1960_v42 = vpop.f32.mrf.mxu0  ;;  %v10235_v62 = vsub.s32 1, %v8878_v51 }
 0x20f   : > { %v2153_v35 = vpop.f32.mrf.mxu1 }
 0x210   : > { %10387 = vst [vmem:[#allocation142_spill] sm:$0xff] %v8874_v15  ;;  %v8880_v1 = vadd.f32 %v2153_v35, %v1960_v42  ;;  %v1962_v2 = vpop.f32.mrf.mxu0  ;;  %v8895_v35 = vrot.slane %v4600_v63, %v10234_v21 }
 0x211   : > { %v2155_v41 = vpop.f32.mrf.mxu1 }
 0x212   : > { %10388 = vst [vmem:[#allocation143_spill] sm:$0xff] %v8880_v1  ;;  %v8882_v11 = vadd.f32 %v2155_v41, %v1962_v2  ;;  %v1964_v26 = vpop.f32.mrf.mxu0 }
 0x213   : > { %v2157_v8 = vpop.f32.mrf.mxu1 }
 0x214   : > { %10389 = vst [vmem:[#allocation144_spill] sm:$0xff] %v8882_v11  ;;  %v8888_v7 = vadd.f32 %v2157_v8, %v1964_v26  ;;  %v3542_v12 = vpop.f32.mrf.mxu0  ;;  %4007 = vmatmul.mubr.bf16.gmra.mxu0 %v8541_v25 }
 0x215   : > { %v3735_v34 = vpop.f32.mrf.mxu1  ;;  %4200 = vmatmul.mubr.bf16.gmra.mxu1 %v8546_v57  ;;  %4016 = vmatprep.mubr.bf16.mxu0 %v8553_v39 }
 0x216   : > { %10390 = vst [vmem:[#allocation145_spill] sm:$0xff] %v8888_v7  ;;  %v3736_v42 = vadd.f32 %v3735_v34, %v3542_v12  ;;  %4209 = vmatprep.mubr.bf16.mxu1 %v8558_v47  ;;  %v3544_v2 = vpop.f32.mrf.mxu0  ;;  %v8902_v7 = vrot.slane %v4600_v63, %v10235_v62 }
 0x217   : > { %v3737_v41 = vpop.f32.mrf.mxu1 }
 0x218   : > { %v4280_v26 = vadd.f32 %v3736_v42, %v8120_v33  ;;  %v3738_v8 = vadd.f32 %v3737_v41, %v3544_v2  ;;  %v3546_v25 = vpop.f32.mrf.mxu0 }
 0x219   : > { %v3739_v57 = vpop.f32.mrf.mxu1 }
 0x21a   : > { %v4612_v12 = vadd.f32 %v8895_v35, %v4280_v26  ;;  %v4281_v34 = vadd.f32 %v3738_v8, %v8124_v5  ;;  %v3740_v21 = vadd.f32 %v3739_v57, %v3546_v25  ;;  %v3548_v11 = vpop.f32.mrf.mxu0 }
 0x21b   : > { %v3741_v39 = vpop.f32.mrf.mxu1 }
 0x21c   : > { %v4676_v1 = vadd.f32 3.0, %v4612_v12  ;;  %v4613_v47 = vadd.f32 %v8902_v7, %v4281_v34  ;;  %v4284_v15 = vadd.f32 %v3740_v21, %v8126_v36  ;;  %v3742_v33 = vadd.f32 %v3741_v39, %v3548_v11  ;;  %v3552_v42 = vpop.f32.mrf.mxu0  ;;  %4017 = vmatmul.mubr.bf16.gmra.mxu0 %v8573_v45 }
 0x21d   : > { %v3745_v2 = vpop.f32.mrf.mxu1  ;;  %4210 = vmatmul.mubr.bf16.gmra.mxu1 %v8578_v16  ;;  %4026 = vmatprep.mubr.bf16.mxu0 %v8585_v40 }
 0x21e   : > { %v4740_v63 = vmax.f32 %v4676_v1, 0.0  ;;  %v4677_v41 = vadd.f32 3.0, %v4613_v47  ;;  %v4614_v5 = vadd.f32 %v8895_v35, %v4284_v15  ;;  %v4285_v26 = vadd.f32 %v3742_v33, %v8128_v43  ;;  %4219 = vmatprep.mubr.bf16.mxu1 %v8590_v32  ;;  %v3554_v36 = vpop.f32.mrf.mxu0 }
 0x21f   : > { %v3746_v8 = vadd.f32 %v3745_v2, %v3552_v42  ;;  %v3747_v11 = vpop.f32.mrf.mxu1 }
 0x220   : > { %v4804_v21 = vmin.f32 %v4740_v63, 6.0  ;;  %v4741_v25 = vmax.f32 %v4677_v41, 0.0  ;;  %v4678_v57 = vadd.f32 3.0, %v4614_v5  ;;  %v4615_v45 = vadd.f32 %v8902_v7, %v4285_v26  ;;  %v3556_v34 = vpop.f32.mrf.mxu0 }
 0x221   : > { %v4288_v16 = vadd.f32 %v3746_v8, %v8132_v56  ;;  %v3748_v1 = vadd.f32 %v3747_v11, %v3554_v36  ;;  %v3749_v15 = vpop.f32.mrf.mxu1 }
 0x222   : > { %v4868_v39 = vmul.f32 %v4804_v21, %v4612_v12  ;;  %v4805_v43 = vmin.f32 %v4741_v25, 6.0  ;;  %v4742_v33 = vmax.f32 %v4678_v57, 0.0  ;;  %v4679_v40 = vadd.f32 3.0, %v4615_v45  ;;  %v3558_v63 = vpop.f32.mrf.mxu0  ;;  %v10391_v57 = vld [vmem:[#allocation67_spill] sm:$0xff] }
 0x223   : > { %v4616_v32 = vadd.f32 %v8895_v35, %v4288_v16  ;;  %v4289_v42 = vadd.f32 %v3748_v1, %v8136_v9  ;;  %v3750_v2 = vadd.f32 %v3749_v15, %v3556_v34  ;;  %v3751_v41 = vpop.f32.mrf.mxu1  ;;  %v10392_v9 = vld [vmem:[#allocation68_spill] sm:$0xff] }
 0x224   : > { %v4932_v26 = vmul.f32 0.16666667, %v4868_v39  ;;  %v4869_v62 = vmul.f32 %v4805_v43, %v4613_v47  ;;  %v4806_v44 = vmin.f32 %v4742_v33, 6.0  ;;  %v4743_v56 = vmax.f32 %v4679_v40, 0.0  ;;  %v3562_v21 = vpop.f32.mrf.mxu0  ;;  %4027 = vmatmul.mubr.bf16.gmra.mxu0 %v10391_v57  ;;  %v10393_v39 = vld [vmem:[#allocation70_spill] sm:$0xff]  ;;  %v10394_v47 = vld [vmem:[#allocation71_spill] sm:$0xff] }
 0x225   : > { %v4680_v8 = vadd.f32 3.0, %v4616_v32  ;;  %v4617_v36 = vadd.f32 %v8902_v7, %v4289_v42  ;;  %v4292_v12 = vadd.f32 %v3750_v2, %v8138_v49  ;;  %v3752_v11 = vadd.f32 %v3751_v41, %v3558_v63  ;;  %v3755_v25 = vpop.f32.mrf.mxu1  ;;  %4220 = vmatmul.mubr.bf16.gmra.mxu1 %v10392_v9  ;;  %4036 = vmatprep.mubr.bf16.mxu0 %v10393_v39  ;;  %v10395_v40 = vld [vmem:[#allocation10_spill] sm:$0xff] }
 0x226   : > { %v4996_v16 = vmax.f32 %v4932_v26, 0.0  ;;  %v4933_v1 = vmul.f32 0.16666667, %v4869_v62  ;;  %v4870_v34 = vmul.f32 %v4806_v44, %v4614_v5  ;;  %v4807_v15 = vmin.f32 %v4743_v56, 6.0  ;;  %4229 = vmatprep.mubr.bf16.mxu1 %v10394_v47  ;;  %v3564_v2 = vpop.f32.mrf.mxu0 }
 0x227   : > { %v4744_v43 = vmax.f32 %v4680_v8, 0.0  ;;  %v4681_v33 = vadd.f32 3.0, %v4617_v36  ;;  %v4618_v49 = vadd.f32 %v8895_v35, %v4292_v12  ;;  %v4293_v42 = vadd.f32 %v3752_v11, %v10395_v40  ;;  %v3757_v63 = vpop.f32.mrf.mxu1 }
 0x228   : > { %v5060_v41 = vmin.f32 %v4996_v16, 6.0  ;;  %v4997_v57 = vmax.f32 %v4933_v1, 0.0  ;;  %v4934_v9 = vmul.f32 0.16666667, %v4870_v34  ;;  %v4871_v26 = vmul.f32 %v4807_v15, %v4615_v45  ;;  %v3566_v39 = vpop.f32.mrf.mxu0 }
 0x229   : > { %v4808_v62 = vmin.f32 %v4744_v43, 6.0  ;;  %v4745_v44 = vmax.f32 %v4681_v33, 0.0  ;;  %v4682_v5 = vadd.f32 3.0, %v4618_v49  ;;  %v4619_v56 = vadd.f32 %v8902_v7, %v4293_v42  ;;  %v3759_v47 = vpop.f32.mrf.mxu1 }
 0x22a   : > { %5124 = vst [vmem:[%s8931_s12] sm:$0xff] %v5060_v41  ;;  %v5061_v8 = vmin.f32 %v4997_v57, 6.0  ;;  %v4998_v12 = vmax.f32 %v4934_v9, 0.0  ;;  %v4935_v11 = vmul.f32 0.16666667, %v4871_v26  ;;  %v3756_v40 = vadd.f32 %v3755_v25, %v3562_v21  ;;  %v3568_v15 = vpop.f32.mrf.mxu0  ;;  %v10397_v21 = vld [vmem:[#allocation75_spill] sm:$0xff] }
 0x22b   : > { %v4872_v16 = vmul.f32 %v4808_v62, %v4616_v32  ;;  %v4809_v1 = vmin.f32 %v4745_v44, 6.0  ;;  %v4746_v34 = vmax.f32 %v4682_v5, 0.0  ;;  %v4683_v45 = vadd.f32 3.0, %v4619_v56  ;;  %v3761_v43 = vpop.f32.mrf.mxu1  ;;  %v10398_v32 = vld [vmem:[#allocation76_spill] sm:$0xff] }
 0x22c   : > { %5125 = vst [vmem:[%s8931_s12 + $0x8] sm:$0xff] %v5061_v8  ;;  %v5062_v33 = vmin.f32 %v4998_v12, 6.0  ;;  %v4999_v42 = vmax.f32 %v4935_v11, 0.0  ;;  %v4296_v24 = vadd.f32 %v3756_v40, %v10396_v6  ;;  %v3758_v14 = vadd.f32 %v3757_v63, %v3564_v2  ;;  %v3572_v9 = vpop.f32.mrf.mxu0  ;;  %4037 = vmatmul.mubr.bf16.gmra.mxu0 %v10397_v21  ;;  %v10399_v44 = vld [vmem:[#allocation12_spill] sm:$0xff]  ;;  %v10400_v6 = vld [vmem:[#allocation78_spill] sm:$0xff]  ;;  %v10401_v2 = vld [vmem:[#allocation79_spill] sm:$0xff] }
 0x22d   : > { %v4936_v10 = vmul.f32 0.16666667, %v4872_v16  ;;  %v4873_v27 = vmul.f32 %v4809_v1, %v4617_v36  ;;  %v4810_v41 = vmin.f32 %v4746_v34, 6.0  ;;  %v4747_v57 = vmax.f32 %v4683_v45, 0.0  ;;  %v3765_v26 = vpop.f32.mrf.mxu1  ;;  %4230 = vmatmul.mubr.bf16.gmra.mxu1 %v10398_v32  ;;  %4046 = vmatprep.mubr.bf16.mxu0 %v10400_v6  ;;  %v10402_v45 = vld [vmem:[#allocation13_spill] sm:$0xff] }
 0x22e   : > { %5126 = vst [vmem:[%s8931_s12 + $0x20] sm:$0xff] %v5062_v33  ;;  %v5063_v25 = vmin.f32 %v4999_v42, 6.0  ;;  %v4620_v62 = vadd.f32 %v8895_v35, %v4296_v24  ;;  %v4297_v5 = vadd.f32 %v3758_v14, %v10399_v44  ;;  %v3760_v8 = vadd.f32 %v3759_v47, %v3566_v39  ;;  %4239 = vmatprep.mubr.bf16.mxu1 %v10401_v2  ;;  %v3574_v40 = vpop.f32.mrf.mxu0 }
 0x22f   : > { %v5000_v36 = vmax.f32 %v4936_v10, 0.0  ;;  %v4937_v63 = vmul.f32 0.16666667, %v4873_v27  ;;  %v4874_v12 = vmul.f32 %v4810_v41, %v4618_v49  ;;  %v4811_v11 = vmin.f32 %v4747_v57, 6.0  ;;  %v3767_v16 = vpop.f32.mrf.mxu1  ;;  %v10403_v41 = vld [vmem:[#allocation14_spill] sm:$0xff] }
 0x230   : > { %5127 = vst [vmem:[%s8931_s12 + $0x28] sm:$0xff] %v5063_v25  ;;  %v4684_v1 = vadd.f32 3.0, %v4620_v62  ;;  %v4621_v34 = vadd.f32 %v8902_v7, %v4297_v5  ;;  %v4300_v24 = vadd.f32 %v3760_v8, %v10402_v45  ;;  %v3762_v33 = vadd.f32 %v3761_v43, %v3568_v15  ;;  %v3576_v21 = vpop.f32.mrf.mxu0 }
 0x231   : > { %v5064_v14 = vmin.f32 %v5000_v36, 6.0  ;;  %v5001_v39 = vmax.f32 %v4937_v63, 0.0  ;;  %v4938_v47 = vmul.f32 0.16666667, %v4874_v12  ;;  %v4875_v42 = vmul.f32 %v4811_v11, %v4619_v56  ;;  %v3769_v32 = vpop.f32.mrf.mxu1  ;;  %v10404_v11 = vld [vmem:[#allocation15_spill] sm:$0xff] }
 0x232   : > { %v4748_v27 = vmax.f32 %v4684_v1, 0.0  ;;  %v4685_v10 = vadd.f32 3.0, %v4621_v34  ;;  %v4622_v49 = vadd.f32 %v8895_v35, %v4300_v24  ;;  %v4301_v57 = vadd.f32 %v3762_v33, %v10403_v41  ;;  %v3578_v8 = vpop.f32.mrf.mxu0 }
 0x233   : > { %5128 = vst [vmem:[%s8931_s12 + $0x40] sm:$0xff] %v5064_v14  ;;  %v5065_v25 = vmin.f32 %v5001_v39, 6.0  ;;  %v5002_v44 = vmax.f32 %v4938_v47, 0.0  ;;  %v4939_v5 = vmul.f32 0.16666667, %v4875_v42  ;;  %v3766_v6 = vadd.f32 %v3765_v26, %v3572_v9  ;;  %v3771_v15 = vpop.f32.mrf.mxu1  ;;  %v10405_v14 = vld [vmem:[#allocation83_spill] sm:$0xff] }
 0x234   : > { %v4812_v43 = vmin.f32 %v4748_v27, 6.0  ;;  %v4749_v2 = vmax.f32 %v4685_v10, 0.0  ;;  %v4686_v36 = vadd.f32 3.0, %v4622_v49  ;;  %v4623_v56 = vadd.f32 %v8902_v7, %v4301_v57  ;;  %v3582_v24 = vpop.f32.mrf.mxu0  ;;  %4047 = vmatmul.mubr.bf16.gmra.mxu0 %v10405_v14  ;;  %v10406_v39 = vld [vmem:[#allocation84_spill] sm:$0xff]  ;;  %v10407_v27 = vld [vmem:[#allocation86_spill] sm:$0xff]  ;;  %v10408_v10 = vld [vmem:[#allocation87_spill] sm:$0xff] }
 0x235   : > { %5129 = vst [vmem:[%s8931_s12 + $0x48] sm:$0xff] %v5065_v25  ;;  %v5066_v63 = vmin.f32 %v5002_v44, 6.0  ;;  %v5003_v12 = vmax.f32 %v4939_v5, 0.0  ;;  %v4304_v1 = vadd.f32 %v3766_v6, %v10404_v11  ;;  %v3768_v45 = vadd.f32 %v3767_v16, %v3574_v40  ;;  %v3775_v33 = vpop.f32.mrf.mxu1  ;;  %4240 = vmatmul.mubr.bf16.gmra.mxu1 %v10406_v39  ;;  %4056 = vmatprep.mubr.bf16.mxu0 %v10407_v27  ;;  %v10409_v40 = vld [vmem:[#allocation16_spill] sm:$0xff]  ;;  %v10410_v14 = vld [vmem:[#allocation17_spill] sm:$0xff] }
 0x236   : > { %v4876_v9 = vmul.f32 %v4812_v43, %v4620_v62  ;;  %v4813_v26 = vmin.f32 %v4749_v2, 6.0  ;;  %v4750_v47 = vmax.f32 %v4686_v36, 0.0  ;;  %v4687_v42 = vadd.f32 3.0, %v4623_v56  ;;  %4249 = vmatprep.mubr.bf16.mxu1 %v10408_v10  ;;  %v3584_v44 = vpop.f32.mrf.mxu0 }
 0x237   : > { %5130 = vst [vmem:[%s8931_s12 + $0x60] sm:$0xff] %v5066_v63  ;;  %v5067_v41 = vmin.f32 %v5003_v12, 6.0  ;;  %v4624_v57 = vadd.f32 %v8895_v35, %v4304_v1  ;;  %v4305_v16 = vadd.f32 %v3768_v45, %v10409_v40  ;;  %v3770_v25 = vadd.f32 %v3769_v32, %v3576_v21  ;;  %v3777_v5 = vpop.f32.mrf.mxu1 }
 0x238   : > { %v4940_v6 = vmul.f32 0.16666667, %v4876_v9  ;;  %v4877_v11 = vmul.f32 %v4813_v26, %v4621_v34  ;;  %v4814_v62 = vmin.f32 %v4750_v47, 6.0  ;;  %v4751_v43 = vmax.f32 %v4687_v42, 0.0  ;;  %v3586_v63 = vpop.f32.mrf.mxu0  ;;  %v10411_v34 = vld [vmem:[#allocation18_spill] sm:$0xff] }
 0x239   : > { %5131 = vst [vmem:[%s8931_s12 + $0x68] sm:$0xff] %v5067_v41  ;;  %v4688_v2 = vadd.f32 3.0, %v4624_v57  ;;  %v4625_v36 = vadd.f32 %v8902_v7, %v4305_v16  ;;  %v4308_v39 = vadd.f32 %v3770_v25, %v10410_v14  ;;  %v3772_v27 = vadd.f32 %v3771_v15, %v3578_v8  ;;  %v3779_v12 = vpop.f32.mrf.mxu1 }
 0x23a   : > { %v5004_v10 = vmax.f32 %v4940_v6, 0.0  ;;  %v4941_v1 = vmul.f32 0.16666667, %v4877_v11  ;;  %v4878_v58 = vmul.f32 %v4814_v62, %v4622_v49  ;;  %v4815_v45 = vmin.f32 %v4751_v43, 6.0  ;;  %v3588_v47 = vpop.f32.mrf.mxu0  ;;  %v10412_v62 = vld [vmem:[#allocation91_spill] sm:$0xff]  ;;  %v10413_v43 = vld [vmem:[#allocation92_spill] sm:$0xff] }
 0x23b   : > { %v4752_v21 = vmax.f32 %v4688_v2, 0.0  ;;  %v4689_v32 = vadd.f32 3.0, %v4625_v36  ;;  %v4626_v9 = vadd.f32 %v8895_v35, %v4308_v39  ;;  %v4309_v26 = vadd.f32 %v3772_v27, %v10411_v34  ;;  %v3781_v42 = vpop.f32.mrf.mxu1 }
 0x23c   : > { %v5068_v41 = vmin.f32 %v5004_v10, 6.0  ;;  %v5005_v40 = vmax.f32 %v4941_v1, 0.0  ;;  %v4942_v16 = vmul.f32 0.16666667, %v4878_v58  ;;  %v4879_v25 = vmul.f32 %v4815_v45, %v4623_v56  ;;  %v3592_v49 = vpop.f32.mrf.mxu0  ;;  %4057 = vmatmul.mubr.bf16.gmra.mxu0 %v10412_v62  ;;  %v10414_v1 = vld [vmem:[#allocation94_spill] sm:$0xff]  ;;  %v10415_v58 = vld [vmem:[#allocation95_spill] sm:$0xff] }
 0x23d   : > { %v4816_v8 = vmin.f32 %v4752_v21, 6.0  ;;  %v4753_v15 = vmax.f32 %v4689_v32, 0.0  ;;  %v4690_v14 = vadd.f32 3.0, %v4626_v9  ;;  %v4627_v6 = vadd.f32 %v8902_v7, %v4309_v26  ;;  %v3785_v11 = vpop.f32.mrf.mxu1  ;;  %4250 = vmatmul.mubr.bf16.gmra.mxu1 %v10413_v43  ;;  %4066 = vmatprep.mubr.bf16.mxu0 %v10414_v1  ;;  %v10416_v43 = vld [vmem:[#allocation19_spill] sm:$0xff] }
 0x23e   : > { %5132 = vst [vmem:[%s8931_s12 + $0x80] sm:$0xff] %v5068_v41  ;;  %v5069_v2 = vmin.f32 %v5005_v40, 6.0  ;;  %v5006_v39 = vmax.f32 %v4942_v16, 0.0  ;;  %v4943_v27 = vmul.f32 0.16666667, %v4879_v25  ;;  %v3776_v10 = vadd.f32 %v3775_v33, %v3582_v24  ;;  %4259 = vmatprep.mubr.bf16.mxu1 %v10415_v58  ;;  %v3594_v34 = vpop.f32.mrf.mxu0 }
 0x23f   : > { %v4880_v56 = vmul.f32 %v4816_v8, %v4624_v57  ;;  %v4817_v45 = vmin.f32 %v4753_v15, 6.0  ;;  %v4754_v21 = vmax.f32 %v4690_v14, 0.0  ;;  %v4691_v32 = vadd.f32 3.0, %v4627_v6  ;;  %v3787_v26 = vpop.f32.mrf.mxu1  ;;  %v10417_v15 = vld [vmem:[#allocation20_spill] sm:$0xff] }
 0x240   : > { %5133 = vst [vmem:[%s8931_s12 + $0x88] sm:$0xff] %v5069_v2  ;;  %v5070_v62 = vmin.f32 %v5006_v39, 6.0  ;;  %v5007_v54 = vmax.f32 %v4943_v27, 0.0  ;;  %v4312_v41 = vadd.f32 %v3776_v10, %v10416_v43  ;;  %v3778_v40 = vadd.f32 %v3777_v5, %v3584_v44  ;;  %v3596_v1 = vpop.f32.mrf.mxu0 }
 0x241   : > { %v4944_v16 = vmul.f32 0.16666667, %v4880_v56  ;;  %v4881_v25 = vmul.f32 %v4817_v45, %v4625_v36  ;;  %v4818_v24 = vmin.f32 %v4754_v21, 6.0  ;;  %v4755_v33 = vmax.f32 %v4691_v32, 0.0  ;;  %v3789_v58 = vpop.f32.mrf.mxu1  ;;  %v10418_v56 = vld [vmem:[#allocation21_spill] sm:$0xff] }
 0x242   : > { %5134 = vst [vmem:[%s8931_s12 + $0xa0] sm:$0xff] %v5070_v62  ;;  %v5071_v57 = vmin.f32 %v5007_v54, 6.0  ;;  %v4628_v8 = vadd.f32 %v8895_v35, %v4312_v41  ;;  %v4313_v14 = vadd.f32 %v3778_v40, %v10417_v15  ;;  %v3780_v13 = vadd.f32 %v3779_v12, %v3586_v63  ;;  %v3598_v10 = vpop.f32.mrf.mxu0  ;;  %v10419_v12 = vld [vmem:[#allocation99_spill] sm:$0xff] }
 0x243   : > { %v5008_v2 = vmax.f32 %v4944_v16, 0.0  ;;  %v4945_v39 = vmul.f32 0.16666667, %v4881_v25  ;;  %v4882_v27 = vmul.f32 %v4818_v24, %v4626_v9  ;;  %v4819_v22 = vmin.f32 %v4755_v33, 6.0  ;;  %v3791_v44 = vpop.f32.mrf.mxu1 }
 0x244   : > { %5135 = vst [vmem:[%s8931_s12 + $0xa8] sm:$0xff] %v5071_v57  ;;  %v4692_v5 = vadd.f32 3.0, %v4628_v8  ;;  %v4629_v36 = vadd.f32 %v8902_v7, %v4313_v14  ;;  %v4316_v45 = vadd.f32 %v3780_v13, %v10418_v56  ;;  %v3782_v21 = vadd.f32 %v3781_v42, %v3588_v47  ;;  %v8978_v41 = vpop.f32.mrf.mxu0  ;;  %4067 = vmatmul.mubr.bf16.gmra.mxu0 %v8733_v28  ;;  %v10420_v13 = vld [vmem:[#allocation22_spill] sm:$0xff]  ;;  %v10421_v47 = vld [vmem:[#allocation101_spill] sm:$0xff]  ;;  %v10423_v56 = vld [vmem:[#allocation23_spill] sm:$0xff] }
 0x245   : > { %v5072_v54 = vmin.f32 %v5008_v2, 6.0  ;;  %v5009_v32 = vmax.f32 %v4945_v39, 0.0  ;;  %v4946_v62 = vmul.f32 0.16666667, %v4882_v27  ;;  %v4883_v43 = vmul.f32 %v4819_v22, %v4627_v6  ;;  %v8980_v63 = vpop.f32.mrf.mxu1  ;;  %4260 = vmatmul.mubr.bf16.gmra.mxu1 %v10419_v12  ;;  %4076 = vmatprep.mubr.bf16.mxu0 %v10421_v47  ;;  %v10422_v42 = vld [vmem:[#allocation102_spill] sm:$0xff] }
 0x246   : > { %v4756_v9 = vmax.f32 %v4692_v5, 0.0  ;;  %v4693_v40 = vadd.f32 3.0, %v4629_v36  ;;  %v4630_v16 = vadd.f32 %v8895_v35, %v4316_v45  ;;  %v4317_v25 = vadd.f32 %v3782_v21, %v10420_v13  ;;  %4269 = vmatprep.mubr.bf16.mxu1 %v10422_v42  ;;  %v8989_v57 = vpop.f32.mrf.mxu0 }
 0x247   : > { %5136 = vst [vmem:[%s8931_s12 + $0xc0] sm:$0xff] %v5072_v54  ;;  %v5073_v22 = vmin.f32 %v5009_v32, 6.0  ;;  %v5010_v6 = vmax.f32 %v4946_v62, 0.0  ;;  %v4947_v24 = vmul.f32 0.16666667, %v4883_v43  ;;  %v3786_v33 = vadd.f32 %v3785_v11, %v3592_v49  ;;  %v8991_v28 = vpop.f32.mrf.mxu1 }
 0x248   : > { %v4820_v15 = vmin.f32 %v4756_v9, 6.0  ;;  %v4757_v14 = vmax.f32 %v4693_v40, 0.0  ;;  %v4694_v2 = vadd.f32 3.0, %v4630_v16  ;;  %v4631_v39 = vadd.f32 %v8902_v7, %v4317_v25  ;;  %v8996_v54 = vpop.f32.mrf.mxu0  ;;  %v10424_v40 = vld [vmem:[#allocation24_spill] sm:$0xff] }
 0x249   : > { %5137 = vst [vmem:[%s8931_s12 + $0xc8] sm:$0xff] %v5073_v22  ;;  %v5074_v27 = vmin.f32 %v5010_v6, 6.0  ;;  %v5011_v5 = vmax.f32 %v4947_v24, 0.0  ;;  %v4320_v45 = vadd.f32 %v3786_v33, %v10423_v56  ;;  %v3788_v21 = vadd.f32 %v3787_v26, %v3594_v34  ;;  %v8998_v32 = vpop.f32.mrf.mxu1  ;;  %v10425_v33 = vld [vmem:[#allocation25_spill] sm:$0xff] }
 0x24a   : > { %v4884_v49 = vmul.f32 %v4820_v15, %v4628_v8  ;;  %v4821_v11 = vmin.f32 %v4757_v14, 6.0  ;;  %v4758_v62 = vmax.f32 %v4694_v2, 0.0  ;;  %v4695_v43 = vadd.f32 3.0, %v4631_v39  ;;  %v9003_v47 = vpop.f32.mrf.mxu0 }
 0x24b   : > { %5138 = vst [vmem:[%s8931_s12 + $0xe0] sm:$0xff] %v5074_v27  ;;  %v5075_v12 = vmin.f32 %v5011_v5, 6.0  ;;  %v4632_v9 = vadd.f32 %v8895_v35, %v4320_v45  ;;  %v4321_v13 = vadd.f32 %v3788_v21, %v10424_v40  ;;  %v3790_v25 = vadd.f32 %v3789_v58, %v3596_v1  ;;  %v9005_v42 = vpop.f32.mrf.mxu1  ;;  %v10426_v1 = vld [vmem:[#allocation106_spill] sm:$0xff]  ;;  %v10427_v58 = vld [vmem:[#allocation107_spill] sm:$0xff] }
 0x24c   : > { %v4948_v34 = vmul.f32 0.16666667, %v4884_v49  ;;  %v4885_v26 = vmul.f32 %v4821_v11, %v4629_v36  ;;  %v4822_v22 = vmin.f32 %v4758_v62, 6.0  ;;  %v4759_v6 = vmax.f32 %v4695_v43, 0.0  ;;  %v9010_v2 = vpop.f32.mrf.mxu0  ;;  %4077 = vmatmul.mubr.bf16.gmra.mxu0 %v10426_v1  ;;  %v10428_v62 = vld [vmem:[#allocation26_spill] sm:$0xff] }
 0x24d   : > { %5139 = vst [vmem:[%s8931_s12 + $0xe8] sm:$0xff] %v5075_v12  ;;  %v4696_v8 = vadd.f32 3.0, %v4632_v9  ;;  %v4633_v24 = vadd.f32 %v8902_v7, %v4321_v13  ;;  %v4324_v15 = vadd.f32 %v3790_v25, %v10425_v33  ;;  %v3792_v14 = vadd.f32 %v3791_v44, %v3598_v10  ;;  %v9012_v27 = vpop.f32.mrf.mxu1  ;;  %4270 = vmatmul.mubr.bf16.gmra.mxu1 %v10427_v58 }
 0x24e   : > { %v5012_v5 = vmax.f32 %v4948_v34, 0.0  ;;  %v4949_v56 = vmul.f32 0.16666667, %v4885_v26  ;;  %v4886_v36 = vmul.f32 %v4822_v22, %v4630_v16  ;;  %v4823_v45 = vmin.f32 %v4759_v6, 6.0  ;;  %v9018_v10 = vpop.f32.mrf.mxu0 }
 0x24f   : > { %v4760_v21 = vmax.f32 %v4696_v8, 0.0  ;;  %v4697_v49 = vadd.f32 3.0, %v4633_v24  ;;  %v4634_v11 = vadd.f32 %v8895_v35, %v4324_v15  ;;  %v4325_v43 = vadd.f32 %v3792_v14, %v10428_v62  ;;  %v9020_v44 = vpop.f32.mrf.mxu1  ;;  %v10429_v62 = vld [vmem:[#allocation4_spill] sm:$0xff] }
 0x250   : > { %v5076_v12 = vmin.f32 %v5012_v5, 6.0  ;;  %v5013_v40 = vmax.f32 %v4949_v56, 0.0  ;;  %v4950_v13 = vmul.f32 0.16666667, %v4886_v36  ;;  %v4887_v25 = vmul.f32 %v4823_v45, %v4631_v39  ;;  %v9023_v22 = vpop.f32.mrf.mxu0 }
 0x251   : > { %v4824_v33 = vmin.f32 %v4760_v21, 6.0  ;;  %v4761_v34 = vmax.f32 %v4697_v49, 0.0  ;;  %v4698_v16 = vadd.f32 3.0, %v4634_v11  ;;  %v4635_v26 = vadd.f32 %v8902_v7, %v4325_v43  ;;  %v9025_v6 = vpop.f32.mrf.mxu1 }
 0x252   : > { %5140 = vst [vmem:[%s8931_s12 + $0x100] sm:$0xff] %v5076_v12  ;;  %v5077_v8 = vmin.f32 %v5013_v40, 6.0  ;;  %v5014_v15 = vmax.f32 %v4950_v13, 0.0  ;;  %v4951_v14 = vmul.f32 0.16666667, %v4887_v25  ;;  %v3796_v1 = vadd.f32 %v8980_v63, %v8978_v41  ;;  %v9030_v36 = vpop.f32.mrf.mxu0 }
 0x253   : > { %v4888_v58 = vmul.f32 %v4824_v33, %v4632_v9  ;;  %v4825_v5 = vmin.f32 %v4761_v34, 6.0  ;;  %v4762_v39 = vmax.f32 %v4698_v16, 0.0  ;;  %v4699_v56 = vadd.f32 3.0, %v4635_v26  ;;  %v9032_v45 = vpop.f32.mrf.mxu1  ;;  %v10430_v16 = vld [vmem:[#allocation5_spill] sm:$0xff] }
 0x254   : > { %5141 = vst [vmem:[%s8931_s12 + $0x108] sm:$0xff] %v5077_v8  ;;  %v5078_v21 = vmin.f32 %v5014_v15, 6.0  ;;  %v5015_v49 = vmax.f32 %v4951_v14, 0.0  ;;  %v4328_v43 = vadd.f32 %v3796_v1, %v10429_v62  ;;  %v3798_v12 = vadd.f32 %v8991_v28, %v8989_v57  ;;  %v9038_v9 = vpop.f32.mrf.mxu0 }
 0x255   : > { %v4952_v40 = vmul.f32 0.16666667, %v4888_v58  ;;  %v4889_v13 = vmul.f32 %v4825_v5, %v4633_v24  ;;  %v4826_v41 = vmin.f32 %v4762_v39, 6.0  ;;  %v4763_v63 = vmax.f32 %v4699_v56, 0.0  ;;  %v9040_v25 = vpop.f32.mrf.mxu1  ;;  %v10431_v56 = vld [vmem:[#allocation6_spill] sm:$0xff] }
 0x256   : > { %5142 = vst [vmem:[%s8931_s12 + $0x120] sm:$0xff] %v5078_v21  ;;  %v5079_v33 = vmin.f32 %v5015_v49, 6.0  ;;  %v4636_v34 = vadd.f32 %v8895_v35, %v4328_v43  ;;  %v4329_v8 = vadd.f32 %v3798_v12, %v10430_v16  ;;  %v3800_v15 = vadd.f32 %v8998_v32, %v8996_v54  ;;  %v9047_v1 = vpop.f32.mrf.mxu0 }
 0x257   : > { %v5016_v14 = vmax.f32 %v4952_v40, 0.0  ;;  %v4953_v57 = vmul.f32 0.16666667, %v4889_v13  ;;  %v4890_v28 = vmul.f32 %v4826_v41, %v4634_v11  ;;  %v4827_v24 = vmin.f32 %v4763_v63, 6.0  ;;  %v9049_v58 = vpop.f32.mrf.mxu1  ;;  %v10432_v63 = vld [vmem:[#allocation7_spill] sm:$0xff] }
 0x258   : > { %5143 = vst [vmem:[%s8931_s12 + $0x128] sm:$0xff] %v5079_v33  ;;  %v4700_v5 = vadd.f32 3.0, %v4636_v34  ;;  %v4637_v39 = vadd.f32 %v8902_v7, %v4329_v8  ;;  %v4332_v21 = vadd.f32 %v3800_v15, %v10431_v56  ;;  %v3802_v49 = vadd.f32 %v9005_v42, %v9003_v47  ;;  %v9056_v11 = vpop.f32.mrf.mxu0 }
 0x259   : > { %v5080_v62 = vmin.f32 %v5016_v14, 6.0  ;;  %v5017_v54 = vmax.f32 %v4953_v57, 0.0  ;;  %v4954_v32 = vmul.f32 0.16666667, %v4890_v28  ;;  %v4891_v43 = vmul.f32 %v4827_v24, %v4635_v26  ;;  %v9058_v12 = vpop.f32.mrf.mxu1 }
 0x25a   : > { %v4764_v40 = vmax.f32 %v4700_v5, 0.0  ;;  %v4701_v13 = vadd.f32 3.0, %v4637_v39  ;;  %v4638_v41 = vadd.f32 %v8895_v35, %v4332_v21  ;;  %v4333_v33 = vadd.f32 %v3802_v49, %v10432_v63  ;;  %v9065_v42 = vpop.f32.mrf.mxu0  ;;  %v10433_v21 = vld [vmem:[#allocation8_spill] sm:$0xff] }
 0x25b   : > { %5144 = vst [vmem:[%s8931_s12 + $0x140] sm:$0xff] %v5080_v62  ;;  %v5081_v16 = vmin.f32 %v5017_v54, 6.0  ;;  %v5018_v8 = vmax.f32 %v4954_v32, 0.0  ;;  %v4955_v15 = vmul.f32 0.16666667, %v4891_v43  ;;  %v3806_v47 = vadd.f32 %v9012_v27, %v9010_v2  ;;  %v9067_v26 = vpop.f32.mrf.mxu1 }
 0x25c   : > { %v4828_v14 = vmin.f32 %v4764_v40, 6.0  ;;  %v4765_v57 = vmax.f32 %v4701_v13, 0.0  ;;  %v4702_v28 = vadd.f32 3.0, %v4638_v41  ;;  %v4639_v24 = vadd.f32 %v8902_v7, %v4333_v33  ;;  %v9074_v54 = vpop.f32.mrf.mxu0  ;;  %v10434_v33 = vld [vmem:[#allocation9_spill] sm:$0xff] }
 0x25d   : > { %5145 = vst [vmem:[%s8931_s12 + $0x148] sm:$0xff] %v5081_v16  ;;  %v5082_v5 = vmin.f32 %v5018_v8, 6.0  ;;  %v5019_v56 = vmax.f32 %v4955_v15, 0.0  ;;  %v4336_v49 = vadd.f32 %v3806_v47, %v10433_v21  ;;  %v3808_v62 = vadd.f32 %v9020_v44, %v9018_v10  ;;  %v9076_v2 = vpop.f32.mrf.mxu1 }
 0x25e   : > { %v4892_v27 = vmul.f32 %v4828_v14, %v4636_v34  ;;  %v4829_v32 = vmin.f32 %v4765_v57, 6.0  ;;  %v4766_v43 = vmax.f32 %v4702_v28, 0.0  ;;  %v4703_v40 = vadd.f32 3.0, %v4639_v24  ;;  %v9083_v15 = vpop.f32.mrf.mxu0  ;;  %v10435_v28 = vld [vmem:[#allocation27_spill] sm:$0xff] }
 0x25f   : > { %5146 = vst [vmem:[%s8931_s12 + $0x160] sm:$0xff] %v5082_v5  ;;  %v5083_v13 = vmin.f32 %v5019_v56, 6.0  ;;  %v4640_v63 = vadd.f32 %v8895_v35, %v4336_v49  ;;  %v4337_v16 = vadd.f32 %v3808_v62, %v10434_v33  ;;  %v3810_v8 = vadd.f32 %v9025_v6, %v9023_v22  ;;  %v9085_v10 = vpop.f32.mrf.mxu1 }
 0x260   : > { %v4956_v44 = vmul.f32 0.16666667, %v4892_v27  ;;  %v4893_v47 = vmul.f32 %v4829_v32, %v4637_v39  ;;  %v4830_v21 = vmin.f32 %v4766_v43, 6.0  ;;  %v4767_v34 = vmax.f32 %v4703_v40, 0.0  ;;  %v9092_v49 = vpop.f32.mrf.mxu0  ;;  %v10436_v40 = vld [vmem:[#allocation28_spill] sm:$0xff] }
 0x261   : > { %5147 = vst [vmem:[%s8931_s12 + $0x168] sm:$0xff] %v5083_v13  ;;  %v4704_v14 = vadd.f32 3.0, %v4640_v63  ;;  %v4641_v57 = vadd.f32 %v8902_v7, %v4337_v16  ;;  %v4340_v5 = vadd.f32 %v3810_v8, %v10435_v28  ;;  %v3812_v56 = vadd.f32 %v9032_v45, %v9030_v36  ;;  %v9094_v22 = vpop.f32.mrf.mxu1 }
 0x262   : > { %v5020_v6 = vmax.f32 %v4956_v44, 0.0  ;;  %v4957_v62 = vmul.f32 0.16666667, %v4893_v47  ;;  %v4894_v33 = vmul.f32 %v4830_v21, %v4638_v41  ;;  %v4831_v27 = vmin.f32 %v4767_v34, 6.0  ;;  %v9098_v16 = vpop.f32.mrf.mxu0 }
 0x263   : > { %v4768_v39 = vmax.f32 %v4704_v14, 0.0  ;;  %v4705_v32 = vadd.f32 3.0, %v4641_v57  ;;  %v4642_v43 = vadd.f32 %v8895_v35, %v4340_v5  ;;  %v4341_v13 = vadd.f32 %v3812_v56, %v10436_v40  ;;  %v9100_v8 = vpop.f32.mrf.mxu1 }
 0x264   : > { %v5084_v36 = vmin.f32 %v5020_v6, 6.0  ;;  %v5021_v45 = vmax.f32 %v4957_v62, 0.0  ;;  %v4958_v28 = vmul.f32 0.16666667, %v4894_v33  ;;  %v4895_v20 = vmul.f32 %v4831_v27, %v4639_v24  ;;  %v9103_v21 = vpop.f32.mrf.mxu0 }
 0x265   : > { %v4832_v3 = vmin.f32 %v4768_v39, 6.0  ;;  %v4769_v44 = vmax.f32 %v4705_v32, 0.0  ;;  %v4706_v41 = vadd.f32 3.0, %v4642_v43  ;;  %v4643_v47 = vadd.f32 %v8902_v7, %v4341_v13  ;;  %v9105_v34 = vpop.f32.mrf.mxu1 }
 0x266   : > { %5148 = vst [vmem:[%s8931_s12 + $0x180] sm:$0xff] %v5084_v36  ;;  %v5085_v14 = vmin.f32 %v5021_v45, 6.0  ;;  %v5022_v5 = vmax.f32 %v4958_v28, 0.0  ;;  %v4959_v56 = vmul.f32 0.16666667, %v4895_v20  ;;  %v3816_v6 = vadd.f32 %v9040_v25, %v9038_v9  ;;  %v9110_v39 = vpop.f32.mrf.mxu0 }
 0x267   : > { %v4896_v62 = vmul.f32 %v4832_v3, %v4640_v63  ;;  %v4833_v33 = vmin.f32 %v4769_v44, 6.0  ;;  %v4770_v24 = vmax.f32 %v4706_v41, 0.0  ;;  %v4707_v27 = vadd.f32 3.0, %v4643_v47  ;;  %v9112_v32 = vpop.f32.mrf.mxu1 }
 0x268   : > { %5149 = vst [vmem:[%s8931_s12 + $0x188] sm:$0xff] %v5085_v14  ;;  %v5086_v40 = vmin.f32 %v5022_v5, 6.0  ;;  %v5023_v13 = vmax.f32 %v4959_v56, 0.0  ;;  %v4344_v36 = vadd.f32 %v3816_v6, %v10437_v31  ;;  %v3818_v20 = vadd.f32 %v9049_v58, %v9047_v1  ;;  %v9118_v25 = vpop.f32.mrf.mxu0  ;;  %v10438_v14 = vld [vmem:[#allocation30_spill] sm:$0xff] }
 0x269   : > { %v4960_v45 = vmul.f32 0.16666667, %v4896_v62  ;;  %v4897_v28 = vmul.f32 %v4833_v33, %v4641_v57  ;;  %v4834_v3 = vmin.f32 %v4770_v24, 6.0  ;;  %v4771_v9 = vmax.f32 %v4707_v27, 0.0  ;;  %v9120_v63 = vpop.f32.mrf.mxu1  ;;  %v10439_v27 = vld [vmem:[#allocation31_spill] sm:$0xff] }
 0x26a   : > { %5150 = vst [vmem:[%s8931_s12 + $0x1a0] sm:$0xff] %v5086_v40  ;;  %v5087_v44 = vmin.f32 %v5023_v13, 6.0  ;;  %v4644_v41 = vadd.f32 %v8895_v35, %v4344_v36  ;;  %v4345_v5 = vadd.f32 %v3818_v20, %v10438_v14  ;;  %v3820_v31 = vadd.f32 %v9058_v12, %v9056_v11  ;;  %v9127_v6 = vpop.f32.mrf.mxu0 }
 0x26b   : > { %v5024_v56 = vmax.f32 %v4960_v45, 0.0  ;;  %v4961_v1 = vmul.f32 0.16666667, %v4897_v28  ;;  %v4898_v58 = vmul.f32 %v4834_v3, %v4642_v43  ;;  %v4835_v57 = vmin.f32 %v4771_v9, 6.0  ;;  %v9129_v62 = vpop.f32.mrf.mxu1 }
 0x26c   : > { %5151 = vst [vmem:[%s8931_s12 + $0x1a8] sm:$0xff] %v5087_v44  ;;  %v4708_v33 = vadd.f32 3.0, %v4644_v41  ;;  %v4645_v24 = vadd.f32 %v8902_v7, %v4345_v5  ;;  %v4348_v40 = vadd.f32 %v3820_v31, %v10439_v27  ;;  %v3822_v13 = vadd.f32 %v9067_v26, %v9065_v42  ;;  %v9136_v43 = vpop.f32.mrf.mxu0  ;;  %v10440_v44 = vld [vmem:[#allocation32_spill] sm:$0xff] }
 0x26d   : > { %v5088_v36 = vmin.f32 %v5024_v56, 6.0  ;;  %v5025_v11 = vmax.f32 %v4961_v1, 0.0  ;;  %v4962_v12 = vmul.f32 0.16666667, %v4898_v58  ;;  %v4899_v20 = vmul.f32 %v4835_v57, %v4643_v47  ;;  %v9138_v45 = vpop.f32.mrf.mxu1 }
 0x26e   : > { %v4772_v28 = vmax.f32 %v4708_v33, 0.0  ;;  %v4709_v3 = vadd.f32 3.0, %v4645_v24  ;;  %v4646_v9 = vadd.f32 %v8895_v35, %v4348_v40  ;;  %v4349_v14 = vadd.f32 %v3822_v13, %v10440_v44  ;;  %v9145_v26 = vpop.f32.mrf.mxu0  ;;  %v10441_v13 = vld [vmem:[#allocation33_spill] sm:$0xff] }
 0x26f   : > { %5152 = vst [vmem:[%s8931_s12 + $0x1c0] sm:$0xff] %v5088_v36  ;;  %v5089_v5 = vmin.f32 %v5025_v11, 6.0  ;;  %v5026_v31 = vmax.f32 %v4962_v12, 0.0  ;;  %v4963_v27 = vmul.f32 0.16666667, %v4899_v20  ;;  %v3826_v42 = vadd.f32 %v9076_v2, %v9074_v54  ;;  %v9147_v47 = vpop.f32.mrf.mxu1 }
 0x270   : > { %v4836_v56 = vmin.f32 %v4772_v28, 6.0  ;;  %v4773_v1 = vmax.f32 %v4709_v3, 0.0  ;;  %v4710_v58 = vadd.f32 3.0, %v4646_v9  ;;  %v4647_v57 = vadd.f32 %v8902_v7, %v4349_v14  ;;  %v9154_v12 = vpop.f32.mrf.mxu0 }
 0x271   : > { %5153 = vst [vmem:[%s8931_s12 + $0x1c8] sm:$0xff] %v5089_v5  ;;  %v5090_v33 = vmin.f32 %v5026_v31, 6.0  ;;  %v5027_v40 = vmax.f32 %v4963_v27, 0.0  ;;  %v4352_v36 = vadd.f32 %v3826_v42, %v10441_v13  ;;  %v3828_v11 = vadd.f32 %v9085_v10, %v9083_v15  ;;  %v9156_v54 = vpop.f32.mrf.mxu1  ;;  %v10442_v5 = vld [vmem:[#allocation34_spill] sm:$0xff] }
 0x272   : > { %v4900_v2 = vmul.f32 %v4836_v56, %v4644_v41  ;;  %v4837_v20 = vmin.f32 %v4773_v1, 6.0  ;;  %v4774_v28 = vmax.f32 %v4710_v58, 0.0  ;;  %v4711_v3 = vadd.f32 3.0, %v4647_v57  ;;  %v9163_v42 = vpop.f32.mrf.mxu0  ;;  %v10443_v58 = vld [vmem:[#allocation35_spill] sm:$0xff] }
 0x273   : > { %5154 = vst [vmem:[%s8931_s12 + $0x1e0] sm:$0xff] %v5090_v33  ;;  %v5091_v44 = vmin.f32 %v5027_v40, 6.0  ;;  %v4648_v14 = vadd.f32 %v8895_v35, %v4352_v36  ;;  %v4353_v31 = vadd.f32 %v3828_v11, %v10442_v5  ;;  %v3830_v27 = vadd.f32 %v9094_v22, %v9092_v49  ;;  %v9165_v15 = vpop.f32.mrf.mxu1 }
 0x274   : > { %v4964_v10 = vmul.f32 0.16666667, %v4900_v2  ;;  %v4901_v13 = vmul.f32 %v4837_v20, %v4645_v24  ;;  %v4838_v37 = vmin.f32 %v4774_v28, 6.0  ;;  %v4775_v41 = vmax.f32 %v4711_v3, 0.0  ;;  %v9172_v36 = vpop.f32.mrf.mxu0  ;;  %v10444_v3 = vld [vmem:[#allocation36_spill] sm:$0xff] }
 0x275   : > { %5155 = vst [vmem:[%s8931_s12 + $0x1e8] sm:$0xff] %v5091_v44  ;;  %v4712_v56 = vadd.f32 3.0, %v4648_v14  ;;  %v4649_v1 = vadd.f32 %v8902_v7, %v4353_v31  ;;  %v4356_v33 = vadd.f32 %v3830_v27, %v10443_v58  ;;  %v3832_v40 = vadd.f32 %v9100_v8, %v9098_v16  ;;  %v9174_v49 = vpop.f32.mrf.mxu1 }
 0x276   : > { %v5028_v22 = vmax.f32 %v4964_v10, 0.0  ;;  %v4965_v11 = vmul.f32 0.16666667, %v4901_v13  ;;  %v4902_v5 = vmul.f32 %v4838_v37, %v4646_v9  ;;  %v4839_v2 = vmin.f32 %v4775_v41, 6.0  ;;  %v9178_v31 = vpop.f32.mrf.mxu0 }
 0x277   : > { %v4776_v24 = vmax.f32 %v4712_v56, 0.0  ;;  %v4713_v20 = vadd.f32 3.0, %v4649_v1  ;;  %v4650_v28 = vadd.f32 %v8895_v35, %v4356_v33  ;;  %v4357_v44 = vadd.f32 %v3832_v40, %v10444_v3  ;;  %v9180_v27 = vpop.f32.mrf.mxu1 }
 0x278   : > { %v5092_v16 = vmin.f32 %v5028_v22, 6.0  ;;  %v5029_v8 = vmax.f32 %v4965_v11, 0.0  ;;  %v4966_v58 = vmul.f32 0.16666667, %v4902_v5  ;;  %v4903_v19 = vmul.f32 %v4839_v2, %v4647_v57  ;;  %v9183_v13 = vpop.f32.mrf.mxu0 }
 0x279   : > { %v4840_v38 = vmin.f32 %v4776_v24, 6.0  ;;  %v4777_v10 = vmax.f32 %v4713_v20, 0.0  ;;  %v4714_v37 = vadd.f32 3.0, %v4650_v28  ;;  %v4651_v9 = vadd.f32 %v8902_v7, %v4357_v44  ;;  %v9185_v41 = vpop.f32.mrf.mxu1 }
 0x27a   : > { %5156 = vst [vmem:[%s8931_s12 + $0x200] sm:$0xff] %v5092_v16  ;;  %v5093_v56 = vmin.f32 %v5029_v8, 6.0  ;;  %v5030_v33 = vmax.f32 %v4966_v58, 0.0  ;;  %v4967_v40 = vmul.f32 0.16666667, %v4903_v19  ;;  %v3836_v22 = vadd.f32 %v9105_v34, %v9103_v21  ;;  %v9190_v24 = vpop.f32.mrf.mxu0 }
 0x27b   : > { %v4904_v11 = vmul.f32 %v4840_v38, %v4648_v14  ;;  %v4841_v5 = vmin.f32 %v4777_v10, 6.0  ;;  %v4778_v57 = vmax.f32 %v4714_v37, 0.0  ;;  %v4715_v2 = vadd.f32 3.0, %v4651_v9  ;;  %v9192_v20 = vpop.f32.mrf.mxu1 }
 0x27c   : > { %5157 = vst [vmem:[%s8931_s12 + $0x208] sm:$0xff] %v5093_v56  ;;  %v5094_v3 = vmin.f32 %v5030_v33, 6.0  ;;  %v5031_v44 = vmax.f32 %v4967_v40, 0.0  ;;  %v4360_v16 = vadd.f32 %v3836_v22, %v10445_v48  ;;  %v3838_v19 = vadd.f32 %v9112_v32, %v9110_v39  ;;  %v9198_v34 = vpop.f32.mrf.mxu0  ;;  %v10446_v56 = vld [vmem:[#allocation38_spill] sm:$0xff] }
 0x27d   : > { %v4968_v8 = vmul.f32 0.16666667, %v4904_v11  ;;  %v4905_v58 = vmul.f32 %v4841_v5, %v4649_v1  ;;  %v4842_v38 = vmin.f32 %v4778_v57, 6.0  ;;  %v4779_v21 = vmax.f32 %v4715_v2, 0.0  ;;  %v9200_v14 = vpop.f32.mrf.mxu1  ;;  %v10447_v2 = vld [vmem:[#allocation39_spill] sm:$0xff] }
 0x27e   : > { %5158 = vst [vmem:[%s8931_s12 + $0x220] sm:$0xff] %v5094_v3  ;;  %v5095_v10 = vmin.f32 %v5031_v44, 6.0  ;;  %v4652_v37 = vadd.f32 %v8895_v35, %v4360_v16  ;;  %v4361_v33 = vadd.f32 %v3838_v19, %v10446_v56  ;;  %v3840_v48 = vadd.f32 %v9120_v63, %v9118_v25  ;;  %v9207_v22 = vpop.f32.mrf.mxu0 }
 0x27f   : > { %v5032_v40 = vmax.f32 %v4968_v8, 0.0  ;;  %v4969_v39 = vmul.f32 0.16666667, %v4905_v58  ;;  %v4906_v32 = vmul.f32 %v4842_v38, %v4650_v28  ;;  %v4843_v1 = vmin.f32 %v4779_v21, 6.0  ;;  %v9209_v11 = vpop.f32.mrf.mxu1 }
 0x280   : > { %5159 = vst [vmem:[%s8931_s12 + $0x228] sm:$0xff] %v5095_v10  ;;  %v4716_v5 = vadd.f32 3.0, %v4652_v37  ;;  %v4653_v57 = vadd.f32 %v8902_v7, %v4361_v33  ;;  %v4364_v3 = vadd.f32 %v3840_v48, %v10447_v2  ;;  %v3842_v44 = vadd.f32 %v9129_v62, %v9127_v6  ;;  %v9216_v28 = vpop.f32.mrf.mxu0  ;;  %v10448_v10 = vld [vmem:[#allocation40_spill] sm:$0xff] }
 0x281   : > { %v5096_v16 = vmin.f32 %v5032_v40, 6.0  ;;  %v5033_v25 = vmax.f32 %v4969_v39, 0.0  ;;  %v4970_v63 = vmul.f32 0.16666667, %v4906_v32  ;;  %v4907_v19 = vmul.f32 %v4843_v1, %v4651_v9  ;;  %v9218_v8 = vpop.f32.mrf.mxu1 }
 0x282   : > { %v4780_v58 = vmax.f32 %v4716_v5, 0.0  ;;  %v4717_v38 = vadd.f32 3.0, %v4653_v57  ;;  %v4654_v21 = vadd.f32 %v8895_v35, %v4364_v3  ;;  %v4365_v56 = vadd.f32 %v3842_v44, %v10448_v10  ;;  %v9225_v62 = vpop.f32.mrf.mxu0  ;;  %v10449_v44 = vld [vmem:[#allocation41_spill] sm:$0xff] }
 0x283   : > { %5160 = vst [vmem:[%s8931_s12 + $0x240] sm:$0xff] %v5096_v16  ;;  %v5097_v33 = vmin.f32 %v5033_v25, 6.0  ;;  %v5034_v48 = vmax.f32 %v4970_v63, 0.0  ;;  %v4971_v2 = vmul.f32 0.16666667, %v4907_v19  ;;  %v3846_v6 = vadd.f32 %v9138_v45, %v9136_v43  ;;  %v9227_v9 = vpop.f32.mrf.mxu1 }
 0x284   : > { %v4844_v40 = vmin.f32 %v4780_v58, 6.0  ;;  %v4781_v39 = vmax.f32 %v4717_v38, 0.0  ;;  %v4718_v32 = vadd.f32 3.0, %v4654_v21  ;;  %v4655_v1 = vadd.f32 %v8902_v7, %v4365_v56  ;;  %v9234_v63 = vpop.f32.mrf.mxu0 }
 0x285   : > { %5161 = vst [vmem:[%s8931_s12 + $0x248] sm:$0xff] %v5097_v33  ;;  %v5098_v5 = vmin.f32 %v5034_v48, 6.0  ;;  %v5035_v3 = vmax.f32 %v4971_v2, 0.0  ;;  %v4368_v16 = vadd.f32 %v3846_v6, %v10449_v44  ;;  %v3848_v25 = vadd.f32 %v9147_v47, %v9145_v26  ;;  %v9236_v43 = vpop.f32.mrf.mxu1  ;;  %v10450_v33 = vld [vmem:[#allocation42_spill] sm:$0xff] }
 0x286   : > { %v4908_v45 = vmul.f32 %v4844_v40, %v4652_v37  ;;  %v4845_v19 = vmin.f32 %v4781_v39, 6.0  ;;  %v4782_v58 = vmax.f32 %v4718_v32, 0.0  ;;  %v4719_v38 = vadd.f32 3.0, %v4655_v1  ;;  %v9243_v6 = vpop.f32.mrf.mxu0  ;;  %v10451_v32 = vld [vmem:[#allocation43_spill] sm:$0xff] }
 0x287   : > { %5162 = vst [vmem:[%s8931_s12 + $0x260] sm:$0xff] %v5098_v5  ;;  %v5099_v10 = vmin.f32 %v5035_v3, 6.0  ;;  %v4656_v56 = vadd.f32 %v8895_v35, %v4368_v16  ;;  %v4369_v48 = vadd.f32 %v3848_v25, %v10450_v33  ;;  %v3850_v2 = vadd.f32 %v9156_v54, %v9154_v12  ;;  %v9245_v26 = vpop.f32.mrf.mxu1 }
 0x288   : > { %v4972_v47 = vmul.f32 0.16666667, %v4908_v45  ;;  %v4909_v44 = vmul.f32 %v4845_v19, %v4653_v57  ;;  %v4846_v61 = vmin.f32 %v4782_v58, 6.0  ;;  %v4783_v37 = vmax.f32 %v4719_v38, 0.0  ;;  %v9252_v16 = vpop.f32.mrf.mxu0  ;;  %v10452_v38 = vld [vmem:[#allocation44_spill] sm:$0xff] }
 0x289   : > { %5163 = vst [vmem:[%s8931_s12 + $0x268] sm:$0xff] %v5099_v10  ;;  %v4720_v40 = vadd.f32 3.0, %v4656_v56  ;;  %v4657_v39 = vadd.f32 %v8902_v7, %v4369_v48  ;;  %v4372_v5 = vadd.f32 %v3850_v2, %v10451_v32  ;;  %v3852_v3 = vadd.f32 %v9165_v15, %v9163_v42  ;;  %v9254_v12 = vpop.f32.mrf.mxu1 }
 0x28a   : > { %v5036_v54 = vmax.f32 %v4972_v47, 0.0  ;;  %v4973_v25 = vmul.f32 0.16666667, %v4909_v44  ;;  %v4910_v33 = vmul.f32 %v4846_v61, %v4654_v21  ;;  %v4847_v45 = vmin.f32 %v4783_v37, 6.0  ;;  %v9258_v48 = vpop.f32.mrf.mxu0 }
 0x28b   : > { %v4784_v57 = vmax.f32 %v4720_v40, 0.0  ;;  %v4721_v19 = vadd.f32 3.0, %v4657_v39  ;;  %v4658_v58 = vadd.f32 %v8895_v35, %v4372_v5  ;;  %v4373_v10 = vadd.f32 %v3852_v3, %v10452_v38  ;;  %v9260_v2 = vpop.f32.mrf.mxu1 }
 0x28c   : > { %v5100_v42 = vmin.f32 %v5036_v54, 6.0  ;;  %v5037_v15 = vmax.f32 %v4973_v25, 0.0  ;;  %v4974_v32 = vmul.f32 0.16666667, %v4910_v33  ;;  %v4911_v30 = vmul.f32 %v4847_v45, %v4655_v1  ;;  %v9263_v44 = vpop.f32.mrf.mxu0 }
 0x28d   : > { %v4848_v59 = vmin.f32 %v4784_v57, 6.0  ;;  %v4785_v47 = vmax.f32 %v4721_v19, 0.0  ;;  %v4722_v61 = vadd.f32 3.0, %v4658_v58  ;;  %v4659_v21 = vadd.f32 %v8902_v7, %v4373_v10  ;;  %v9265_v37 = vpop.f32.mrf.mxu1 }
 0x28e   : > { %5164 = vst [vmem:[%s8931_s12 + $0x280] sm:$0xff] %v5100_v42  ;;  %v5101_v40 = vmin.f32 %v5037_v15, 6.0  ;;  %v5038_v5 = vmax.f32 %v4974_v32, 0.0  ;;  %v4975_v3 = vmul.f32 0.16666667, %v4911_v30  ;;  %v3856_v54 = vadd.f32 %v9174_v49, %v9172_v36  ;;  %v9270_v57 = vpop.f32.mrf.mxu0 }
 0x28f   : > { %v4912_v25 = vmul.f32 %v4848_v59, %v4656_v56  ;;  %v4849_v33 = vmin.f32 %v4785_v47, 6.0  ;;  %v4786_v1 = vmax.f32 %v4722_v61, 0.0  ;;  %v4723_v45 = vadd.f32 3.0, %v4659_v21  ;;  %v9272_v19 = vpop.f32.mrf.mxu1 }
 0x290   : > { %5165 = vst [vmem:[%s8931_s12 + $0x288] sm:$0xff] %v5101_v40  ;;  %v5102_v38 = vmin.f32 %v5038_v5, 6.0  ;;  %v5039_v10 = vmax.f32 %v4975_v3, 0.0  ;;  %v4376_v42 = vadd.f32 %v3856_v54, %v10453_v4  ;;  %v3858_v30 = vadd.f32 %v9180_v27, %v9178_v31  ;;  %v9278_v49 = vpop.f32.mrf.mxu0  ;;  %v10454_v40 = vld [vmem:[#allocation46_spill] sm:$0xff] }
 0x291   : > { %v4976_v15 = vmul.f32 0.16666667, %v4912_v25  ;;  %v4913_v32 = vmul.f32 %v4849_v33, %v4657_v39  ;;  %v4850_v59 = vmin.f32 %v4786_v1, 6.0  ;;  %v4787_v36 = vmax.f32 %v4723_v45, 0.0  ;;  %v9280_v56 = vpop.f32.mrf.mxu1  ;;  %v10455_v45 = vld [vmem:[#allocation47_spill] sm:$0xff] }
 0x292   : > { %5166 = vst [vmem:[%s8931_s12 + $0x2a0] sm:$0xff] %v5102_v38  ;;  %v5103_v47 = vmin.f32 %v5039_v10, 6.0  ;;  %v4660_v61 = vadd.f32 %v8895_v35, %v4376_v42  ;;  %v4377_v5 = vadd.f32 %v3858_v30, %v10454_v40  ;;  %v3860_v4 = vadd.f32 %v9185_v41, %v9183_v13  ;;  %v9287_v54 = vpop.f32.mrf.mxu0 }
 0x293   : > { %v5040_v3 = vmax.f32 %v4976_v15, 0.0  ;;  %v4977_v31 = vmul.f32 0.16666667, %v4913_v32  ;;  %v4914_v27 = vmul.f32 %v4850_v59, %v4658_v58  ;;  %v4851_v39 = vmin.f32 %v4787_v36, 6.0  ;;  %v9289_v25 = vpop.f32.mrf.mxu1 }
 0x294   : > { %5167 = vst [vmem:[%s8931_s12 + $0x2a8] sm:$0xff] %v5103_v47  ;;  %v4724_v33 = vadd.f32 3.0, %v4660_v61  ;;  %v4661_v1 = vadd.f32 %v8902_v7, %v4377_v5  ;;  %v4380_v38 = vadd.f32 %v3860_v4, %v10455_v45  ;;  %v3862_v10 = vadd.f32 %v9192_v20, %v9190_v24  ;;  %v9296_v58 = vpop.f32.mrf.mxu0  ;;  %v10456_v47 = vld [vmem:[#allocation48_spill] sm:$0xff] }
 0x295   : > { %v5104_v42 = vmin.f32 %v5040_v3, 6.0  ;;  %v5041_v13 = vmax.f32 %v4977_v31, 0.0  ;;  %v4978_v41 = vmul.f32 0.16666667, %v4914_v27  ;;  %v4915_v30 = vmul.f32 %v4851_v39, %v4659_v21  ;;  %v9298_v15 = vpop.f32.mrf.mxu1 }
 0x296   : > { %v4788_v32 = vmax.f32 %v4724_v33, 0.0  ;;  %v4725_v59 = vadd.f32 3.0, %v4661_v1  ;;  %v4662_v36 = vadd.f32 %v8895_v35, %v4380_v38  ;;  %v4381_v40 = vadd.f32 %v3862_v10, %v10456_v47  ;;  %v9305_v20 = vpop.f32.mrf.mxu0  ;;  %v10457_v10 = vld [vmem:[#allocation49_spill] sm:$0xff] }
 0x297   : > { %5168 = vst [vmem:[%s8931_s12 + $0x2c0] sm:$0xff] %v5104_v42  ;;  %v5105_v5 = vmin.f32 %v5041_v13, 6.0  ;;  %v5042_v4 = vmax.f32 %v4978_v41, 0.0  ;;  %v4979_v45 = vmul.f32 0.16666667, %v4915_v30  ;;  %v3866_v24 = vadd.f32 %v9200_v14, %v9198_v34  ;;  %v9307_v21 = vpop.f32.mrf.mxu1 }
 0x298   : > { %v4852_v3 = vmin.f32 %v4788_v32, 6.0  ;;  %v4789_v31 = vmax.f32 %v4725_v59, 0.0  ;;  %v4726_v27 = vadd.f32 3.0, %v4662_v36  ;;  %v4663_v39 = vadd.f32 %v8902_v7, %v4381_v40  ;;  %v9314_v41 = vpop.f32.mrf.mxu0 }
 0x299   : > { %5169 = vst [vmem:[%s8931_s12 + $0x2c8] sm:$0xff] %v5105_v5  ;;  %v5106_v33 = vmin.f32 %v5042_v4, 6.0  ;;  %v5043_v38 = vmax.f32 %v4979_v45, 0.0  ;;  %v4384_v42 = vadd.f32 %v3866_v24, %v10457_v10  ;;  %v3868_v13 = vadd.f32 %v9209_v11, %v9207_v22  ;;  %v9316_v34 = vpop.f32.mrf.mxu1  ;;  %v10458_v5 = vld [vmem:[#allocation50_spill] sm:$0xff] }
 0x29a   : > { %v4916_v14 = vmul.f32 %v4852_v3, %v4660_v61  ;;  %v4853_v30 = vmin.f32 %v4789_v31, 6.0  ;;  %v4790_v32 = vmax.f32 %v4726_v27, 0.0  ;;  %v4727_v59 = vadd.f32 3.0, %v4663_v39  ;;  %v9323_v24 = vpop.f32.mrf.mxu0  ;;  %v10459_v27 = vld [vmem:[#allocation51_spill] sm:$0xff] }
 0x29b   : > { %5170 = vst [vmem:[%s8931_s12 + $0x2e0] sm:$0xff] %v5106_v33  ;;  %v5107_v47 = vmin.f32 %v5043_v38, 6.0  ;;  %v4664_v40 = vadd.f32 %v8895_v35, %v4384_v42  ;;  %v4385_v4 = vadd.f32 %v3868_v13, %v10458_v5  ;;  %v3870_v45 = vadd.f32 %v9218_v8, %v9216_v28  ;;  %v9325_v22 = vpop.f32.mrf.mxu1 }
 0x29c   : > { %v4980_v11 = vmul.f32 0.16666667, %v4916_v14  ;;  %v4917_v10 = vmul.f32 %v4853_v30, %v4661_v1  ;;  %v4854_v50 = vmin.f32 %v4790_v32, 6.0  ;;  %v4791_v61 = vmax.f32 %v4727_v59, 0.0  ;;  %v9332_v42 = vpop.f32.mrf.mxu0  ;;  %v10460_v59 = vld [vmem:[#allocation52_spill] sm:$0xff] }
 0x29d   : > { %5171 = vst [vmem:[%s8931_s12 + $0x2e8] sm:$0xff] %v5107_v47  ;;  %v4728_v3 = vadd.f32 3.0, %v4664_v40  ;;  %v4665_v31 = vadd.f32 %v8902_v7, %v4385_v4  ;;  %v4388_v33 = vadd.f32 %v3870_v45, %v10459_v27  ;;  %v3872_v38 = vadd.f32 %v9227_v9, %v9225_v62  ;;  %v9334_v28 = vpop.f32.mrf.mxu1 }
 0x29e   : > { %v5044_v8 = vmax.f32 %v4980_v11, 0.0  ;;  %v4981_v13 = vmul.f32 0.16666667, %v4917_v10  ;;  %v4918_v5 = vmul.f32 %v4854_v50, %v4662_v36  ;;  %v4855_v14 = vmin.f32 %v4791_v61, 6.0  ;;  %v9338_v4 = vpop.f32.mrf.mxu0 }
 0x29f   : > { %v4792_v1 = vmax.f32 %v4728_v3, 0.0  ;;  %v4729_v30 = vadd.f32 3.0, %v4665_v31  ;;  %v4666_v32 = vadd.f32 %v8895_v35, %v4388_v33  ;;  %v4389_v47 = vadd.f32 %v3872_v38, %v10460_v59  ;;  %v9340_v45 = vpop.f32.mrf.mxu1 }
 0x2a0   : > { %v5108_v62 = vmin.f32 %v5044_v8, 6.0  ;;  %v5045_v9 = vmax.f32 %v4981_v13, 0.0  ;;  %v4982_v27 = vmul.f32 0.16666667, %v4918_v5  ;;  %v4919_v23 = vmul.f32 %v4855_v14, %v4663_v39  ;;  %v9343_v10 = vpop.f32.mrf.mxu0 }
 0x2a1   : > { %v4856_v46 = vmin.f32 %v4792_v1, 6.0  ;;  %v4793_v11 = vmax.f32 %v4729_v30, 0.0  ;;  %v4730_v50 = vadd.f32 3.0, %v4666_v32  ;;  %v4667_v36 = vadd.f32 %v8902_v7, %v4389_v47  ;;  %v9345_v61 = vpop.f32.mrf.mxu1 }
 0x2a2   : > { %5172 = vst [vmem:[%s8931_s12 + $0x300] sm:$0xff] %v5108_v62  ;;  %v5109_v3 = vmin.f32 %v5045_v9, 6.0  ;;  %v5046_v33 = vmax.f32 %v4982_v27, 0.0  ;;  %v4983_v38 = vmul.f32 0.16666667, %v4919_v23  ;;  %v3876_v8 = vadd.f32 %v9236_v43, %v9234_v63  ;;  %v9350_v1 = vpop.f32.mrf.mxu0 }
 0x2a3   : > { %v4920_v13 = vmul.f32 %v4856_v46, %v4664_v40  ;;  %v4857_v5 = vmin.f32 %v4793_v11, 6.0  ;;  %v4794_v39 = vmax.f32 %v4730_v50, 0.0  ;;  %v4731_v14 = vadd.f32 3.0, %v4667_v36  ;;  %v9352_v30 = vpop.f32.mrf.mxu1 }
 0x2a4   : > { %5173 = vst [vmem:[%s8931_s12 + $0x308] sm:$0xff] %v5109_v3  ;;  %v5110_v59 = vmin.f32 %v5046_v33, 6.0  ;;  %v5047_v47 = vmax.f32 %v4983_v38, 0.0  ;;  %v4392_v62 = vadd.f32 %v3876_v8, %v10461_v60  ;;  %v3878_v23 = vadd.f32 %v9245_v26, %v9243_v6  ;;  %v9358_v43 = vpop.f32.mrf.mxu0  ;;  %v10462_v3 = vld [vmem:[#allocation54_spill] sm:$0xff] }
 0x2a5   : > { %v4984_v9 = vmul.f32 0.16666667, %v4920_v13  ;;  %v4921_v27 = vmul.f32 %v4857_v5, %v4665_v31  ;;  %v4858_v46 = vmin.f32 %v4794_v39, 6.0  ;;  %v4795_v63 = vmax.f32 %v4731_v14, 0.0  ;;  %v9360_v40 = vpop.f32.mrf.mxu1  ;;  %v10463_v14 = vld [vmem:[#allocation55_spill] sm:$0xff] }
 0x2a6   : > { %5174 = vst [vmem:[%s8931_s12 + $0x320] sm:$0xff] %v5110_v59  ;;  %v5111_v11 = vmin.f32 %v5047_v47, 6.0  ;;  %v4668_v50 = vadd.f32 %v8895_v35, %v4392_v62  ;;  %v4393_v33 = vadd.f32 %v3878_v23, %v10462_v3  ;;  %v3880_v60 = vadd.f32 %v9254_v12, %v9252_v16  ;;  %v9367_v8 = vpop.f32.mrf.mxu0 }
 0x2a7   : > { %v5048_v38 = vmax.f32 %v4984_v9, 0.0  ;;  %v4985_v6 = vmul.f32 0.16666667, %v4921_v27  ;;  %v4922_v26 = vmul.f32 %v4858_v46, %v4666_v32  ;;  %v4859_v31 = vmin.f32 %v4795_v63, 6.0  ;;  %v9369_v13 = vpop.f32.mrf.mxu1 }
 0x2a8   : > { %5175 = vst [vmem:[%s8931_s12 + $0x328] sm:$0xff] %v5111_v11  ;;  %v4732_v5 = vadd.f32 3.0, %v4668_v50  ;;  %v4669_v39 = vadd.f32 %v8902_v7, %v4393_v33  ;;  %v4396_v59 = vadd.f32 %v3880_v60, %v10463_v14  ;;  %v3882_v47 = vadd.f32 %v9260_v2, %v9258_v48  ;;  %v9376_v32 = vpop.f32.mrf.mxu0  ;;  %v10464_v11 = vld [vmem:[#allocation56_spill] sm:$0xff] }
 0x2a9   : > { %v5112_v62 = vmin.f32 %v5048_v38, 6.0  ;;  %v5049_v16 = vmax.f32 %v4985_v6, 0.0  ;;  %v4986_v12 = vmul.f32 0.16666667, %v4922_v26  ;;  %v4923_v23 = vmul.f32 %v4859_v31, %v4667_v36  ;;  %v9378_v9 = vpop.f32.mrf.mxu1 }
 0x2aa   : > { %v4796_v27 = vmax.f32 %v4732_v5, 0.0  ;;  %v4733_v46 = vadd.f32 3.0, %v4669_v39  ;;  %v4670_v63 = vadd.f32 %v8895_v35, %v4396_v59  ;;  %v4397_v3 = vadd.f32 %v3882_v47, %v10464_v11  ;;  %v9385_v2 = vpop.f32.mrf.mxu0  ;;  %v10465_v47 = vld [vmem:[#allocation57_spill] sm:$0xff] }
 0x2ab   : > { %5176 = vst [vmem:[%s8931_s12 + $0x340] sm:$0xff] %v5112_v62  ;;  %v5113_v33 = vmin.f32 %v5049_v16, 6.0  ;;  %v5050_v60 = vmax.f32 %v4986_v12, 0.0  ;;  %v4987_v14 = vmul.f32 0.16666667, %v4923_v23  ;;  %v3886_v48 = vadd.f32 %v9265_v37, %v9263_v44  ;;  %v9387_v36 = vpop.f32.mrf.mxu1 }
 0x2ac   : > { %v4860_v38 = vmin.f32 %v4796_v27, 6.0  ;;  %v4797_v6 = vmax.f32 %v4733_v46, 0.0  ;;  %v4734_v26 = vadd.f32 3.0, %v4670_v63  ;;  %v4671_v31 = vadd.f32 %v8902_v7, %v4397_v3  ;;  %v9394_v12 = vpop.f32.mrf.mxu0 }
 0x2ad   : > { %5177 = vst [vmem:[%s8931_s12 + $0x348] sm:$0xff] %v5113_v33  ;;  %v5114_v5 = vmin.f32 %v5050_v60, 6.0  ;;  %v5051_v59 = vmax.f32 %v4987_v14, 0.0  ;;  %v4400_v62 = vadd.f32 %v3886_v48, %v10465_v47  ;;  %v3888_v16 = vadd.f32 %v9272_v19, %v9270_v57  ;;  %v9396_v44 = vpop.f32.mrf.mxu1  ;;  %v10466_v33 = vld [vmem:[#allocation58_spill] sm:$0xff] }
 0x2ae   : > { %v4924_v37 = vmul.f32 %v4860_v38, %v4668_v50  ;;  %v4861_v23 = vmin.f32 %v4797_v6, 6.0  ;;  %v4798_v27 = vmax.f32 %v4734_v26, 0.0  ;;  %v4735_v46 = vadd.f32 3.0, %v4671_v31  ;;  %v9403_v48 = vpop.f32.mrf.mxu0  ;;  %v10467_v26 = vld [vmem:[#allocation59_spill] sm:$0xff] }
 0x2af   : > { %5178 = vst [vmem:[%s8931_s12 + $0x360] sm:$0xff] %v5114_v5  ;;  %v5115_v11 = vmin.f32 %v5051_v59, 6.0  ;;  %v4672_v3 = vadd.f32 %v8895_v35, %v4400_v62  ;;  %v4401_v60 = vadd.f32 %v3888_v16, %v10466_v33  ;;  %v3890_v14 = vadd.f32 %v9280_v56, %v9278_v49  ;;  %v9405_v57 = vpop.f32.mrf.mxu1 }
 0x2b0   : > { %v4988_v19 = vmul.f32 0.16666667, %v4924_v37  ;;  %v4925_v47 = vmul.f32 %v4861_v23, %v4669_v39  ;;  %v4862_v53 = vmin.f32 %v4798_v27, 6.0  ;;  %v4799_v50 = vmax.f32 %v4735_v46, 0.0  ;;  %v9412_v62 = vpop.f32.mrf.mxu0  ;;  %v10468_v46 = vld [vmem:[#allocation60_spill] sm:$0xff] }
 0x2b1   : > { %5179 = vst [vmem:[%s8931_s12 + $0x368] sm:$0xff] %v5115_v11  ;;  %v4736_v38 = vadd.f32 3.0, %v4672_v3  ;;  %v4673_v6 = vadd.f32 %v8902_v7, %v4401_v60  ;;  %v4404_v5 = vadd.f32 %v3890_v14, %v10467_v26  ;;  %v3892_v59 = vadd.f32 %v9289_v25, %v9287_v54  ;;  %v9414_v49 = vpop.f32.mrf.mxu1 }
 0x2b2   : > { %v5052_v56 = vmax.f32 %v4988_v19, 0.0  ;;  %v4989_v16 = vmul.f32 0.16666667, %v4925_v47  ;;  %v4926_v33 = vmul.f32 %v4862_v53, %v4670_v63  ;;  %v4863_v37 = vmin.f32 %v4799_v50, 6.0  ;;  %v9418_v60 = vpop.f32.mrf.mxu0 }
 0x2b3   : > { %v4800_v39 = vmax.f32 %v4736_v38, 0.0  ;;  %v4737_v23 = vadd.f32 3.0, %v4673_v6  ;;  %v4674_v27 = vadd.f32 %v8895_v35, %v4404_v5  ;;  %v4405_v11 = vadd.f32 %v3892_v59, %v10468_v46  ;;  %v9420_v14 = vpop.f32.mrf.mxu1  ;;  %v5252_v35 = vld [vmem:[%s10205_s2 + $0x2] sm:$0x3] }
 0x2b4   : > { %v5116_v54 = vmin.f32 %v5052_v56, 6.0  ;;  %v5053_v25 = vmax.f32 %v4989_v16, 0.0  ;;  %v4990_v26 = vmul.f32 0.16666667, %v4926_v33  ;;  %v4927_v29 = vmul.f32 %v4863_v37, %v4671_v31  ;;  %v9426_v63 = vpop.f32.mrf.mxu0 }
 0x2b5   : > { %v4864_v18 = vmin.f32 %v4800_v39, 6.0  ;;  %v4801_v19 = vmax.f32 %v4737_v23, 0.0  ;;  %v4738_v47 = vadd.f32 3.0, %v4674_v27  ;;  %v4675_v53 = vadd.f32 %v8902_v7, %v4405_v11  ;;  %v9428_v50 = vpop.f32.mrf.mxu1  ;;  %v10469_v11 = vld [vmem:[#allocation61_spill] sm:$0xff] }
 0x2b6   : > { %5180 = vst [vmem:[%s8931_s12 + $0x380] sm:$0xff] %v5116_v54  ;;  %v5117_v38 = vmin.f32 %v5053_v25, 6.0  ;;  %v5054_v5 = vmax.f32 %v4990_v26, 0.0  ;;  %v4991_v59 = vmul.f32 0.16666667, %v4927_v29  ;;  %v4122_v31 = vadd.f32 %v9298_v15, %v9296_v58  ;;  %v9433_v37 = vpop.f32.mrf.mxu0 }
 0x2b7   : > { %v4928_v56 = vmul.f32 %v4864_v18, %v4672_v3  ;;  %v4865_v16 = vmin.f32 %v4801_v19, 6.0  ;;  %v4802_v33 = vmax.f32 %v4738_v47, 0.0  ;;  %v4739_v7 = vadd.f32 3.0, %v4675_v53  ;;  %v9435_v39 = vpop.f32.mrf.mxu1 }
 0x2b8   : > { %5181 = vst [vmem:[%s8931_s12 + $0x388] sm:$0xff] %v5117_v38  ;;  %v5118_v23 = vmin.f32 %v5054_v5, 6.0  ;;  %v5055_v46 = vmax.f32 %v4991_v59, 0.0  ;;  %v4282_v54 = vadd.f32 %v4122_v31, %v10469_v11  ;;  %v10470_v25 = vsub.s32 0, %v8878_v51  ;;  %v9443_v3 = vpop.f32.mrf.mxu0 }
 0x2b9   : > { %v4992_v26 = vmul.f32 0.16666667, %v4928_v56  ;;  %v4929_v58 = vmul.f32 %v4865_v16, %v4673_v6  ;;  %v4866_v18 = vmin.f32 %v4802_v33, 6.0  ;;  %v4803_v15 = vmax.f32 %v4739_v7, 0.0  ;;  %v9445_v19 = vpop.f32.mrf.mxu1 }
 0x2ba   : > { %v9441_v29 = vrot.slane %v5252_v35, %v10470_v25  ;;  %5182 = vst [vmem:[%s8931_s12 + $0x3a0] sm:$0xff] %v5118_v23  ;;  %v5119_v47 = vmin.f32 %v5055_v46, 6.0  ;;  %v4124_v5 = vadd.f32 %v9307_v21, %v9305_v20  ;;  %v10471_v59 = vsub.s32 1, %v8878_v51  ;;  %v9455_v7 = vpop.f32.mrf.mxu0  ;;  %v10472_v46 = vld [vmem:[#allocation62_spill] sm:$0xff] }
 0x2bb   : > { %v5056_v56 = vmax.f32 %v4992_v26, 0.0  ;;  %v4993_v6 = vmul.f32 0.16666667, %v4929_v58  ;;  %v4930_v16 = vmul.f32 %v4866_v18, %v4674_v27  ;;  %v4867_v33 = vmin.f32 %v4803_v15, 6.0  ;;  %v9457_v11 = vpop.f32.mrf.mxu1 }
 0x2bc   : > { %v5264_v38 = vadd.f32 %v9441_v29, %v4282_v54  ;;  %v9453_v31 = vrot.slane %v5252_v35, %v10471_v59  ;;  %5183 = vst [vmem:[%s8931_s12 + $0x3a8] sm:$0xff] %v5119_v47  ;;  %v4283_v54 = vadd.f32 %v4124_v5, %v10472_v46  ;;  %v4126_v20 = vadd.f32 %v9316_v34, %v9314_v41  ;;  %v9465_v26 = vpop.f32.mrf.mxu0  ;;  %v10473_v47 = vld [vmem:[#allocation63_spill] sm:$0xff]  ;;  %v10474_v59 = vld [vmem:[#allocation64_spill] sm:$0xff] }
 0x2bd   : > { %v4128_v51 = vadd.f32 %v9325_v22, %v9323_v24  ;;  %v5120_v21 = vmin.f32 %v5056_v56, 6.0  ;;  %v5057_v35 = vmax.f32 %v4993_v6, 0.0  ;;  %v4994_v25 = vmul.f32 0.16666667, %v4930_v16  ;;  %v9467_v58 = vpop.f32.mrf.mxu1 }
 0x2be   : > { %v5328_v23 = vadd.f32 3.0, %v5264_v38  ;;  %v4931_v27 = vmul.f32 %v4867_v33, %v4675_v53  ;;  %v5265_v15 = vadd.f32 %v9453_v31, %v4283_v54  ;;  %v4286_v5 = vadd.f32 %v4126_v20, %v10473_v47  ;;  %v9475_v53 = vpop.f32.mrf.mxu0 }
 0x2bf   : > { %v4287_v46 = vadd.f32 %v4128_v51, %v10474_v59  ;;  %5184 = vst [vmem:[%s8931_s12 + $0x3c0] sm:$0xff] %v5120_v21  ;;  %v5121_v41 = vmin.f32 %v5057_v35, 6.0  ;;  %v5058_v34 = vmax.f32 %v4994_v25, 0.0  ;;  %v4132_v22 = vadd.f32 %v9334_v28, %v9332_v42  ;;  %v9477_v56 = vpop.f32.mrf.mxu1  ;;  %v10475_v51 = vld [vmem:[#allocation65_spill] sm:$0xff] }
 0x2c0   : > { %v5392_v18 = vmax.f32 %v5328_v23, 0.0  ;;  %v4995_v24 = vmul.f32 0.16666667, %v4931_v27  ;;  %v5329_v16 = vadd.f32 3.0, %v5265_v15  ;;  %v5266_v33 = vadd.f32 %v9441_v29, %v4286_v5  ;;  %v9485_v42 = vpop.f32.mrf.mxu0 }
 0x2c1   : > { %v5267_v23 = vadd.f32 %v9453_v31, %v4287_v46  ;;  %5185 = vst [vmem:[%s8931_s12 + $0x3c8] sm:$0xff] %v5121_v41  ;;  %v5122_v54 = vmin.f32 %v5058_v34, 6.0  ;;  %v4290_v21 = vadd.f32 %v4132_v22, %v10475_v51  ;;  %v4134_v35 = vadd.f32 %v9340_v45, %v9338_v4  ;;  %v9487_v28 = vpop.f32.mrf.mxu1  ;;  %v10476_v46 = vld [vmem:[#allocation66_spill] sm:$0xff] }
 0x2c2   : > { %v5456_v6 = vmin.f32 %v5392_v18, 6.0  ;;  %v5059_v20 = vmax.f32 %v4995_v24, 0.0  ;;  %v5393_v27 = vmax.f32 %v5329_v16, 0.0  ;;  %v5330_v18 = vadd.f32 3.0, %v5266_v33  ;;  %v9494_v24 = vpop.f32.mrf.mxu0 }
 0x2c3   : > { %v5331_v47 = vadd.f32 3.0, %v5267_v23  ;;  %5186 = vst [vmem:[%s8931_s12 + $0x3e0] sm:$0xff] %v5122_v54  ;;  %v5268_v59 = vadd.f32 %v9441_v29, %v4290_v21  ;;  %v4291_v41 = vadd.f32 %v4134_v35, %v10476_v46  ;;  %v4136_v34 = vadd.f32 %v9345_v61, %v9343_v10  ;;  %v9496_v4 = vpop.f32.mrf.mxu1  ;;  %v10477_v54 = vld [vmem:[#allocation69_spill] sm:$0xff] }
 0x2c4   : > { %v5520_v25 = vmul.f32 %v5456_v6, %v5264_v38  ;;  %v5123_v5 = vmin.f32 %v5059_v20, 6.0  ;;  %v5457_v22 = vmin.f32 %v5393_v27, 6.0  ;;  %v5394_v51 = vmax.f32 %v5330_v18, 0.0  ;;  %v9503_v35 = vpop.f32.mrf.mxu0 }
 0x2c5   : > { %v5395_v38 = vmax.f32 %v5331_v47, 0.0  ;;  %v5332_v6 = vadd.f32 3.0, %v5268_v59  ;;  %v5269_v16 = vadd.f32 %v9453_v31, %v4291_v41  ;;  %v4294_v20 = vadd.f32 %v4136_v34, %v10477_v54  ;;  %v9505_v10 = vpop.f32.mrf.mxu1 }
 0x2c6   : > { %v5584_v45 = vmul.f32 0.16666667, %v5520_v25  ;;  %5187 = vst [vmem:[%s8931_s12 + $0x3e8] sm:$0xff] %v5123_v5  ;;  %v4138_v21 = vadd.f32 %v9352_v30, %v9350_v1  ;;  %v5521_v46 = vmul.f32 %v5457_v22, %v5265_v15  ;;  %v5458_v55 = vmin.f32 %v5394_v51, 6.0  ;;  %v10478_v5 = vld [vmem:[#allocation72_spill] sm:$0xff]  ;;  %v9509_v52 = vpop.f32.mrf.mxu0 }
 0x2c7   : > { %v5459_v25 = vmin.f32 %v5395_v38, 6.0  ;;  %v5396_v27 = vmax.f32 %v5332_v6, 0.0  ;;  %v5333_v18 = vadd.f32 3.0, %v5269_v16  ;;  %v5270_v47 = vadd.f32 %v9441_v29, %v4294_v20  ;;  %v9511_v34 = vpop.f32.mrf.mxu1 }
 0x2c8   : > { %v5648_v61 = vmax.f32 %v5584_v45, 0.0  ;;  %v4295_v41 = vadd.f32 %v4138_v21, %v10478_v5  ;;  %v5585_v30 = vmul.f32 0.16666667, %v5521_v46  ;;  %v5522_v54 = vmul.f32 %v5458_v55, %v5266_v33  ;;  %v9514_v51 = vpop.f32.mrf.mxu0 }
 0x2c9   : > { %v5523_v17 = vmul.f32 %v5459_v25, %v5267_v23  ;;  %v5460_v0 = vmin.f32 %v5396_v27, 6.0  ;;  %v5397_v45 = vmax.f32 %v5333_v18, 0.0  ;;  %v5334_v15 = vadd.f32 3.0, %v5270_v47  ;;  %v9516_v38 = vpop.f32.mrf.mxu1 }
 0x2ca   : > { %v5712_v1 = vmin.f32 %v5648_v61, 6.0  ;;  %v5271_v22 = vadd.f32 %v9453_v31, %v4295_v41  ;;  %10479 = vst [vmem:[#allocation67_spill] sm:$0xff] %v9516_v38  ;;  %v5649_v6 = vmax.f32 %v5585_v30, 0.0  ;;  %v5586_v20 = vmul.f32 0.16666667, %v5522_v54  ;;  %v9521_v46 = vpop.f32.mrf.mxu0  ;;  %v10480_v38 = vld [vmem:[#allocation73_spill] sm:$0xff] }
 0x2cb   : > { %v5587_v21 = vmul.f32 0.16666667, %v5523_v17  ;;  %v4142_v5 = vadd.f32 %v9360_v40, %v9358_v43  ;;  %v5524_v61 = vmul.f32 %v5460_v0, %v5268_v59  ;;  %v5461_v55 = vmin.f32 %v5397_v45, 6.0  ;;  %v9523_v25 = vpop.f32.mrf.mxu1 }
 0x2cc   : > { %5776 = vst [vmem:[%s8931_s12 + $0x10] sm:$0xff] %v5712_v1  ;;  %v5398_v33 = vmax.f32 %v5334_v15, 0.0  ;;  %v5335_v23 = vadd.f32 3.0, %v5271_v22  ;;  %v5713_v27 = vmin.f32 %v5649_v6, 6.0  ;;  %v5650_v18 = vmax.f32 %v5586_v20, 0.0  ;;  %v9526_v0 = vpop.f32.mrf.mxu0 }
 0x2cd   : > { %v5651_v41 = vmax.f32 %v5587_v21, 0.0  ;;  %v4298_v1 = vadd.f32 %v4142_v5, %v10480_v38  ;;  %v5588_v30 = vmul.f32 0.16666667, %v5524_v61  ;;  %v5525_v54 = vmul.f32 %v5461_v55, %v5269_v16  ;;  %v9528_v40 = vpop.f32.mrf.mxu1 }
 0x2ce   : > { %v5462_v17 = vmin.f32 %v5398_v33, 6.0  ;;  %v5399_v43 = vmax.f32 %v5335_v23, 0.0  ;;  %5777 = vst [vmem:[%s8931_s12 + $0x18] sm:$0xff] %v5713_v27  ;;  %v5714_v59 = vmin.f32 %v5650_v18, 6.0  ;;  %v4144_v6 = vadd.f32 %v9369_v13, %v9367_v8  ;;  %v9534_v5 = vpop.f32.mrf.mxu0  ;;  %v10481_v33 = vld [vmem:[#allocation74_spill] sm:$0xff] }
 0x2cf   : > { %v5715_v45 = vmin.f32 %v5651_v41, 6.0  ;;  %v5272_v15 = vadd.f32 %v9441_v29, %v4298_v1  ;;  %v5652_v20 = vmax.f32 %v5588_v30, 0.0  ;;  %v5589_v38 = vmul.f32 0.16666667, %v5525_v54  ;;  %v9536_v61 = vpop.f32.mrf.mxu1 }
 0x2d0   : > { %v5526_v21 = vmul.f32 %v5462_v17, %v5270_v47  ;;  %v5463_v16 = vmin.f32 %v5399_v43, 6.0  ;;  %5778 = vst [vmem:[%s8931_s12 + $0x30] sm:$0xff] %v5714_v59  ;;  %v4299_v23 = vadd.f32 %v4144_v6, %v10481_v33  ;;  %v4146_v27 = vadd.f32 %v9378_v9, %v9376_v32  ;;  %v9545_v1 = vpop.f32.mrf.mxu0  ;;  %v10482_v43 = vld [vmem:[#allocation77_spill] sm:$0xff] }
 0x2d1   : > { %5779 = vst [vmem:[%s8931_s12 + $0x38] sm:$0xff] %v5715_v45  ;;  %v5336_v55 = vadd.f32 3.0, %v5272_v15  ;;  %v4148_v8 = vadd.f32 %v9387_v36, %v9385_v2  ;;  %v5716_v13 = vmin.f32 %v5652_v20, 6.0  ;;  %v5653_v18 = vmax.f32 %v5589_v38, 0.0  ;;  %v9547_v30 = vpop.f32.mrf.mxu1  ;;  %v10483_v45 = vld [vmem:[#allocation80_spill] sm:$0xff] }
 0x2d2   : > { %v5590_v47 = vmul.f32 0.16666667, %v5526_v21  ;;  %v5527_v41 = vmul.f32 %v5463_v16, %v5271_v22  ;;  %v5273_v17 = vadd.f32 %v9453_v31, %v4299_v23  ;;  %v4302_v59 = vadd.f32 %v4146_v27, %v10482_v43  ;;  %v9555_v22 = vpop.f32.mrf.mxu0  ;;  %v10484_v27 = vld [vmem:[#allocation81_spill] sm:$0xff] }
 0x2d3   : > { %v5400_v54 = vmax.f32 %v5336_v55, 0.0  ;;  %v4303_v6 = vadd.f32 %v4148_v8, %v10483_v45  ;;  %5780 = vst [vmem:[%s8931_s12 + $0x50] sm:$0xff] %v5716_v13  ;;  %v5717_v32 = vmin.f32 %v5653_v18, 6.0  ;;  %v4152_v36 = vadd.f32 %v9396_v44, %v9394_v12  ;;  %v9557_v20 = vpop.f32.mrf.mxu1  ;;  %v10485_v45 = vld [vmem:[#allocation82_spill] sm:$0xff] }
 0x2d4   : > { %v5654_v9 = vmax.f32 %v5590_v47, 0.0  ;;  %v5591_v2 = vmul.f32 0.16666667, %v5527_v41  ;;  %v5337_v21 = vadd.f32 3.0, %v5273_v17  ;;  %v5274_v16 = vadd.f32 %v9441_v29, %v4302_v59  ;;  %v9565_v12 = vpop.f32.mrf.mxu0 }
 0x2d5   : > { %v5464_v38 = vmin.f32 %v5400_v54, 6.0  ;;  %v5275_v55 = vadd.f32 %v9453_v31, %v4303_v6  ;;  %5781 = vst [vmem:[%s8931_s12 + $0x58] sm:$0xff] %v5717_v32  ;;  %v4306_v8 = vadd.f32 %v4152_v36, %v10484_v27  ;;  %v4154_v13 = vadd.f32 %v9405_v57, %v9403_v48  ;;  %v9567_v44 = vpop.f32.mrf.mxu1 }
 0x2d6   : > { %v5718_v33 = vmin.f32 %v5654_v9, 6.0  ;;  %v5655_v23 = vmax.f32 %v5591_v2, 0.0  ;;  %v5401_v47 = vmax.f32 %v5337_v21, 0.0  ;;  %v5338_v41 = vadd.f32 3.0, %v5274_v16  ;;  %v9574_v9 = vpop.f32.mrf.mxu0 }
 0x2d7   : > { %v5528_v18 = vmul.f32 %v5464_v38, %v5272_v15  ;;  %v5339_v54 = vadd.f32 3.0, %v5275_v55  ;;  %v5276_v59 = vadd.f32 %v9441_v29, %v4306_v8  ;;  %v4307_v6 = vadd.f32 %v4154_v13, %v10485_v45  ;;  %10486 = vst [vmem:[#allocation68_spill] sm:$0xff] %v9574_v9  ;;  %v9576_v48 = vpop.f32.mrf.mxu1 }
 0x2d8   : > { %5782 = vst [vmem:[%s8931_s12 + $0x70] sm:$0xff] %v5718_v33  ;;  %v5719_v43 = vmin.f32 %v5655_v23, 6.0  ;;  %v4156_v32 = vadd.f32 %v9414_v49, %v9412_v62  ;;  %10487 = vst [vmem:[#allocation70_spill] sm:$0xff] %v9576_v48  ;;  %v5465_v2 = vmin.f32 %v5401_v47, 6.0  ;;  %v5402_v36 = vmax.f32 %v5338_v41, 0.0  ;;  %v10488_v33 = vld [vmem:[#allocation85_spill] sm:$0xff]  ;;  %v9583_v45 = vpop.f32.mrf.mxu0 }
 0x2d9   : > { %v5592_v57 = vmul.f32 0.16666667, %v5528_v18  ;;  %v5403_v15 = vmax.f32 %v5339_v54, 0.0  ;;  %v5340_v38 = vadd.f32 3.0, %v5276_v59  ;;  %v5277_v21 = vadd.f32 %v9453_v31, %v4307_v6  ;;  %v9585_v18 = vpop.f32.mrf.mxu1 }
 0x2da   : > { %5783 = vst [vmem:[%s8931_s12 + $0x78] sm:$0xff] %v5719_v43  ;;  %v4310_v23 = vadd.f32 %v4156_v32, %v10488_v33  ;;  %v4158_v27 = vadd.f32 %v9420_v14, %v9418_v60  ;;  %v5529_v13 = vmul.f32 %v5465_v2, %v5273_v17  ;;  %v5466_v62 = vmin.f32 %v5402_v36, 6.0  ;;  %v10489_v43 = vld [vmem:[#allocation88_spill] sm:$0xff] }
 0x2db   : > { %v5656_v8 = vmax.f32 %v5592_v57, 0.0  ;;  %v5467_v49 = vmin.f32 %v5403_v15, 6.0  ;;  %v5404_v47 = vmax.f32 %v5340_v38, 0.0  ;;  %v5341_v41 = vadd.f32 3.0, %v5277_v21 }
 0x2dc   : > { %v5278_v54 = vadd.f32 %v9441_v29, %v4310_v23  ;;  %v4311_v6 = vadd.f32 %v4158_v27, %v10489_v43  ;;  %v5593_v32 = vmul.f32 0.16666667, %v5529_v13  ;;  %v5530_v33 = vmul.f32 %v5466_v62, %v5274_v16  ;;  %v9593_v23 = vpop.f32.mrf.mxu0  ;;  %v9595_v27 = vpop.f32.mrf.mxu1 }
 0x2dd   : > { %v5720_v48 = vmin.f32 %v5656_v8, 6.0  ;;  %v5531_v9 = vmul.f32 %v5467_v49, %v5275_v55  ;;  %v5468_v60 = vmin.f32 %v5404_v47, 6.0  ;;  %v5405_v14 = vmax.f32 %v5341_v41, 0.0  ;;  %v10490_v41 = vld [vmem:[#allocation89_spill] sm:$0xff] }
 0x2de   : > { %v5342_v17 = vadd.f32 3.0, %v5278_v54  ;;  %v5279_v57 = vadd.f32 %v9453_v31, %v4311_v6  ;;  %v5657_v2 = vmax.f32 %v5593_v32, 0.0  ;;  %v5594_v36 = vmul.f32 0.16666667, %v5530_v33 }
 0x2df   : > { %5784 = vst [vmem:[%s8931_s12 + $0x90] sm:$0xff] %v5720_v48  ;;  %v5595_v15 = vmul.f32 0.16666667, %v5531_v9  ;;  %v4162_v38 = vadd.f32 %v9428_v50, %v9426_v63  ;;  %v5532_v8 = vmul.f32 %v5468_v60, %v5276_v59  ;;  %v5469_v16 = vmin.f32 %v5405_v14, 6.0  ;;  %v9602_v60 = vpop.f32.mrf.mxu0  ;;  %v9604_v14 = vpop.f32.mrf.mxu1 }
 0x2e0   : > { %v5406_v55 = vmax.f32 %v5342_v17, 0.0  ;;  %v5343_v13 = vadd.f32 3.0, %v5279_v57  ;;  %v5721_v62 = vmin.f32 %v5657_v2, 6.0  ;;  %v5658_v49 = vmax.f32 %v5594_v36, 0.0 }
 0x2e1   : > { %v5659_v47 = vmax.f32 %v5595_v15, 0.0  ;;  %v4314_v48 = vadd.f32 %v4162_v38, %v10490_v41  ;;  %v5596_v43 = vmul.f32 0.16666667, %v5532_v8  ;;  %v5533_v9 = vmul.f32 %v5469_v16, %v5277_v21  ;;  %v10491_v38 = vld [vmem:[#allocation90_spill] sm:$0xff] }
 0x2e2   : > { %v5470_v6 = vmin.f32 %v5406_v55, 6.0  ;;  %v5407_v32 = vmax.f32 %v5343_v13, 0.0  ;;  %5785 = vst [vmem:[%s8931_s12 + $0x98] sm:$0xff] %v5721_v62  ;;  %v5722_v63 = vmin.f32 %v5658_v49, 6.0  ;;  %v4164_v59 = vadd.f32 %v9435_v39, %v9433_v37 }
 0x2e3   : > { %v5723_v50 = vmin.f32 %v5659_v47, 6.0  ;;  %v5280_v33 = vadd.f32 %v9441_v29, %v4314_v48  ;;  %v5660_v17 = vmax.f32 %v5596_v43, 0.0  ;;  %v5597_v2 = vmul.f32 0.16666667, %v5533_v9  ;;  %v10492_v47 = vld [vmem:[#allocation93_spill] sm:$0xff]  ;;  %v10493_v48 = vld [vmem:[#allocation96_spill] sm:$0xff]  ;;  %v9616_v9 = vpop.f32.mrf.mxu0 }
 0x2e4   : > { %v5534_v36 = vmul.f32 %v5470_v6, %v5278_v54  ;;  %v5471_v15 = vmin.f32 %v5407_v32, 6.0  ;;  %5786 = vst [vmem:[%s8931_s12 + $0xb0] sm:$0xff] %v5722_v63  ;;  %v4315_v8 = vadd.f32 %v4164_v59, %v10491_v38  ;;  %v4166_v16 = vadd.f32 %v9445_v19, %v9443_v3  ;;  %v9618_v6 = vpop.f32.mrf.mxu1 }
 0x2e5   : > { %5787 = vst [vmem:[%s8931_s12 + $0xb8] sm:$0xff] %v5723_v50  ;;  %v5344_v21 = vadd.f32 3.0, %v5280_v33  ;;  %v4168_v37 = vadd.f32 %v9457_v11, %v9455_v7  ;;  %v5724_v39 = vmin.f32 %v5660_v17, 6.0  ;;  %v5661_v55 = vmax.f32 %v5597_v2, 0.0  ;;  %v10494_v2 = vld [vmem:[#allocation97_spill] sm:$0xff] }
 0x2e6   : > { %v5598_v13 = vmul.f32 0.16666667, %v5534_v36  ;;  %v5535_v62 = vmul.f32 %v5471_v15, %v5279_v57  ;;  %v5281_v54 = vadd.f32 %v9453_v31, %v4315_v8  ;;  %v4318_v41 = vadd.f32 %v4166_v16, %v10492_v47  ;;  %v9631_v16 = vpop.f32.mrf.mxu1 }
 0x2e7   : > { %v5408_v49 = vmax.f32 %v5344_v21, 0.0  ;;  %v4319_v43 = vadd.f32 %v4168_v37, %v10493_v48  ;;  %5788 = vst [vmem:[%s8931_s12 + $0xd0] sm:$0xff] %v5724_v39  ;;  %v5725_v3 = vmin.f32 %v5661_v55, 6.0  ;;  %v4172_v11 = vadd.f32 %v9467_v58, %v9465_v26  ;;  %v9629_v58 = vpop.f32.mrf.mxu0  ;;  %v10495_v55 = vld [vmem:[#allocation98_spill] sm:$0xff]  ;;  %v10496_v48 = vld [vmem:[#allocation100_spill] sm:$0xff] }
 0x2e8   : > { %v5662_v19 = vmax.f32 %v5598_v13, 0.0  ;;  %v5599_v7 = vmul.f32 0.16666667, %v5535_v62  ;;  %v5345_v32 = vadd.f32 3.0, %v5281_v54  ;;  %v5282_v63 = vadd.f32 %v9441_v29, %v4318_v41 }
 0x2e9   : > { %v5472_v57 = vmin.f32 %v5408_v49, 6.0  ;;  %v5283_v50 = vadd.f32 %v9453_v31, %v4319_v43  ;;  %5789 = vst [vmem:[%s8931_s12 + $0xd8] sm:$0xff] %v5725_v3  ;;  %v4322_v36 = vadd.f32 %v4172_v11, %v10494_v2  ;;  %v4174_v15 = vadd.f32 %v9477_v56, %v9475_v53  ;;  %v10497_v2 = vld [vmem:[#allocation103_spill] sm:$0xff] }
 0x2ea   : > { %v5726_v59 = vmin.f32 %v5662_v19, 6.0  ;;  %v5663_v17 = vmax.f32 %v5599_v7, 0.0  ;;  %v5409_v38 = vmax.f32 %v5345_v32, 0.0  ;;  %v5346_v8 = vadd.f32 3.0, %v5282_v63  ;;  %v9643_v32 = vpop.f32.mrf.mxu0 }
 0x2eb   : > { %v5536_v21 = vmul.f32 %v5472_v57, %v5280_v33  ;;  %v5347_v26 = vadd.f32 3.0, %v5283_v50  ;;  %v5284_v39 = vadd.f32 %v9441_v29, %v4322_v36  ;;  %v4323_v13 = vadd.f32 %v4174_v15, %v10495_v55 }
 0x2ec   : > { %5790 = vst [vmem:[%s8931_s12 + $0xf0] sm:$0xff] %v5726_v59  ;;  %v5727_v37 = vmin.f32 %v5663_v17, 6.0  ;;  %v4176_v62 = vadd.f32 %v9487_v28, %v9485_v42  ;;  %v5473_v53 = vmin.f32 %v5409_v38, 6.0  ;;  %v5410_v56 = vmax.f32 %v5346_v8, 0.0  ;;  %v9645_v42 = vpop.f32.mrf.mxu1 }
 0x2ed   : > { %v5600_v49 = vmul.f32 0.16666667, %v5536_v21  ;;  %v5411_v33 = vmax.f32 %v5347_v26, 0.0  ;;  %v5348_v47 = vadd.f32 3.0, %v5284_v39  ;;  %v5285_v41 = vadd.f32 %v9453_v31, %v4323_v13 }
 0x2ee   : > { %5791 = vst [vmem:[%s8931_s12 + $0xf8] sm:$0xff] %v5727_v37  ;;  %v4326_v43 = vadd.f32 %v4176_v62, %v10496_v48  ;;  %v4178_v3 = vadd.f32 %v9496_v4, %v9494_v24  ;;  %v5537_v7 = vmul.f32 %v5473_v53, %v5281_v54  ;;  %v5474_v11 = vmin.f32 %v5410_v56, 6.0  ;;  %v9655_v53 = vpop.f32.mrf.mxu1 }
 0x2ef   : > { %v5664_v19 = vmax.f32 %v5600_v49, 0.0  ;;  %v5475_v57 = vmin.f32 %v5411_v33, 6.0  ;;  %v5412_v28 = vmax.f32 %v5348_v47, 0.0  ;;  %v5349_v59 = vadd.f32 3.0, %v5285_v41  ;;  %v9653_v49 = vpop.f32.mrf.mxu0 }
 0x2f0   : > { %v5286_v17 = vadd.f32 %v9441_v29, %v4326_v43  ;;  %v4327_v36 = vadd.f32 %v4178_v3, %v10497_v2  ;;  %v5601_v21 = vmul.f32 0.16666667, %v5537_v7  ;;  %v5538_v38 = vmul.f32 %v5474_v11, %v5282_v63  ;;  %v10498_v3 = vld [vmem:[#allocation104_spill] sm:$0xff] }
 0x2f1   : > { %v5728_v15 = vmin.f32 %v5664_v19, 6.0  ;;  %v5539_v8 = vmul.f32 %v5475_v57, %v5283_v50  ;;  %v5476_v24 = vmin.f32 %v5412_v28, 6.0  ;;  %v5413_v4 = vmax.f32 %v5349_v59, 0.0  ;;  %v9662_v2 = vpop.f32.mrf.mxu0 }
 0x2f2   : > { %v5350_v54 = vadd.f32 3.0, %v5286_v17  ;;  %v5287_v26 = vadd.f32 %v9453_v31, %v4327_v36  ;;  %v5665_v37 = vmax.f32 %v5601_v21, 0.0  ;;  %v5602_v55 = vmul.f32 0.16666667, %v5538_v38  ;;  %v9664_v36 = vpop.f32.mrf.mxu1 }
 0x2f3   : > { %5792 = vst [vmem:[%s8931_s12 + $0x110] sm:$0xff] %v5728_v15  ;;  %v5603_v13 = vmul.f32 0.16666667, %v5539_v8  ;;  %v4182_v62 = vadd.f32 %v9505_v10, %v9503_v35  ;;  %v5540_v56 = vmul.f32 %v5476_v24, %v5284_v39  ;;  %v5477_v63 = vmin.f32 %v5413_v4, 6.0  ;;  %v10499_v24 = vld [vmem:[#allocation105_spill] sm:$0xff] }
 0x2f4   : > { %v5414_v50 = vmax.f32 %v5350_v54, 0.0  ;;  %v5351_v33 = vadd.f32 3.0, %v5287_v26  ;;  %v5729_v47 = vmin.f32 %v5665_v37, 6.0  ;;  %v5666_v48 = vmax.f32 %v5602_v55, 0.0  ;;  %v10500_v54 = vld [vmem:[#allocation67_spill] sm:$0xff] }
 0x2f5   : > { %v5667_v43 = vmax.f32 %v5603_v13, 0.0  ;;  %v4330_v19 = vadd.f32 %v4182_v62, %v10498_v3  ;;  %v5604_v7 = vmul.f32 0.16666667, %v5540_v56  ;;  %v5541_v11 = vmul.f32 %v5477_v63, %v5285_v41  ;;  %v10501_v63 = vld [vmem:[#allocation108_spill] sm:$0xff] }
 0x2f6   : > { %v5478_v57 = vmin.f32 %v5414_v50, 6.0  ;;  %v5415_v28 = vmax.f32 %v5351_v33, 0.0  ;;  %5793 = vst [vmem:[%s8931_s12 + $0x118] sm:$0xff] %v5729_v47  ;;  %v5730_v35 = vmin.f32 %v5666_v48, 6.0  ;;  %v4184_v39 = vadd.f32 %v9511_v34, %v9509_v52  ;;  %v10502_v33 = vld [vmem:[#allocation109_spill] sm:$0xff]  ;;  %v9676_v48 = vpop.f32.mrf.mxu0 }
 0x2f7   : > { %v5731_v10 = vmin.f32 %v5667_v43, 6.0  ;;  %v5288_v59 = vadd.f32 %v9441_v29, %v4330_v19  ;;  %v5668_v15 = vmax.f32 %v5604_v7, 0.0  ;;  %v5605_v21 = vmul.f32 0.16666667, %v5541_v11  ;;  %v9678_v43 = vpop.f32.mrf.mxu1 }
 0x2f8   : > { %v5542_v38 = vmul.f32 %v5478_v57, %v5286_v17  ;;  %v5479_v8 = vmin.f32 %v5415_v28, 6.0  ;;  %5794 = vst [vmem:[%s8931_s12 + $0x130] sm:$0xff] %v5730_v35  ;;  %v4331_v4 = vadd.f32 %v4184_v39, %v10499_v24  ;;  %v4186_v37 = vadd.f32 %v10500_v54, %v9514_v51  ;;  %v10503_v35 = vld [vmem:[#allocation110_spill] sm:$0xff] }
 0x2f9   : > { %5795 = vst [vmem:[%s8931_s12 + $0x138] sm:$0xff] %v5731_v10  ;;  %v5352_v41 = vadd.f32 3.0, %v5288_v59  ;;  %v4188_v52 = vadd.f32 %v9523_v25, %v9521_v46  ;;  %v5732_v34 = vmin.f32 %v5668_v15, 6.0  ;;  %v5669_v55 = vmax.f32 %v5605_v21, 0.0 }
 0x2fa   : > { %v5606_v13 = vmul.f32 0.16666667, %v5542_v38  ;;  %v5543_v62 = vmul.f32 %v5479_v8, %v5287_v26  ;;  %v5289_v17 = vadd.f32 %v9453_v31, %v4331_v4  ;;  %v4334_v50 = vadd.f32 %v4186_v37, %v10501_v63  ;;  %v9691_v8 = vpop.f32.mrf.mxu1  ;;  %v10504_v4 = vld [vmem:[#allocation111_spill] sm:$0xff] }
 0x2fb   : > { %v5416_v56 = vmax.f32 %v5352_v41, 0.0  ;;  %v4335_v47 = vadd.f32 %v4188_v52, %v10502_v33  ;;  %5796 = vst [vmem:[%s8931_s12 + $0x150] sm:$0xff] %v5732_v34  ;;  %v5733_v51 = vmin.f32 %v5669_v55, 6.0  ;;  %v4192_v25 = vadd.f32 %v9528_v40, %v9526_v0  ;;  %v9689_v40 = vpop.f32.mrf.mxu0 }
 0x2fc   : > { %v5670_v3 = vmax.f32 %v5606_v13, 0.0  ;;  %v5607_v46 = vmul.f32 0.16666667, %v5543_v62  ;;  %v5353_v19 = vadd.f32 3.0, %v5289_v17  ;;  %v5290_v7 = vadd.f32 %v9441_v29, %v4334_v50  ;;  %v10505_v13 = vld [vmem:[#allocation112_spill] sm:$0xff] }
 0x2fd   : > { %v5480_v26 = vmin.f32 %v5416_v56, 6.0  ;;  %v5291_v11 = vadd.f32 %v9453_v31, %v4335_v47  ;;  %5797 = vst [vmem:[%s8931_s12 + $0x158] sm:$0xff] %v5733_v51  ;;  %v4338_v10 = vadd.f32 %v4192_v25, %v10503_v35  ;;  %v4194_v39 = vadd.f32 %v9536_v61, %v9534_v5  ;;  %v9703_v51 = vpop.f32.mrf.mxu0  ;;  %v10506_v25 = vld [vmem:[#allocation113_spill] sm:$0xff] }
 0x2fe   : > { %v5734_v57 = vmin.f32 %v5670_v3, 6.0  ;;  %v5671_v28 = vmax.f32 %v5607_v46, 0.0  ;;  %v5417_v21 = vmax.f32 %v5353_v19, 0.0  ;;  %v5354_v38 = vadd.f32 3.0, %v5290_v7 }
 0x2ff   : > { %v5544_v15 = vmul.f32 %v5480_v26, %v5288_v59  ;;  %v5355_v0 = vadd.f32 3.0, %v5291_v11  ;;  %v5292_v24 = vadd.f32 %v9441_v29, %v4338_v10  ;;  %v4339_v54 = vadd.f32 %v4194_v39, %v10504_v4 }
 0x300   : > { %5798 = vst [vmem:[%s8931_s12 + $0x170] sm:$0xff] %v5734_v57  ;;  %v5735_v41 = vmin.f32 %v5671_v28, 6.0  ;;  %v4196_v37 = vadd.f32 %v9547_v30, %v9545_v1  ;;  %v5481_v5 = vmin.f32 %v5417_v21, 6.0  ;;  %v5418_v61 = vmax.f32 %v5354_v38, 0.0  ;;  %v9705_v1 = vpop.f32.mrf.mxu1 }
 0x301   : > { %v5608_v52 = vmul.f32 0.16666667, %v5544_v15  ;;  %v5419_v59 = vmax.f32 %v5355_v0, 0.0  ;;  %v5356_v34 = vadd.f32 3.0, %v5292_v24  ;;  %v5293_v55 = vadd.f32 %v9453_v31, %v4339_v54  ;;  %v9713_v0 = vpop.f32.mrf.mxu0 }
 0x302   : > { %5799 = vst [vmem:[%s8931_s12 + $0x178] sm:$0xff] %v5735_v41  ;;  %v4342_v62 = vadd.f32 %v4196_v37, %v10505_v13  ;;  %v4198_v56 = vadd.f32 %v9557_v20, %v9555_v22  ;;  %v5545_v50 = vmul.f32 %v5481_v5, %v5289_v17  ;;  %v5482_v33 = vmin.f32 %v5418_v61, 6.0  ;;  %v9715_v41 = vpop.f32.mrf.mxu1  ;;  %v10507_v61 = vld [vmem:[#allocation114_spill] sm:$0xff] }
 0x303   : > { %v5672_v63 = vmax.f32 %v5608_v52, 0.0  ;;  %v5483_v47 = vmin.f32 %v5419_v59, 6.0  ;;  %v5420_v30 = vmax.f32 %v5356_v34, 0.0  ;;  %v5357_v3 = vadd.f32 3.0, %v5293_v55 }
 0x304   : > { %v5294_v46 = vadd.f32 %v9441_v29, %v4342_v62  ;;  %v4343_v26 = vadd.f32 %v4198_v56, %v10506_v25  ;;  %v5609_v57 = vmul.f32 0.16666667, %v5545_v50  ;;  %v5546_v28 = vmul.f32 %v5482_v33, %v5290_v7  ;;  %v10509_v50 = vld [vmem:[#allocation70_spill] sm:$0xff] }
 0x305   : > { %v5736_v19 = vmin.f32 %v5672_v63, 6.0  ;;  %v5547_v35 = vmul.f32 %v5483_v47, %v5291_v11  ;;  %v5484_v22 = vmin.f32 %v5420_v30, 6.0  ;;  %v5421_v20 = vmax.f32 %v5357_v3, 0.0  ;;  %v9722_v47 = vpop.f32.mrf.mxu0  ;;  %v9724_v30 = vpop.f32.mrf.mxu1 }
 0x306   : > { %v5358_v17 = vadd.f32 3.0, %v5294_v46  ;;  %v5295_v10 = vadd.f32 %v9453_v31, %v4343_v26  ;;  %v5673_v39 = vmax.f32 %v5609_v57, 0.0  ;;  %v5610_v15 = vmul.f32 0.16666667, %v5546_v28  ;;  %v10510_v57 = vld [vmem:[#allocation115_spill] sm:$0xff] }
 0x307   : > { %5800 = vst [vmem:[%s8931_s12 + $0x190] sm:$0xff] %v5736_v19  ;;  %v5611_v21 = vmul.f32 0.16666667, %v5547_v35  ;;  %v4202_v38 = vadd.f32 %v9567_v44, %v9565_v12  ;;  %v5548_v4 = vmul.f32 %v5484_v22, %v5292_v24  ;;  %v5485_v7 = vmin.f32 %v5421_v20, 6.0  ;;  %v10508_v24 = vld [vmem:[#allocation68_spill] sm:$0xff] }
 0x308   : > { %v5422_v11 = vmax.f32 %v5358_v17, 0.0  ;;  %v5359_v54 = vadd.f32 3.0, %v5295_v10  ;;  %v5737_v37 = vmin.f32 %v5673_v39, 6.0  ;;  %v5674_v52 = vmax.f32 %v5610_v15, 0.0 }
 0x309   : > { %v5675_v5 = vmax.f32 %v5611_v21, 0.0  ;;  %v4346_v59 = vadd.f32 %v4202_v38, %v10507_v61  ;;  %v5612_v34 = vmul.f32 0.16666667, %v5548_v4  ;;  %v5549_v13 = vmul.f32 %v5485_v7, %v5293_v55  ;;  %v10511_v38 = vld [vmem:[#allocation116_spill] sm:$0xff]  ;;  %v10512_v7 = vld [vmem:[#allocation117_spill] sm:$0xff] }
 0x30a   : > { %v5486_v62 = vmin.f32 %v5422_v11, 6.0  ;;  %v5423_v56 = vmax.f32 %v5359_v54, 0.0  ;;  %5801 = vst [vmem:[%s8931_s12 + $0x198] sm:$0xff] %v5737_v37  ;;  %v5738_v12 = vmin.f32 %v5674_v52, 6.0  ;;  %v4204_v33 = vadd.f32 %v10509_v50, %v10508_v24  ;;  %v9736_v54 = vpop.f32.mrf.mxu0  ;;  %v9738_v37 = vpop.f32.mrf.mxu1 }
 0x30b   : > { %v5739_v44 = vmin.f32 %v5675_v5, 6.0  ;;  %v5296_v63 = vadd.f32 %v9441_v29, %v4346_v59  ;;  %v5676_v3 = vmax.f32 %v5612_v34, 0.0  ;;  %v5613_v25 = vmul.f32 0.16666667, %v5549_v13  ;;  %v10513_v13 = vld [vmem:[#allocation118_spill] sm:$0xff] }
 0x30c   : > { %v5550_v26 = vmul.f32 %v5486_v62, %v5294_v46  ;;  %v5487_v19 = vmin.f32 %v5423_v56, 6.0  ;;  %5802 = vst [vmem:[%s8931_s12 + $0x1b0] sm:$0xff] %v5738_v12  ;;  %v4347_v28 = vadd.f32 %v4204_v33, %v10510_v57  ;;  %v4206_v35 = vadd.f32 %v9585_v18, %v9583_v45  ;;  %v9751_v50 = vpop.f32.mrf.mxu1 }
 0x30d   : > { %5803 = vst [vmem:[%s8931_s12 + $0x1b8] sm:$0xff] %v5739_v44  ;;  %v5360_v55 = vadd.f32 3.0, %v5296_v63  ;;  %v4208_v22 = vadd.f32 %v9595_v27, %v9593_v23  ;;  %v5740_v20 = vmin.f32 %v5676_v3, 6.0  ;;  %v5677_v17 = vmax.f32 %v5613_v25, 0.0  ;;  %v10514_v25 = vld [vmem:[#allocation119_spill] sm:$0xff] }
 0x30e   : > { %v5614_v39 = vmul.f32 0.16666667, %v5550_v26  ;;  %v5551_v15 = vmul.f32 %v5487_v19, %v5295_v10  ;;  %v5297_v46 = vadd.f32 %v9453_v31, %v4347_v28  ;;  %v4350_v4 = vadd.f32 %v4206_v35, %v10511_v38  ;;  %v10515_v35 = vld [vmem:[#allocation120_spill] sm:$0xff] }
 0x30f   : > { %v5424_v21 = vmax.f32 %v5360_v55, 0.0  ;;  %v4351_v11 = vadd.f32 %v4208_v22, %v10512_v7  ;;  %5804 = vst [vmem:[%s8931_s12 + $0x1d0] sm:$0xff] %v5740_v20  ;;  %v5741_v45 = vmin.f32 %v5677_v17, 6.0  ;;  %v4212_v27 = vadd.f32 %v9604_v14, %v9602_v60  ;;  %v9749_v14 = vpop.f32.mrf.mxu0 }
 0x310   : > { %v5678_v18 = vmax.f32 %v5614_v39, 0.0  ;;  %v5615_v23 = vmul.f32 0.16666667, %v5551_v15  ;;  %v5361_v52 = vadd.f32 3.0, %v5297_v46  ;;  %v5298_v5 = vadd.f32 %v9441_v29, %v4350_v4 }
 0x311   : > { %v5488_v10 = vmin.f32 %v5424_v21, 6.0  ;;  %v5299_v61 = vadd.f32 %v9453_v31, %v4351_v11  ;;  %5805 = vst [vmem:[%s8931_s12 + $0x1d8] sm:$0xff] %v5741_v45  ;;  %v4354_v62 = vadd.f32 %v4212_v27, %v10513_v13  ;;  %v4214_v56 = vadd.f32 %v9618_v6, %v9616_v9  ;;  %v9763_v38 = vpop.f32.mrf.mxu0  ;;  %v10516_v11 = vld [vmem:[#allocation121_spill] sm:$0xff] }
 0x312   : > { %v5742_v59 = vmin.f32 %v5678_v18, 6.0  ;;  %v5679_v34 = vmax.f32 %v5615_v23, 0.0  ;;  %v5425_v44 = vmax.f32 %v5361_v52, 0.0  ;;  %v5362_v24 = vadd.f32 3.0, %v5298_v5 }
 0x313   : > { %v5552_v12 = vmul.f32 %v5488_v10, %v5296_v63  ;;  %v5363_v60 = vadd.f32 3.0, %v5299_v61  ;;  %v5300_v3 = vadd.f32 %v9441_v29, %v4354_v62  ;;  %v4355_v26 = vadd.f32 %v4214_v56, %v10514_v25  ;;  %v9773_v56 = vpop.f32.mrf.mxu0 }
 0x314   : > { %5806 = vst [vmem:[%s8931_s12 + $0x1f0] sm:$0xff] %v5742_v59  ;;  %v5743_v33 = vmin.f32 %v5679_v34, 6.0  ;;  %v4216_v19 = vadd.f32 %v9631_v16, %v9629_v58  ;;  %v5489_v9 = vmin.f32 %v5425_v44, 6.0  ;;  %v5426_v6 = vmax.f32 %v5362_v24, 0.0  ;;  %v9765_v58 = vpop.f32.mrf.mxu1 }
 0x315   : > { %v5616_v55 = vmul.f32 0.16666667, %v5552_v12  ;;  %v5427_v63 = vmax.f32 %v5363_v60, 0.0  ;;  %v5364_v57 = vadd.f32 3.0, %v5300_v3  ;;  %v5301_v28 = vadd.f32 %v9453_v31, %v4355_v26  ;;  %v10517_v26 = vld [vmem:[#allocation122_spill] sm:$0xff] }
 0x316   : > { %5807 = vst [vmem:[%s8931_s12 + $0x1f8] sm:$0xff] %v5743_v33  ;;  %v4358_v22 = vadd.f32 %v4216_v19, %v10515_v35  ;;  %v4218_v20 = vadd.f32 %v9645_v42, %v9643_v32  ;;  %v5553_v39 = vmul.f32 %v5489_v9, %v5297_v46  ;;  %v5490_v15 = vmin.f32 %v5426_v6, 6.0  ;;  %v9775_v12 = vpop.f32.mrf.mxu1  ;;  %v9782_v35 = vpop.f32.mrf.mxu0 }
 0x317   : > { %v5680_v17 = vmax.f32 %v5616_v55, 0.0  ;;  %v5491_v21 = vmin.f32 %v5427_v63, 6.0  ;;  %v5428_v16 = vmax.f32 %v5364_v57, 0.0  ;;  %v5365_v4 = vadd.f32 3.0, %v5301_v28 }
 0x318   : > { %v5302_v7 = vadd.f32 %v9441_v29, %v4358_v22  ;;  %v4359_v45 = vadd.f32 %v4218_v20, %v10516_v11  ;;  %v5617_v23 = vmul.f32 0.16666667, %v5553_v39  ;;  %v5554_v27 = vmul.f32 %v5490_v15, %v5298_v5  ;;  %v9784_v22 = vpop.f32.mrf.mxu1 }
 0x319   : > { %v5744_v18 = vmin.f32 %v5680_v17, 6.0  ;;  %v5555_v10 = vmul.f32 %v5491_v21, %v5299_v61  ;;  %v5492_v32 = vmin.f32 %v5428_v16, 6.0  ;;  %v5429_v42 = vmax.f32 %v5365_v4, 0.0  ;;  %v10518_v21 = vld [vmem:[#allocation123_spill] sm:$0xff] }
 0x31a   : > { %v5366_v46 = vadd.f32 3.0, %v5302_v7  ;;  %v5303_v52 = vadd.f32 %v9453_v31, %v4359_v45  ;;  %v5681_v59 = vmax.f32 %v5617_v23, 0.0  ;;  %v5618_v34 = vmul.f32 0.16666667, %v5554_v27  ;;  %v10519_v27 = vld [vmem:[#allocation124_spill] sm:$0xff] }
 0x31b   : > { %5808 = vst [vmem:[%s8931_s12 + $0x210] sm:$0xff] %v5744_v18  ;;  %v5619_v13 = vmul.f32 0.16666667, %v5555_v10  ;;  %v4222_v62 = vadd.f32 %v9655_v53, %v9653_v49  ;;  %v5556_v44 = vmul.f32 %v5492_v32, %v5300_v3  ;;  %v5493_v5 = vmin.f32 %v5429_v42, 6.0  ;;  %v10520_v32 = vld [vmem:[#allocation125_spill] sm:$0xff] }
 0x31c   : > { %v5430_v61 = vmax.f32 %v5366_v46, 0.0  ;;  %v5367_v24 = vadd.f32 3.0, %v5303_v52  ;;  %v5745_v60 = vmin.f32 %v5681_v59, 6.0  ;;  %v5682_v33 = vmax.f32 %v5618_v34, 0.0  ;;  %v9796_v46 = vpop.f32.mrf.mxu0  ;;  %v9798_v59 = vpop.f32.mrf.mxu1 }
 0x31d   : > { %v5683_v25 = vmax.f32 %v5619_v13, 0.0  ;;  %v4362_v19 = vadd.f32 %v4222_v62, %v10517_v26  ;;  %v5620_v55 = vmul.f32 0.16666667, %v5556_v44  ;;  %v5557_v9 = vmul.f32 %v5493_v5, %v5301_v28 }
 0x31e   : > { %v5494_v6 = vmin.f32 %v5430_v61, 6.0  ;;  %v5431_v63 = vmax.f32 %v5367_v24, 0.0  ;;  %5809 = vst [vmem:[%s8931_s12 + $0x218] sm:$0xff] %v5745_v60  ;;  %v5746_v49 = vmin.f32 %v5682_v33, 6.0  ;;  %v4224_v3 = vadd.f32 %v9664_v36, %v9662_v2  ;;  %v10521_v61 = vld [vmem:[#allocation126_spill] sm:$0xff] }
 0x31f   : > { %v5747_v53 = vmin.f32 %v5683_v25, 6.0  ;;  %v5304_v57 = vadd.f32 %v9441_v29, %v4362_v19  ;;  %v5684_v20 = vmax.f32 %v5620_v55, 0.0  ;;  %v5621_v17 = vmul.f32 0.16666667, %v5557_v9  ;;  %v9811_v19 = vpop.f32.mrf.mxu1 }
 0x320   : > { %v5558_v39 = vmul.f32 %v5494_v6, %v5302_v7  ;;  %v5495_v15 = vmin.f32 %v5431_v63, 6.0  ;;  %5810 = vst [vmem:[%s8931_s12 + $0x230] sm:$0xff] %v5746_v49  ;;  %v4363_v16 = vadd.f32 %v4224_v3, %v10518_v21  ;;  %v4226_v4 = vadd.f32 %v9678_v43, %v9676_v48  ;;  %v10522_v6 = vld [vmem:[#allocation127_spill] sm:$0xff] }
 0x321   : > { %5811 = vst [vmem:[%s8931_s12 + $0x238] sm:$0xff] %v5747_v53  ;;  %v5368_v28 = vadd.f32 3.0, %v5304_v57  ;;  %v4228_v2 = vadd.f32 %v9691_v8, %v9689_v40  ;;  %v5748_v36 = vmin.f32 %v5684_v20, 6.0  ;;  %v5685_v11 = vmax.f32 %v5621_v17, 0.0  ;;  %v10523_v17 = vld [vmem:[#allocation128_spill] sm:$0xff] }
 0x322   : > { %v5622_v45 = vmul.f32 0.16666667, %v5558_v39  ;;  %v5559_v18 = vmul.f32 %v5495_v15, %v5303_v52  ;;  %v5305_v7 = vadd.f32 %v9453_v31, %v4363_v16  ;;  %v4366_v10 = vadd.f32 %v4226_v4, %v10519_v27 }
 0x323   : > { %v5432_v23 = vmax.f32 %v5368_v28, 0.0  ;;  %v4367_v42 = vadd.f32 %v4228_v2, %v10520_v32  ;;  %5812 = vst [vmem:[%s8931_s12 + $0x250] sm:$0xff] %v5748_v36  ;;  %v5749_v48 = vmin.f32 %v5685_v11, 6.0  ;;  %v4232_v8 = vadd.f32 %v9705_v1, %v9703_v51  ;;  %v9809_v1 = vpop.f32.mrf.mxu0 }
 0x324   : > { %v5686_v43 = vmax.f32 %v5622_v45, 0.0  ;;  %v5623_v40 = vmul.f32 0.16666667, %v5559_v18  ;;  %v5369_v34 = vadd.f32 3.0, %v5305_v7  ;;  %v5306_v13 = vadd.f32 %v9441_v29, %v4366_v10  ;;  %v10524_v45 = vld [vmem:[#allocation129_spill] sm:$0xff] }
 0x325   : > { %v5496_v52 = vmin.f32 %v5432_v23, 6.0  ;;  %v5307_v62 = vadd.f32 %v9453_v31, %v4367_v42  ;;  %5813 = vst [vmem:[%s8931_s12 + $0x258] sm:$0xff] %v5749_v48  ;;  %v4370_v24 = vadd.f32 %v4232_v8, %v10521_v61  ;;  %v4234_v60 = vadd.f32 %v9715_v41, %v9713_v0  ;;  %v9823_v2 = vpop.f32.mrf.mxu0 }
 0x326   : > { %v5750_v44 = vmin.f32 %v5686_v43, 6.0  ;;  %v5687_v5 = vmax.f32 %v5623_v40, 0.0  ;;  %v5433_v25 = vmax.f32 %v5369_v34, 0.0  ;;  %v5370_v26 = vadd.f32 3.0, %v5306_v13 }
 0x327   : > { %v5560_v33 = vmul.f32 %v5496_v52, %v5304_v57  ;;  %v5371_v51 = vadd.f32 3.0, %v5307_v62  ;;  %v5308_v9 = vadd.f32 %v9441_v29, %v4370_v24  ;;  %v4371_v63 = vadd.f32 %v4234_v60, %v10522_v6  ;;  %v9833_v52 = vpop.f32.mrf.mxu0 }
 0x328   : > { %5814 = vst [vmem:[%s8931_s12 + $0x270] sm:$0xff] %v5750_v44  ;;  %v5751_v55 = vmin.f32 %v5687_v5, 6.0  ;;  %v4236_v49 = vadd.f32 %v9724_v30, %v9722_v47  ;;  %v5497_v0 = vmin.f32 %v5433_v25, 6.0  ;;  %v5434_v41 = vmax.f32 %v5370_v26, 0.0  ;;  %v9825_v47 = vpop.f32.mrf.mxu1 }
 0x329   : > { %v5624_v53 = vmul.f32 0.16666667, %v5560_v33  ;;  %v5435_v57 = vmax.f32 %v5371_v51, 0.0  ;;  %v5372_v3 = vadd.f32 3.0, %v5308_v9  ;;  %v5309_v20 = vadd.f32 %v9453_v31, %v4371_v63  ;;  %v10525_v33 = vld [vmem:[#allocation130_spill] sm:$0xff] }
 0x32a   : > { %5815 = vst [vmem:[%s8931_s12 + $0x278] sm:$0xff] %v5751_v55  ;;  %v4374_v39 = vadd.f32 %v4236_v49, %v10523_v17  ;;  %v4238_v15 = vadd.f32 %v9738_v37, %v9736_v54  ;;  %v5561_v21 = vmul.f32 %v5497_v0, %v5305_v7  ;;  %v5498_v16 = vmin.f32 %v5434_v41, 6.0  ;;  %v9835_v34 = vpop.f32.mrf.mxu1  ;;  %v9842_v49 = vpop.f32.mrf.mxu0  ;;  %v10526_v17 = vld [vmem:[#allocation131_spill] sm:$0xff] }
 0x32b   : > { %v5688_v28 = vmax.f32 %v5624_v53, 0.0  ;;  %v5499_v4 = vmin.f32 %v5435_v57, 6.0  ;;  %v5436_v30 = vmax.f32 %v5372_v3, 0.0  ;;  %v5373_v36 = vadd.f32 3.0, %v5309_v20 }
 0x32c   : > { %v5310_v11 = vadd.f32 %v9441_v29, %v4374_v39  ;;  %v4375_v18 = vadd.f32 %v4238_v15, %v10524_v45  ;;  %v5625_v27 = vmul.f32 0.16666667, %v5561_v21  ;;  %v5562_v10 = vmul.f32 %v5498_v16, %v5306_v13  ;;  %v9844_v53 = vpop.f32.mrf.mxu1  ;;  %v10528_v45 = vld [vmem:[#allocation133_spill] sm:$0xff] }
 0x32d   : > { %v5752_v23 = vmin.f32 %v5688_v28, 6.0  ;;  %v5563_v32 = vmul.f32 %v5499_v4, %v5307_v62  ;;  %v5500_v54 = vmin.f32 %v5436_v30, 6.0  ;;  %v5437_v37 = vmax.f32 %v5373_v36, 0.0  ;;  %v10527_v36 = vld [vmem:[#allocation132_spill] sm:$0xff] }
 0x32e   : > { %v5374_v7 = vadd.f32 3.0, %v5310_v11  ;;  %v5311_v42 = vadd.f32 %v9453_v31, %v4375_v18  ;;  %v5689_v48 = vmax.f32 %v5625_v27, 0.0  ;;  %v5626_v43 = vmul.f32 0.16666667, %v5562_v10  ;;  %v9858_v27 = vpop.f32.mrf.mxu1 }
 0x32f   : > { %5816 = vst [vmem:[%s8931_s12 + $0x290] sm:$0xff] %v5752_v23  ;;  %v5627_v40 = vmul.f32 0.16666667, %v5563_v32  ;;  %v4242_v8 = vadd.f32 %v9751_v50, %v9749_v14  ;;  %v5564_v44 = vmul.f32 %v5500_v54, %v5308_v9  ;;  %v5501_v13 = vmin.f32 %v5437_v37, 6.0  ;;  %v9856_v23 = vpop.f32.mrf.mxu0 }
 0x330   : > { %v5438_v62 = vmax.f32 %v5374_v7, 0.0  ;;  %v5375_v5 = vadd.f32 3.0, %v5311_v42  ;;  %v5753_v61 = vmin.f32 %v5689_v48, 6.0  ;;  %v5690_v24 = vmax.f32 %v5626_v43, 0.0  ;;  %v10529_v48 = vld [vmem:[#allocation134_spill] sm:$0xff] }
 0x331   : > { %v5691_v60 = vmax.f32 %v5627_v40, 0.0  ;;  %v4378_v25 = vadd.f32 %v4242_v8, %v10525_v33  ;;  %v5628_v26 = vmul.f32 0.16666667, %v5564_v44  ;;  %v5565_v51 = vmul.f32 %v5501_v13, %v5309_v20 }
 0x332   : > { %v5502_v55 = vmin.f32 %v5438_v62, 6.0  ;;  %v5439_v6 = vmax.f32 %v5375_v5, 0.0  ;;  %5817 = vst [vmem:[%s8931_s12 + $0x298] sm:$0xff] %v5753_v61  ;;  %v5754_v14 = vmin.f32 %v5690_v24, 6.0  ;;  %v4244_v9 = vadd.f32 %v9765_v58, %v9763_v38  ;;  %v9871_v62 = vpop.f32.mrf.mxu1  ;;  %v10530_v24 = vld [vmem:[#allocation135_spill] sm:$0xff] }
 0x333   : > { %v5755_v50 = vmin.f32 %v5691_v60, 6.0  ;;  %v5312_v63 = vadd.f32 %v9441_v29, %v4378_v25  ;;  %v5692_v0 = vmax.f32 %v5628_v26, 0.0  ;;  %v5629_v41 = vmul.f32 0.16666667, %v5565_v51 }
 0x334   : > { %v5566_v57 = vmul.f32 %v5502_v55, %v5310_v11  ;;  %v5503_v3 = vmin.f32 %v5439_v6, 6.0  ;;  %5818 = vst [vmem:[%s8931_s12 + $0x2b0] sm:$0xff] %v5754_v14  ;;  %v4379_v39 = vadd.f32 %v4244_v9, %v10526_v17  ;;  %v4246_v15 = vadd.f32 %v9775_v12, %v9773_v56  ;;  %v10531_v6 = vld [vmem:[#allocation136_spill] sm:$0xff]  ;;  %v10532_v17 = vld [vmem:[#allocation137_spill] sm:$0xff] }
 0x335   : > { %5819 = vst [vmem:[%s8931_s12 + $0x2b8] sm:$0xff] %v5755_v50  ;;  %v5376_v20 = vadd.f32 3.0, %v5312_v63  ;;  %v4248_v38 = vadd.f32 %v9784_v22, %v9782_v35  ;;  %v5756_v58 = vmin.f32 %v5692_v0, 6.0  ;;  %v5693_v28 = vmax.f32 %v5629_v41, 0.0 }
 0x336   : > { %v5630_v21 = vmul.f32 0.16666667, %v5566_v57  ;;  %v5567_v16 = vmul.f32 %v5503_v3, %v5311_v42  ;;  %v5313_v30 = vadd.f32 %v9453_v31, %v4379_v39  ;;  %v4382_v11 = vadd.f32 %v4246_v15, %v10527_v36 }
 0x337   : > { %v5440_v4 = vmax.f32 %v5376_v20, 0.0  ;;  %v4383_v18 = vadd.f32 %v4248_v38, %v10528_v45  ;;  %5820 = vst [vmem:[%s8931_s12 + $0x2d0] sm:$0xff] %v5756_v58  ;;  %v5757_v56 = vmin.f32 %v5693_v28, 6.0  ;;  %v4252_v22 = vadd.f32 %v9798_v59, %v9796_v46  ;;  %v9869_v59 = vpop.f32.mrf.mxu0 }
 0x338   : > { %v5694_v12 = vmax.f32 %v5630_v21, 0.0  ;;  %v5631_v35 = vmul.f32 0.16666667, %v5567_v16  ;;  %v5377_v32 = vadd.f32 3.0, %v5313_v30  ;;  %v5314_v54 = vadd.f32 %v9441_v29, %v4382_v11 }
 0x339   : > { %v5504_v10 = vmin.f32 %v5440_v4, 6.0  ;;  %v5315_v37 = vadd.f32 %v9453_v31, %v4383_v18  ;;  %5821 = vst [vmem:[%s8931_s12 + $0x2d8] sm:$0xff] %v5757_v56  ;;  %v4386_v43 = vadd.f32 %v4252_v22, %v10529_v48  ;;  %v4254_v40 = vadd.f32 %v9811_v19, %v9809_v1  ;;  %v4074_v57 = vpop.f32.mrf.mxu0 }
 0x33a   : > { %v5758_v7 = vmin.f32 %v5694_v12, 6.0  ;;  %v5695_v42 = vmax.f32 %v5631_v35, 0.0  ;;  %v5441_v44 = vmax.f32 %v5377_v32, 0.0  ;;  %v5378_v13 = vadd.f32 3.0, %v5314_v54 }
 0x33b   : > { %v5568_v8 = vmul.f32 %v5504_v10, %v5312_v63  ;;  %v5379_v46 = vadd.f32 3.0, %v5315_v37  ;;  %v5316_v61 = vadd.f32 %v9441_v29, %v4386_v43  ;;  %v4387_v60 = vadd.f32 %v4254_v40, %v10530_v24  ;;  %v4078_v45 = vpop.f32.mrf.mxu0 }
 0x33c   : > { %5822 = vst [vmem:[%s8931_s12 + $0x2f0] sm:$0xff] %v5758_v7  ;;  %v5759_v5 = vmin.f32 %v5695_v42, 6.0  ;;  %v4256_v33 = vadd.f32 %v9825_v47, %v9823_v2  ;;  %v5505_v1 = vmin.f32 %v5441_v44, 6.0  ;;  %v5442_v19 = vmax.f32 %v5378_v13, 0.0  ;;  %v4267_v2 = vpop.f32.mrf.mxu1 }
 0x33d   : > { %v5632_v25 = vmul.f32 0.16666667, %v5568_v8  ;;  %v5443_v26 = vmax.f32 %v5379_v46, 0.0  ;;  %v5380_v51 = vadd.f32 3.0, %v5316_v61  ;;  %v5317_v55 = vadd.f32 %v9453_v31, %v4387_v60  ;;  %v4080_v13 = vpop.f32.mrf.mxu0 }
 0x33e   : > { %5823 = vst [vmem:[%s8931_s12 + $0x2f8] sm:$0xff] %v5759_v5  ;;  %v4390_v14 = vadd.f32 %v4256_v33, %v10531_v6  ;;  %v4258_v50 = vadd.f32 %v9835_v34, %v9833_v52  ;;  %v5569_v9 = vmul.f32 %v5505_v1, %v5313_v30  ;;  %v5506_v0 = vmin.f32 %v5442_v19, 6.0  ;;  %v4271_v18 = vpop.f32.mrf.mxu1 }
 0x33f   : > { %v5696_v63 = vmax.f32 %v5632_v25, 0.0  ;;  %v5507_v41 = vmin.f32 %v5443_v26, 6.0  ;;  %v5444_v47 = vmax.f32 %v5380_v51, 0.0  ;;  %v5381_v3 = vadd.f32 3.0, %v5317_v55  ;;  %v10534_v25 = vld [vmem:[#allocation139_spill] sm:$0xff] }
 0x340   : > { %v5318_v20 = vadd.f32 %v9441_v29, %v4390_v14  ;;  %v4391_v39 = vadd.f32 %v4258_v50, %v10532_v17  ;;  %v5633_v38 = vmul.f32 0.16666667, %v5569_v9  ;;  %v5570_v58 = vmul.f32 %v5506_v0, %v5314_v54  ;;  %v4273_v46 = vpop.f32.mrf.mxu1  ;;  %v10535_v50 = vld [vmem:[#allocation140_spill] sm:$0xff]  ;;  %v10536_v9 = vld [vmem:[#allocation141_spill] sm:$0xff] }
 0x341   : > { %v5760_v15 = vmin.f32 %v5696_v63, 6.0  ;;  %v5571_v28 = vmul.f32 %v5507_v41, %v5315_v37  ;;  %v5508_v21 = vmin.f32 %v5444_v47, 6.0  ;;  %v5445_v16 = vmax.f32 %v5381_v3, 0.0  ;;  %v10533_v37 = vld [vmem:[#allocation138_spill] sm:$0xff]  ;;  %v4082_v41 = vpop.f32.mrf.mxu0 }
 0x342   : > { %v5382_v52 = vadd.f32 3.0, %v5318_v20  ;;  %v5319_v34 = vadd.f32 %v9453_v31, %v4391_v39  ;;  %v5697_v4 = vmax.f32 %v5633_v38, 0.0  ;;  %v5634_v30 = vmul.f32 0.16666667, %v5570_v58  ;;  %v4275_v47 = vpop.f32.mrf.mxu1  ;;  %v10537_v58 = vld [vmem:[#allocation142_spill] sm:$0xff] }
 0x343   : > { %5824 = vst [vmem:[%s8931_s12 + $0x310] sm:$0xff] %v5760_v15  ;;  %v5635_v36 = vmul.f32 0.16666667, %v5571_v28  ;;  %v4262_v11 = vadd.f32 %v9844_v53, %v9842_v49  ;;  %v5572_v56 = vmul.f32 %v5508_v21, %v5316_v61  ;;  %v5509_v12 = vmin.f32 %v5445_v16, 6.0 }
 0x344   : > { %v5446_v35 = vmax.f32 %v5382_v52, 0.0  ;;  %v5383_v22 = vadd.f32 3.0, %v5319_v34  ;;  %v5761_v10 = vmin.f32 %v5697_v4, 6.0  ;;  %v5698_v32 = vmax.f32 %v5634_v30, 0.0  ;;  %v4084_v30 = vpop.f32.mrf.mxu0 }
 0x345   : > { %v5699_v54 = vmax.f32 %v5635_v36, 0.0  ;;  %v4394_v7 = vadd.f32 %v4262_v11, %v10533_v37  ;;  %v5636_v42 = vmul.f32 0.16666667, %v5572_v56  ;;  %v5573_v48 = vmul.f32 %v5509_v12, %v5317_v55  ;;  %v4277_v36 = vpop.f32.mrf.mxu1 }
 0x346   : > { %v5510_v43 = vmin.f32 %v5446_v35, 6.0  ;;  %v5447_v40 = vmax.f32 %v5383_v22, 0.0  ;;  %5825 = vst [vmem:[%s8931_s12 + $0x318] sm:$0xff] %v5761_v10  ;;  %v5762_v8 = vmin.f32 %v5698_v32, 6.0  ;;  %v4264_v44 = vadd.f32 %v9858_v27, %v9856_v23 }
 0x347   : > { %v5763_v49 = vmin.f32 %v5699_v54, 6.0  ;;  %v5320_v53 = vadd.f32 %v9441_v29, %v4394_v7  ;;  %v5700_v5 = vmax.f32 %v5636_v42, 0.0  ;;  %v5637_v61 = vmul.f32 0.16666667, %v5573_v48  ;;  %v10539_v7 = vld [vmem:[#allocation144_spill] sm:$0xff] }
 0x348   : > { %v5574_v24 = vmul.f32 %v5510_v43, %v5318_v20  ;;  %v5511_v60 = vmin.f32 %v5447_v40, 6.0  ;;  %5826 = vst [vmem:[%s8931_s12 + $0x330] sm:$0xff] %v5762_v8  ;;  %v4395_v1 = vadd.f32 %v4264_v44, %v10534_v25  ;;  %v4266_v19 = vadd.f32 %v9871_v62, %v9869_v59 }
 0x349   : > { %5827 = vst [vmem:[%s8931_s12 + $0x338] sm:$0xff] %v5763_v49  ;;  %v5384_v33 = vadd.f32 3.0, %v5320_v53  ;;  %v4268_v26 = vadd.f32 %v4267_v2, %v4074_v57  ;;  %v5764_v51 = vmin.f32 %v5700_v5, 6.0  ;;  %v5701_v55 = vmax.f32 %v5637_v61, 0.0 }
 0x34a   : > { %v5638_v6 = vmul.f32 0.16666667, %v5574_v24  ;;  %v5575_v23 = vmul.f32 %v5511_v60, %v5319_v34  ;;  %v5321_v14 = vadd.f32 %v9453_v31, %v4395_v1  ;;  %v4398_v63 = vadd.f32 %v4266_v19, %v10535_v50 }
 0x34b   : > { %v5448_v27 = vmax.f32 %v5384_v33, 0.0  ;;  %v4399_v0 = vadd.f32 %v4268_v26, %v10536_v9  ;;  %5828 = vst [vmem:[%s8931_s12 + $0x350] sm:$0xff] %v5764_v51  ;;  %v5765_v3 = vmin.f32 %v5701_v55, 6.0  ;;  %v4272_v59 = vadd.f32 %v4271_v18, %v4078_v45  ;;  %v10538_v18 = vld [vmem:[#allocation143_spill] sm:$0xff] }
 0x34c   : > { %v5702_v20 = vmax.f32 %v5638_v6, 0.0  ;;  %v5639_v17 = vmul.f32 0.16666667, %v5575_v23  ;;  %v5385_v57 = vadd.f32 3.0, %v5321_v14  ;;  %v5322_v2 = vadd.f32 %v9441_v29, %v4398_v63 }
 0x34d   : > { %v5512_v62 = vmin.f32 %v5448_v27, 6.0  ;;  %v5323_v39 = vadd.f32 %v9453_v31, %v4399_v0  ;;  %5829 = vst [vmem:[%s8931_s12 + $0x358] sm:$0xff] %v5765_v3  ;;  %v4402_v28 = vadd.f32 %v4272_v59, %v10537_v58  ;;  %v4274_v21 = vadd.f32 %v4273_v46, %v4080_v13  ;;  %v10540_v46 = vld [vmem:[#allocation145_spill] sm:$0xff] }
 0x34e   : > { %v5766_v15 = vmin.f32 %v5702_v20, 6.0  ;;  %v5703_v38 = vmax.f32 %v5639_v17, 0.0  ;;  %v5449_v52 = vmax.f32 %v5385_v57, 0.0  ;;  %v5386_v34 = vadd.f32 3.0, %v5322_v2 }
 0x34f   : > { %v5576_v16 = vmul.f32 %v5512_v62, %v5320_v53  ;;  %v5387_v4 = vadd.f32 3.0, %v5323_v39  ;;  %v5324_v45 = vadd.f32 %v9441_v29, %v4402_v28  ;;  %v4403_v56 = vadd.f32 %v4274_v21, %v10538_v18  ;;  %v5875_v18 = vld [vmem:[%s8931_s12 + $0x28] sm:$0xff] (%p7491_p3) }
 0x350   : > { %5830 = vst [vmem:[%s8931_s12 + $0x370] sm:$0xff] %v5766_v15  ;;  %v5767_v11 = vmin.f32 %v5703_v38, 6.0  ;;  %v4276_v12 = vadd.f32 %v4275_v47, %v4082_v41  ;;  %v5513_v22 = vmin.f32 %v5449_v52, 6.0  ;;  %v5450_v10 = vmax.f32 %v5386_v34, 0.0  ;;  %5876 = vst [vmem:[%s9933_s19 + $0x28] sm:$0xff] (%p7491_p3), %v5875_v18  ;;  %v6003_v18 = vld [vmem:[%s8931_s12 + $0x228] sm:$0xff] (%p7491_p3) }
 0x351   : > { %v5640_v35 = vmul.f32 0.16666667, %v5576_v16  ;;  %v5451_v32 = vmax.f32 %v5387_v4, 0.0  ;;  %v5388_v54 = vadd.f32 3.0, %v5324_v45  ;;  %v5325_v37 = vadd.f32 %v9453_v31, %v4403_v56  ;;  %v5865_v4 = vld [vmem:[%s8931_s12] sm:$0xff] (%p7491_p3)  ;;  %v5877_v56 = vld [vmem:[%s8931_s12 + $0x30] sm:$0xff] (%p7491_p3) }
 0x352   : > { %5831 = vst [vmem:[%s8931_s12 + $0x378] sm:$0xff] %v5767_v11  ;;  %v4406_v42 = vadd.f32 %v4276_v12, %v10539_v7  ;;  %v4278_v48 = vadd.f32 %v4277_v36, %v4084_v30  ;;  %v5577_v40 = vmul.f32 %v5513_v22, %v5321_v14  ;;  %v5514_v8 = vmin.f32 %v5450_v10, 6.0  ;;  %v5867_v30 = vld [vmem:[%s8931_s12 + $0x8] sm:$0xff] (%p7491_p3)  ;;  %v5869_v36 = vld [vmem:[%s8931_s12 + $0x10] sm:$0xff] (%p7491_p3)  ;;  %v5871_v11 = vld [vmem:[%s8931_s12 + $0x18] sm:$0xff] (%p7491_p3) }
 0x353   : > { %v5704_v43 = vmax.f32 %v5640_v35, 0.0  ;;  %v5515_v49 = vmin.f32 %v5451_v32, 6.0  ;;  %v5452_v53 = vmax.f32 %v5388_v54, 0.0  ;;  %v5389_v44 = vadd.f32 3.0, %v5325_v37  ;;  %5866 = vst [vmem:[%s9933_s19] sm:$0xff] (%p7491_p3), %v5865_v4  ;;  %5868 = vst [vmem:[%s9933_s19 + $0x8] sm:$0xff] (%p7491_p3), %v5867_v30  ;;  %v5879_v12 = vld [vmem:[%s8931_s12 + $0x38] sm:$0xff] (%p7491_p3) }
 0x354   : > { %v5326_v13 = vadd.f32 %v9441_v29, %v4406_v42  ;;  %v4407_v5 = vadd.f32 %v4278_v48, %v10540_v46  ;;  %v5641_v24 = vmul.f32 0.16666667, %v5577_v40  ;;  %v5578_v60 = vmul.f32 %v5514_v8, %v5322_v2  ;;  %5870 = vst [vmem:[%s9933_s19 + $0x10] sm:$0xff] (%p7491_p3), %v5869_v36  ;;  %5872 = vst [vmem:[%s9933_s19 + $0x18] sm:$0xff] (%p7491_p3), %v5871_v11  ;;  %v5881_v35 = vld [vmem:[%s8931_s12 + $0x40] sm:$0xff] (%p7491_p3)  ;;  %v5883_v22 = vld [vmem:[%s8931_s12 + $0x48] sm:$0xff] (%p7491_p3) }
 0x355   : > { %v5768_v61 = vmin.f32 %v5704_v43, 6.0  ;;  %v5579_v33 = vmul.f32 %v5515_v49, %v5323_v39  ;;  %v5516_v25 = vmin.f32 %v5452_v53, 6.0  ;;  %v5453_v1 = vmax.f32 %v5389_v44, 0.0  ;;  %5878 = vst [vmem:[%s9933_s19 + $0x30] sm:$0xff] (%p7491_p3), %v5877_v56  ;;  %5880 = vst [vmem:[%s9933_s19 + $0x38] sm:$0xff] (%p7491_p3), %v5879_v12  ;;  %v5885_v10 = vld [vmem:[%s8931_s12 + $0x50] sm:$0xff] (%p7491_p3) }
 0x356   : > { %v5390_v19 = vadd.f32 3.0, %v5326_v13  ;;  %v5327_v26 = vadd.f32 %v9453_v31, %v4407_v5  ;;  %v5705_v51 = vmax.f32 %v5641_v24, 0.0  ;;  %v5642_v55 = vmul.f32 0.16666667, %v5578_v60  ;;  %5882 = vst [vmem:[%s9933_s19 + $0x80] sm:$0xff] (%p7491_p3), %v5881_v35  ;;  %v5887_v32 = vld [vmem:[%s8931_s12 + $0x58] sm:$0xff] (%p7491_p3) }
 0x357   : > { %5832 = vst [vmem:[%s8931_s12 + $0x390] sm:$0xff] %v5768_v61  ;;  %v5643_v6 = vmul.f32 0.16666667, %v5579_v33  ;;  %v5580_v23 = vmul.f32 %v5516_v25, %v5324_v45  ;;  %v5517_v27 = vmin.f32 %v5453_v1, 6.0  ;;  %v5873_v45 = vld [vmem:[%s8931_s12 + $0x20] sm:$0xff] (%p7491_p3)  ;;  %5884 = vst [vmem:[%s9933_s19 + $0x88] sm:$0xff] (%p7491_p3), %v5883_v22 }
 0x358   : > { %v5454_v14 = vmax.f32 %v5390_v19, 0.0  ;;  %v5391_v29 = vadd.f32 3.0, %v5327_v26  ;;  %v5769_v50 = vmin.f32 %v5705_v51, 6.0  ;;  %v5706_v63 = vmax.f32 %v5642_v55, 0.0  ;;  %5874 = vst [vmem:[%s9933_s19 + $0x20] sm:$0xff] (%p7491_p3), %v5873_v45  ;;  %5886 = vst [vmem:[%s9933_s19 + $0x90] sm:$0xff] (%p7491_p3), %v5885_v10 }
 0x359   : > { %v5707_v9 = vmax.f32 %v5643_v6, 0.0  ;;  %v5644_v0 = vmul.f32 0.16666667, %v5580_v23  ;;  %v5581_v41 = vmul.f32 %v5517_v27, %v5325_v37  ;;  %5888 = vst [vmem:[%s9933_s19 + $0x98] sm:$0xff] (%p7491_p3), %v5887_v32  ;;  %v5889_v54 = vld [vmem:[%s8931_s12 + $0x60] sm:$0xff] (%p7491_p3)  ;;  %v5891_v37 = vld [vmem:[%s8931_s12 + $0x68] sm:$0xff] (%p7491_p3) }
 0x35a   : > { %v5518_v47 = vmin.f32 %v5454_v14, 6.0  ;;  %v5455_v3 = vmax.f32 %v5391_v29, 0.0  ;;  %5833 = vst [vmem:[%s8931_s12 + $0x398] sm:$0xff] %v5769_v50  ;;  %v5770_v31 = vmin.f32 %v5706_v63, 6.0  ;;  %v5893_v7 = vld [vmem:[%s8931_s12 + $0x70] sm:$0xff] (%p7491_p3)  ;;  %5890 = vst [vmem:[%s9933_s19 + $0xa0] sm:$0xff] (%p7491_p3), %v5889_v54 }
 0x35b   : > { %v5771_v20 = vmin.f32 %v5707_v9, 6.0  ;;  %v5708_v17 = vmax.f32 %v5644_v0, 0.0  ;;  %v5645_v59 = vmul.f32 0.16666667, %v5581_v41  ;;  %5892 = vst [vmem:[%s9933_s19 + $0xa8] sm:$0xff] (%p7491_p3), %v5891_v37  ;;  %5894 = vst [vmem:[%s9933_s19 + $0xb0] sm:$0xff] (%p7491_p3), %v5893_v7 }
 0x35c   : > { %v5582_v62 = vmul.f32 %v5518_v47, %v5326_v13  ;;  %v5519_v57 = vmin.f32 %v5455_v3, 6.0  ;;  %5834 = vst [vmem:[%s8931_s12 + $0x3b0] sm:$0xff] %v5770_v31  ;;  %v5895_v42 = vld [vmem:[%s8931_s12 + $0x78] sm:$0xff] (%p7491_p3)  ;;  %v5897_v48 = vld [vmem:[%s8931_s12 + $0x80] sm:$0xff] (%p7491_p3)  ;;  %v5899_v43 = vld [vmem:[%s8931_s12 + $0x88] sm:$0xff] (%p7491_p3) }
 0x35d   : > { %5835 = vst [vmem:[%s8931_s12 + $0x3b8] sm:$0xff] %v5771_v20  ;;  %v5772_v2 = vmin.f32 %v5708_v17, 6.0  ;;  %v5709_v39 = vmax.f32 %v5645_v59, 0.0  ;;  %5896 = vst [vmem:[%s9933_s19 + $0xb8] sm:$0xff] (%p7491_p3), %v5895_v42  ;;  %v5901_v40 = vld [vmem:[%s8931_s12 + $0x90] sm:$0xff] (%p7491_p3)  ;;  %v5903_v8 = vld [vmem:[%s8931_s12 + $0x98] sm:$0xff] (%p7491_p3) }
 0x35e   : > { %v5646_v15 = vmul.f32 0.16666667, %v5582_v62  ;;  %v5583_v38 = vmul.f32 %v5519_v57, %v5327_v26  ;;  %5898 = vst [vmem:[%s9933_s19 + $0x100] sm:$0xff] (%p7491_p3), %v5897_v48  ;;  %5900 = vst [vmem:[%s9933_s19 + $0x108] sm:$0xff] (%p7491_p3), %v5899_v43  ;;  %v5905_v49 = vld [vmem:[%s8931_s12 + $0xa0] sm:$0xff] (%p7491_p3)  ;;  %v5907_v53 = vld [vmem:[%s8931_s12 + $0xa8] sm:$0xff] (%p7491_p3) }
 0x35f   : > { %5836 = vst [vmem:[%s8931_s12 + $0x3d0] sm:$0xff] %v5772_v2  ;;  %v5773_v58 = vmin.f32 %v5709_v39, 6.0  ;;  %5902 = vst [vmem:[%s9933_s19 + $0x110] sm:$0xff] (%p7491_p3), %v5901_v40  ;;  %v5909_v44 = vld [vmem:[%s8931_s12 + $0xb0] sm:$0xff] (%p7491_p3)  ;;  %v5911_v13 = vld [vmem:[%s8931_s12 + $0xb8] sm:$0xff] (%p7491_p3) }
 0x360   : > { %v5710_v28 = vmax.f32 %v5646_v15, 0.0  ;;  %v5647_v21 = vmul.f32 0.16666667, %v5583_v38  ;;  %5904 = vst [vmem:[%s9933_s19 + $0x118] sm:$0xff] (%p7491_p3), %v5903_v8  ;;  %5906 = vst [vmem:[%s9933_s19 + $0x120] sm:$0xff] (%p7491_p3), %v5905_v49  ;;  %v5913_v46 = vld [vmem:[%s8931_s12 + $0xc0] sm:$0xff] (%p7491_p3) }
 0x361   : > { %5837 = vst [vmem:[%s8931_s12 + $0x3d8] sm:$0xff] %v5773_v58  ;;  %5908 = vst [vmem:[%s9933_s19 + $0x128] sm:$0xff] (%p7491_p3), %v5907_v53  ;;  %v5915_v5 = vld [vmem:[%s8931_s12 + $0xc8] sm:$0xff] (%p7491_p3)  ;;  %v5917_v61 = vld [vmem:[%s8931_s12 + $0xd0] sm:$0xff] (%p7491_p3) }
 0x362   : > { %v5774_v16 = vmin.f32 %v5710_v28, 6.0  ;;  %v5711_v52 = vmax.f32 %v5647_v21, 0.0  ;;  %5846 = sbr.rel (!%p7491_p3) target bundleno = 920 (0x398), region = 36  ;;  %5910 = vst [vmem:[%s9933_s19 + $0x130] sm:$0xff] (%p7491_p3), %v5909_v44  ;;  %5912 = vst [vmem:[%s9933_s19 + $0x138] sm:$0xff] (%p7491_p3), %v5911_v13  ;;  %v5919_v24 = vld [vmem:[%s8931_s12 + $0xd8] sm:$0xff] (%p7491_p3) }
 0x363   : > { %5914 = vst [vmem:[%s9933_s19 + $0x180] sm:$0xff] (%p7491_p3), %v5913_v46  ;;  %5916 = vst [vmem:[%s9933_s19 + $0x188] sm:$0xff] (%p7491_p3), %v5915_v5  ;;  %v5921_v60 = vld [vmem:[%s8931_s12 + $0xe0] sm:$0xff] (%p7491_p3)  ;;  %v5923_v33 = vld [vmem:[%s8931_s12 + $0xe8] sm:$0xff] (%p7491_p3) }
 0x364   : > { %5838 = vst [vmem:[%s8931_s12 + $0x3f0] sm:$0xff] %v5774_v16  ;;  %v5775_v34 = vmin.f32 %v5711_v52, 6.0  ;;  %5918 = vst [vmem:[%s9933_s19 + $0x190] sm:$0xff] (%p7491_p3), %v5917_v61  ;;  %v5925_v25 = vld [vmem:[%s8931_s12 + $0xf0] sm:$0xff] (%p7491_p3)  ;;  %v5927_v1 = vld [vmem:[%s8931_s12 + $0xf8] sm:$0xff] (%p7491_p3) }
 0x365   : > { %5920 = vst [vmem:[%s9933_s19 + $0x198] sm:$0xff] (%p7491_p3), %v5919_v24  ;;  %5922 = vst [vmem:[%s9933_s19 + $0x1a0] sm:$0xff] (%p7491_p3), %v5921_v60  ;;  %v5929_v19 = vld [vmem:[%s8931_s12 + $0x100] sm:$0xff] (%p7491_p3)  ;;  %v5931_v26 = vld [vmem:[%s8931_s12 + $0x108] sm:$0xff] (%p7491_p3) }
 0x366   : > { %5839 = vst [vmem:[%s8931_s12 + $0x3f8] sm:$0xff] %v5775_v34  ;;  %5924 = vst [vmem:[%s9933_s19 + $0x1a8] sm:$0xff] (%p7491_p3), %v5923_v33  ;;  %v5933_v51 = vld [vmem:[%s8931_s12 + $0x110] sm:$0xff] (%p7491_p3)  ;;  %v5935_v55 = vld [vmem:[%s8931_s12 + $0x118] sm:$0xff] (%p7491_p3) }
 0x367   : > { %5926 = vst [vmem:[%s9933_s19 + $0x1b0] sm:$0xff] %v5925_v25  ;;  %5928 = vst [vmem:[%s9933_s19 + $0x1b8] sm:$0xff] %v5927_v1  ;;  %v5937_v6 = vld [vmem:[%s8931_s12 + $0x120] sm:$0xff]  ;;  %v5939_v23 = vld [vmem:[%s8931_s12 + $0x128] sm:$0xff] }
 0x368   : > { %5930 = vst [vmem:[%s9933_s19 + $0x200] sm:$0xff] %v5929_v19  ;;  %5932 = vst [vmem:[%s9933_s19 + $0x208] sm:$0xff] %v5931_v26  ;;  %v5941_v27 = vld [vmem:[%s8931_s12 + $0x130] sm:$0xff]  ;;  %v5943_v14 = vld [vmem:[%s8931_s12 + $0x138] sm:$0xff] }
 0x369   : > { %5934 = vst [vmem:[%s9933_s19 + $0x210] sm:$0xff] %v5933_v51  ;;  %5936 = vst [vmem:[%s9933_s19 + $0x218] sm:$0xff] %v5935_v55  ;;  %v5945_v29 = vld [vmem:[%s8931_s12 + $0x140] sm:$0xff]  ;;  %v5947_v50 = vld [vmem:[%s8931_s12 + $0x148] sm:$0xff] }
 0x36a   : > { %5938 = vst [vmem:[%s9933_s19 + $0x220] sm:$0xff] %v5937_v6  ;;  %5940 = vst [vmem:[%s9933_s19 + $0x228] sm:$0xff] %v5939_v23  ;;  %v5949_v63 = vld [vmem:[%s8931_s12 + $0x150] sm:$0xff]  ;;  %v5951_v9 = vld [vmem:[%s8931_s12 + $0x158] sm:$0xff] }
 0x36b   : > { %5942 = vst [vmem:[%s9933_s19 + $0x230] sm:$0xff] %v5941_v27  ;;  %5944 = vst [vmem:[%s9933_s19 + $0x238] sm:$0xff] %v5943_v14  ;;  %v5953_v0 = vld [vmem:[%s8931_s12 + $0x160] sm:$0xff]  ;;  %v5955_v41 = vld [vmem:[%s8931_s12 + $0x168] sm:$0xff] }
 0x36c   : > { %5946 = vst [vmem:[%s9933_s19 + $0x280] sm:$0xff] %v5945_v29  ;;  %5948 = vst [vmem:[%s9933_s19 + $0x288] sm:$0xff] %v5947_v50  ;;  %v5957_v47 = vld [vmem:[%s8931_s12 + $0x170] sm:$0xff]  ;;  %v5959_v3 = vld [vmem:[%s8931_s12 + $0x178] sm:$0xff] }
 0x36d   : > { %5950 = vst [vmem:[%s9933_s19 + $0x290] sm:$0xff] %v5949_v63  ;;  %5952 = vst [vmem:[%s9933_s19 + $0x298] sm:$0xff] %v5951_v9  ;;  %v5961_v31 = vld [vmem:[%s8931_s12 + $0x180] sm:$0xff]  ;;  %v5963_v20 = vld [vmem:[%s8931_s12 + $0x188] sm:$0xff] }
 0x36e   : > { %5954 = vst [vmem:[%s9933_s19 + $0x2a0] sm:$0xff] %v5953_v0  ;;  %5956 = vst [vmem:[%s9933_s19 + $0x2a8] sm:$0xff] %v5955_v41  ;;  %v5965_v17 = vld [vmem:[%s8931_s12 + $0x190] sm:$0xff]  ;;  %v5967_v59 = vld [vmem:[%s8931_s12 + $0x198] sm:$0xff] }
 0x36f   : > { %5958 = vst [vmem:[%s9933_s19 + $0x2b0] sm:$0xff] %v5957_v47  ;;  %5960 = vst [vmem:[%s9933_s19 + $0x2b8] sm:$0xff] %v5959_v3  ;;  %v5969_v62 = vld [vmem:[%s8931_s12 + $0x1a0] sm:$0xff]  ;;  %v5971_v57 = vld [vmem:[%s8931_s12 + $0x1a8] sm:$0xff] }
 0x370   : > { %5962 = vst [vmem:[%s9933_s19 + $0x300] sm:$0xff] %v5961_v31  ;;  %5964 = vst [vmem:[%s9933_s19 + $0x308] sm:$0xff] %v5963_v20  ;;  %v5973_v2 = vld [vmem:[%s8931_s12 + $0x1b0] sm:$0xff]  ;;  %v5975_v39 = vld [vmem:[%s8931_s12 + $0x1b8] sm:$0xff] }
 0x371   : > { %5966 = vst [vmem:[%s9933_s19 + $0x310] sm:$0xff] %v5965_v17  ;;  %5968 = vst [vmem:[%s9933_s19 + $0x318] sm:$0xff] %v5967_v59  ;;  %v5977_v15 = vld [vmem:[%s8931_s12 + $0x1c0] sm:$0xff]  ;;  %v5979_v38 = vld [vmem:[%s8931_s12 + $0x1c8] sm:$0xff] }
 0x372   : > { %5970 = vst [vmem:[%s9933_s19 + $0x320] sm:$0xff] %v5969_v62  ;;  %5972 = vst [vmem:[%s9933_s19 + $0x328] sm:$0xff] %v5971_v57  ;;  %v5981_v58 = vld [vmem:[%s8931_s12 + $0x1d0] sm:$0xff]  ;;  %v5983_v28 = vld [vmem:[%s8931_s12 + $0x1d8] sm:$0xff] }
 0x373   : > { %5974 = vst [vmem:[%s9933_s19 + $0x330] sm:$0xff] %v5973_v2  ;;  %5976 = vst [vmem:[%s9933_s19 + $0x338] sm:$0xff] %v5975_v39  ;;  %v5985_v21 = vld [vmem:[%s8931_s12 + $0x1e0] sm:$0xff]  ;;  %v5987_v16 = vld [vmem:[%s8931_s12 + $0x1e8] sm:$0xff] }
 0x374   : > { %5978 = vst [vmem:[%s9933_s19 + $0x380] sm:$0xff] %v5977_v15  ;;  %5980 = vst [vmem:[%s9933_s19 + $0x388] sm:$0xff] %v5979_v38  ;;  %v5989_v52 = vld [vmem:[%s8931_s12 + $0x1f0] sm:$0xff]  ;;  %v5991_v34 = vld [vmem:[%s8931_s12 + $0x1f8] sm:$0xff] }
 0x375   : > { %5982 = vst [vmem:[%s9933_s19 + $0x390] sm:$0xff] %v5981_v58  ;;  %5984 = vst [vmem:[%s9933_s19 + $0x398] sm:$0xff] %v5983_v28  ;;  %v5993_v4 = vld [vmem:[%s8931_s12 + $0x200] sm:$0xff]  ;;  %v5995_v30 = vld [vmem:[%s8931_s12 + $0x208] sm:$0xff] }
 0x376   : > { %5986 = vst [vmem:[%s9933_s19 + $0x3a0] sm:$0xff] %v5985_v21  ;;  %5988 = vst [vmem:[%s9933_s19 + $0x3a8] sm:$0xff] %v5987_v16  ;;  %v5997_v36 = vld [vmem:[%s8931_s12 + $0x210] sm:$0xff]  ;;  %v5999_v11 = vld [vmem:[%s8931_s12 + $0x218] sm:$0xff] }
 0x377   : > { %5990 = vst [vmem:[%s9933_s19 + $0x3b0] sm:$0xff] %v5989_v52  ;;  %5992 = vst [vmem:[%s9933_s19 + $0x3b8] sm:$0xff] %v5991_v34  ;;  %v6001_v45 = vld [vmem:[%s8931_s12 + $0x220] sm:$0xff]  ;;  %v6005_v56 = vld [vmem:[%s8931_s12 + $0x230] sm:$0xff] }
 0x378   : > { %5994 = vst [vmem:[%s9933_s19 + $0x400] sm:$0xff] %v5993_v4  ;;  %5996 = vst [vmem:[%s9933_s19 + $0x408] sm:$0xff] %v5995_v30  ;;  %v6007_v12 = vld [vmem:[%s8931_s12 + $0x238] sm:$0xff]  ;;  %v6009_v35 = vld [vmem:[%s8931_s12 + $0x240] sm:$0xff] }
 0x379   : > { %5998 = vst [vmem:[%s9933_s19 + $0x410] sm:$0xff] %v5997_v36  ;;  %6000 = vst [vmem:[%s9933_s19 + $0x418] sm:$0xff] %v5999_v11  ;;  %v6011_v22 = vld [vmem:[%s8931_s12 + $0x248] sm:$0xff]  ;;  %v6013_v10 = vld [vmem:[%s8931_s12 + $0x250] sm:$0xff] }
 0x37a   : > { %6002 = vst [vmem:[%s9933_s19 + $0x420] sm:$0xff] %v6001_v45  ;;  %6004 = vst [vmem:[%s9933_s19 + $0x428] sm:$0xff] %v6003_v18  ;;  %v6015_v32 = vld [vmem:[%s8931_s12 + $0x258] sm:$0xff]  ;;  %v6017_v54 = vld [vmem:[%s8931_s12 + $0x260] sm:$0xff] }
 0x37b   : > { %6006 = vst [vmem:[%s9933_s19 + $0x430] sm:$0xff] %v6005_v56  ;;  %6008 = vst [vmem:[%s9933_s19 + $0x438] sm:$0xff] %v6007_v12  ;;  %v6019_v37 = vld [vmem:[%s8931_s12 + $0x268] sm:$0xff]  ;;  %v6021_v7 = vld [vmem:[%s8931_s12 + $0x270] sm:$0xff] }
 0x37c   : > { %6010 = vst [vmem:[%s9933_s19 + $0x480] sm:$0xff] %v6009_v35  ;;  %6012 = vst [vmem:[%s9933_s19 + $0x488] sm:$0xff] %v6011_v22  ;;  %v6023_v42 = vld [vmem:[%s8931_s12 + $0x278] sm:$0xff]  ;;  %v6025_v48 = vld [vmem:[%s8931_s12 + $0x280] sm:$0xff] }
 0x37d   : > { %6014 = vst [vmem:[%s9933_s19 + $0x490] sm:$0xff] %v6013_v10  ;;  %6016 = vst [vmem:[%s9933_s19 + $0x498] sm:$0xff] %v6015_v32  ;;  %v6027_v43 = vld [vmem:[%s8931_s12 + $0x288] sm:$0xff]  ;;  %v6029_v40 = vld [vmem:[%s8931_s12 + $0x290] sm:$0xff] }
 0x37e   : > { %6018 = vst [vmem:[%s9933_s19 + $0x4a0] sm:$0xff] %v6017_v54  ;;  %6020 = vst [vmem:[%s9933_s19 + $0x4a8] sm:$0xff] %v6019_v37  ;;  %v6031_v8 = vld [vmem:[%s8931_s12 + $0x298] sm:$0xff]  ;;  %v6033_v49 = vld [vmem:[%s8931_s12 + $0x2a0] sm:$0xff] }
 0x37f   : > { %6022 = vst [vmem:[%s9933_s19 + $0x4b0] sm:$0xff] %v6021_v7  ;;  %6024 = vst [vmem:[%s9933_s19 + $0x4b8] sm:$0xff] %v6023_v42  ;;  %v6035_v53 = vld [vmem:[%s8931_s12 + $0x2a8] sm:$0xff]  ;;  %v6037_v44 = vld [vmem:[%s8931_s12 + $0x2b0] sm:$0xff] }
 0x380   : > { %6026 = vst [vmem:[%s9933_s19 + $0x500] sm:$0xff] %v6025_v48  ;;  %6028 = vst [vmem:[%s9933_s19 + $0x508] sm:$0xff] %v6027_v43  ;;  %v6039_v13 = vld [vmem:[%s8931_s12 + $0x2b8] sm:$0xff]  ;;  %v6041_v46 = vld [vmem:[%s8931_s12 + $0x2c0] sm:$0xff] }
 0x381   : > { %6030 = vst [vmem:[%s9933_s19 + $0x510] sm:$0xff] %v6029_v40  ;;  %6032 = vst [vmem:[%s9933_s19 + $0x518] sm:$0xff] %v6031_v8  ;;  %v6043_v5 = vld [vmem:[%s8931_s12 + $0x2c8] sm:$0xff]  ;;  %v6045_v61 = vld [vmem:[%s8931_s12 + $0x2d0] sm:$0xff] }
 0x382   : > { %6034 = vst [vmem:[%s9933_s19 + $0x520] sm:$0xff] %v6033_v49  ;;  %6036 = vst [vmem:[%s9933_s19 + $0x528] sm:$0xff] %v6035_v53  ;;  %v6047_v24 = vld [vmem:[%s8931_s12 + $0x2d8] sm:$0xff]  ;;  %v6049_v60 = vld [vmem:[%s8931_s12 + $0x2e0] sm:$0xff] }
 0x383   : > { %6038 = vst [vmem:[%s9933_s19 + $0x530] sm:$0xff] %v6037_v44  ;;  %6040 = vst [vmem:[%s9933_s19 + $0x538] sm:$0xff] %v6039_v13  ;;  %v6051_v33 = vld [vmem:[%s8931_s12 + $0x2e8] sm:$0xff]  ;;  %v6053_v25 = vld [vmem:[%s8931_s12 + $0x2f0] sm:$0xff] }
 0x384   : > { %6042 = vst [vmem:[%s9933_s19 + $0x580] sm:$0xff] %v6041_v46  ;;  %6044 = vst [vmem:[%s9933_s19 + $0x588] sm:$0xff] %v6043_v5  ;;  %v6055_v1 = vld [vmem:[%s8931_s12 + $0x2f8] sm:$0xff]  ;;  %v6057_v19 = vld [vmem:[%s8931_s12 + $0x300] sm:$0xff] }
 0x385   : > { %6046 = vst [vmem:[%s9933_s19 + $0x590] sm:$0xff] %v6045_v61  ;;  %6048 = vst [vmem:[%s9933_s19 + $0x598] sm:$0xff] %v6047_v24  ;;  %v6059_v26 = vld [vmem:[%s8931_s12 + $0x308] sm:$0xff]  ;;  %v6061_v51 = vld [vmem:[%s8931_s12 + $0x310] sm:$0xff] }
 0x386   : > { %6050 = vst [vmem:[%s9933_s19 + $0x5a0] sm:$0xff] %v6049_v60  ;;  %6052 = vst [vmem:[%s9933_s19 + $0x5a8] sm:$0xff] %v6051_v33  ;;  %v6063_v55 = vld [vmem:[%s8931_s12 + $0x318] sm:$0xff]  ;;  %v6065_v6 = vld [vmem:[%s8931_s12 + $0x320] sm:$0xff] }
 0x387   : > { %6054 = vst [vmem:[%s9933_s19 + $0x5b0] sm:$0xff] %v6053_v25  ;;  %6056 = vst [vmem:[%s9933_s19 + $0x5b8] sm:$0xff] %v6055_v1  ;;  %v6067_v23 = vld [vmem:[%s8931_s12 + $0x328] sm:$0xff]  ;;  %v6069_v27 = vld [vmem:[%s8931_s12 + $0x330] sm:$0xff] }
 0x388   : > { %6058 = vst [vmem:[%s9933_s19 + $0x600] sm:$0xff] %v6057_v19  ;;  %6060 = vst [vmem:[%s9933_s19 + $0x608] sm:$0xff] %v6059_v26  ;;  %v6071_v14 = vld [vmem:[%s8931_s12 + $0x338] sm:$0xff]  ;;  %v6073_v29 = vld [vmem:[%s8931_s12 + $0x340] sm:$0xff] }
 0x389   : > { %6062 = vst [vmem:[%s9933_s19 + $0x610] sm:$0xff] %v6061_v51  ;;  %6064 = vst [vmem:[%s9933_s19 + $0x618] sm:$0xff] %v6063_v55  ;;  %v6075_v50 = vld [vmem:[%s8931_s12 + $0x348] sm:$0xff]  ;;  %v6077_v63 = vld [vmem:[%s8931_s12 + $0x350] sm:$0xff] }
 0x38a   : > { %6066 = vst [vmem:[%s9933_s19 + $0x620] sm:$0xff] %v6065_v6  ;;  %6068 = vst [vmem:[%s9933_s19 + $0x628] sm:$0xff] %v6067_v23  ;;  %v6079_v9 = vld [vmem:[%s8931_s12 + $0x358] sm:$0xff]  ;;  %v6081_v0 = vld [vmem:[%s8931_s12 + $0x360] sm:$0xff] }
 0x38b   : > { %6070 = vst [vmem:[%s9933_s19 + $0x630] sm:$0xff] %v6069_v27  ;;  %6072 = vst [vmem:[%s9933_s19 + $0x638] sm:$0xff] %v6071_v14  ;;  %v6083_v41 = vld [vmem:[%s8931_s12 + $0x368] sm:$0xff]  ;;  %v6085_v47 = vld [vmem:[%s8931_s12 + $0x370] sm:$0xff] }
 0x38c   : > { %6074 = vst [vmem:[%s9933_s19 + $0x680] sm:$0xff] %v6073_v29  ;;  %6076 = vst [vmem:[%s9933_s19 + $0x688] sm:$0xff] %v6075_v50  ;;  %v6087_v3 = vld [vmem:[%s8931_s12 + $0x378] sm:$0xff]  ;;  %v6089_v31 = vld [vmem:[%s8931_s12 + $0x380] sm:$0xff] }
 0x38d   : > { %6078 = vst [vmem:[%s9933_s19 + $0x690] sm:$0xff] %v6077_v63  ;;  %6080 = vst [vmem:[%s9933_s19 + $0x698] sm:$0xff] %v6079_v9  ;;  %v6091_v20 = vld [vmem:[%s8931_s12 + $0x388] sm:$0xff]  ;;  %v6093_v17 = vld [vmem:[%s8931_s12 + $0x390] sm:$0xff] }
 0x38e   : > { %6082 = vst [vmem:[%s9933_s19 + $0x6a0] sm:$0xff] %v6081_v0  ;;  %6084 = vst [vmem:[%s9933_s19 + $0x6a8] sm:$0xff] %v6083_v41  ;;  %v6095_v59 = vld [vmem:[%s8931_s12 + $0x398] sm:$0xff]  ;;  %v6097_v62 = vld [vmem:[%s8931_s12 + $0x3a0] sm:$0xff] }
 0x38f   : > { %6086 = vst [vmem:[%s9933_s19 + $0x6b0] sm:$0xff] %v6085_v47  ;;  %6088 = vst [vmem:[%s9933_s19 + $0x6b8] sm:$0xff] %v6087_v3  ;;  %v6099_v57 = vld [vmem:[%s8931_s12 + $0x3a8] sm:$0xff]  ;;  %v6101_v2 = vld [vmem:[%s8931_s12 + $0x3b0] sm:$0xff] }
 0x390   : > { %6090 = vst [vmem:[%s9933_s19 + $0x700] sm:$0xff] %v6089_v31  ;;  %6092 = vst [vmem:[%s9933_s19 + $0x708] sm:$0xff] %v6091_v20  ;;  %v6103_v39 = vld [vmem:[%s8931_s12 + $0x3b8] sm:$0xff]  ;;  %v6105_v15 = vld [vmem:[%s8931_s12 + $0x3c0] sm:$0xff] }
 0x391   : > { %6094 = vst [vmem:[%s9933_s19 + $0x710] sm:$0xff] %v6093_v17  ;;  %6096 = vst [vmem:[%s9933_s19 + $0x718] sm:$0xff] %v6095_v59  ;;  %v6107_v38 = vld [vmem:[%s8931_s12 + $0x3c8] sm:$0xff]  ;;  %v6109_v58 = vld [vmem:[%s8931_s12 + $0x3d0] sm:$0xff] }
 0x392   : > { %6098 = vst [vmem:[%s9933_s19 + $0x720] sm:$0xff] %v6097_v62  ;;  %6100 = vst [vmem:[%s9933_s19 + $0x728] sm:$0xff] %v6099_v57  ;;  %v6111_v28 = vld [vmem:[%s8931_s12 + $0x3d8] sm:$0xff]  ;;  %v6113_v21 = vld [vmem:[%s8931_s12 + $0x3e0] sm:$0xff] }
 0x393   : > { %6102 = vst [vmem:[%s9933_s19 + $0x730] sm:$0xff] %v6101_v2  ;;  %6104 = vst [vmem:[%s9933_s19 + $0x738] sm:$0xff] %v6103_v39  ;;  %v6115_v16 = vld [vmem:[%s8931_s12 + $0x3e8] sm:$0xff]  ;;  %v6117_v52 = vld [vmem:[%s8931_s12 + $0x3f0] sm:$0xff] }
 0x394   : > { %6106 = vst [vmem:[%s9933_s19 + $0x780] sm:$0xff] %v6105_v15  ;;  %6108 = vst [vmem:[%s9933_s19 + $0x788] sm:$0xff] %v6107_v38  ;;  %v6119_v34 = vld [vmem:[%s8931_s12 + $0x3f8] sm:$0xff] }
 0x395   : > { %6110 = vst [vmem:[%s9933_s19 + $0x790] sm:$0xff] %v6109_v58  ;;  %6112 = vst [vmem:[%s9933_s19 + $0x798] sm:$0xff] %v6111_v28 }
 0x396   : > { %6114 = vst [vmem:[%s9933_s19 + $0x7a0] sm:$0xff] %v6113_v21  ;;  %6116 = vst [vmem:[%s9933_s19 + $0x7a8] sm:$0xff] %v6115_v16 }
 0x397   : > { %6118 = vst [vmem:[%s9933_s19 + $0x7b0] sm:$0xff] %v6117_v52  ;;  %6120 = vst [vmem:[%s9933_s19 + $0x7b8] sm:$0xff] %v6119_v34 }
 0x398 PF: > { %s13_s16 = sadd.s32 1, %s7437_s16   ;;  %s10541_s12 = smov %s7425_s13 }
 0x399   : > { %p10_p8 = scmp.ge.s32.totalorder %s13_s16, 4   ;;  %s10542_s13 = smov %s7500_s22 }
 0x39a   : > { %s10543_s14 = smov %s7433_s15  ;;  %s10544_s15 = smov %s10546_s18 }
 0x39b   :  { %12 = sbr.rel (!%p10_p8) target bundleno = 3 (0x3), region = 86 }

</bundles_post_ra>
